<compile_context>
chip_gen: v5e
topology: v5e:2x2
jax: 0.10.0
libtpu: 0.0.40
codegen_flags: <defaults>
</compile_context>

<pallas_src>
import jax
import jax.numpy as jnp
from jax.experimental import pallas as pl
from jax.experimental.pallas import tpu as pltpu

_VMEM = pl.BlockSpec(memory_space=pltpu.MemorySpace.VMEM)
_K = 3                      # conv kernel size
_STRIDES = (2, 1, 1, 1)     # Encoder conv strides


def _conv_out(h_in, padding, kernel_size, stride):
    return int((h_in + 2.0 * padding - (kernel_size - 1.0) - 1.0) / stride + 1.0)


def _expand_conv_weight(w, stride, w_in):
    """Expand w[Cout,Cin,3,3] -> [3, W_in*Cin, W_out*Cout] per-kh matmul mats.

    WW[kh, w*Cin+ci, wo*Cout+co] = w[co, ci, kh, w - wo*stride]  (0 outside the
    3-tap window), so that for an input-row slab A[b, w*Cin+ci] the product
    A @ WW[kh] yields the kh-contribution of the conv output row.
    """
    cout, cin, k, _ = w.shape
    wo_n = (w_in - k) // stride + 1
    win_idx = jnp.arange(w_in)[:, None]          # [W_in, 1]
    wo_idx = jnp.arange(wo_n)[None, :]           # [1, Wo]
    mats = []
    for kh in range(k):
        m = jnp.zeros((w_in, cin, wo_n, cout), jnp.float32)
        for kw in range(k):
            ind = (win_idx == wo_idx * stride + kw).astype(jnp.float32)  # [W_in, Wo]
            wk = w[:, :, kh, kw].T                                       # [Cin, Cout]
            m = m + ind[:, None, :, None] * wk[None, :, None, :]
        mats.append(m.reshape(w_in * cin, wo_n * cout))
    return jnp.stack(mats, axis=0)               # [3, W_in*Cin, Wo*Cout]


def _merge_q(q1, q2, feat, sd, ad, use_state_input):
    """Merge two independent Q MLPs into one double-width MLP (block-diag)."""
    w1_1, b1_1, w2_1, b2_1, w3_1, b3_1 = q1
    w1_2, b1_2, w2_2, b2_2, w3_2, b3_2 = q2
    h = w2_1.shape[0]
    w1 = jnp.concatenate([w1_1, w1_2], axis=1)                 # [latent, 2h]
    if use_state_input:
        w1f, w1s, w1a = w1[:feat], w1[feat:feat + sd], w1[feat + sd:]
    else:
        w1f, w1a = w1[:feat], w1[feat:]
        w1s = jnp.zeros((sd, 2 * h), jnp.float32)              # state contributes 0
    qb1 = jnp.concatenate([b1_1, b1_2], axis=1)
    zh = jnp.zeros((h, h), jnp.float32)
    w2 = jnp.concatenate([jnp.concatenate([w2_1, zh], 1),
                          jnp.concatenate([zh, w2_2], 1)], 0)  # block-diag [2h,2h]
    qb2 = jnp.concatenate([b2_1, b2_2], axis=1)
    z1 = jnp.zeros((h, 1), jnp.float32)
    w3 = jnp.concatenate([jnp.concatenate([w3_1, z1], 1),
                          jnp.concatenate([z1, w3_2], 1)], 0)  # block-diag [2h,2]
    qb3 = jnp.concatenate([b3_1, b3_2], axis=1)
    return w1f, w1s, w1a, qb1, w2, qb2, w3, qb3


# ---------------------------------------------------------------------------
# The single fused kernel: conv trunk -> head (Linear+LN+tanh) -> merged Q MLP
# ---------------------------------------------------------------------------
def _make_critic_kernel(h_ins, h_outs, strides, k):
    n_layers = len(h_outs)

    def kernel(obs_ref, state_ref, action_ref,
               ww0, cb0, ww1, cb1, ww2, cb2, ww3, cb3,
               hw_ref, hb_ref, lng_ref, lnb_ref,
               w1f_ref, w1s_ref, w1a_ref, qb1_ref,
               w2_ref, qb2_ref, w3_ref, qb3_ref,
               q_ref):
        wws = (ww0, ww1, ww2, ww3)
        cbs = (cb0, cb1, cb2, cb3)

        # ---- conv trunk: activations as per-row slabs [B, W*C] ----
        rows = [obs_ref[h] for h in range(h_ins[0])]
        for li in range(n_layers):
            s = strides[li]
            ww, cb = wws[li], cbs[li]
            new_rows = []
            for ho in range(h_outs[li]):
                y = cb[...]                                   # [1, Wo*Cout]
                for kh in range(k):
                    y = y + jnp.dot(rows[ho * s + kh], ww[kh],
                                    preferred_element_type=jnp.float32)
                new_rows.append(jnp.maximum(y, 0.0))          # conv + bias + ReLU
            rows = new_rows

        # ---- encoder head: Linear -> LayerNorm(eps=1e-5) -> tanh ----
        h_feat = rows[0] if len(rows) == 1 else jnp.concatenate(rows, axis=-1)
        z = jnp.dot(h_feat, hw_ref[...],
                    preferred_element_type=jnp.float32) + hb_ref[...]
        mu = jnp.mean(z, axis=-1, keepdims=True)
        var = jnp.mean((z - mu) * (z - mu), axis=-1, keepdims=True)
        z = (z - mu) * jax.lax.rsqrt(var + 1e-5) * lng_ref[...] + lnb_ref[...]
        obs_feat = jnp.tanh(z)

        # ---- torch.repeat_interleave of a size-1 batch dim == broadcast ----
        n = q_ref.shape[0]
        if obs_feat.shape[0] != n:
            obs_feat = jnp.broadcast_to(obs_feat, (n, obs_feat.shape[1]))
        st = state_ref[...]
        if st.shape[0] != n:
            st = jnp.broadcast_to(st, (n, st.shape[1]))
        act = action_ref[...]

        # ---- merged double-Q MLP (hidden_depth = 2) ----
        h1 = jnp.maximum(
            jnp.dot(obs_feat, w1f_ref[...], preferred_element_type=jnp.float32)
            + jnp.dot(st, w1s_ref[...], preferred_element_type=jnp.float32)
            + jnp.dot(act, w1a_ref[...], preferred_element_type=jnp.float32)
            + qb1_ref[...], 0.0)
        h2 = jnp.maximum(
            jnp.dot(h1, w2_ref[...], preferred_element_type=jnp.float32)
            + qb2_ref[...], 0.0)
        q_ref[...] = (jnp.dot(h2, w3_ref[...], preferred_element_type=jnp.float32)
                      + qb3_ref[...])

    return kernel


# ---------------------------------------------------------------------------
# Wrapper: full Critic forward pass (one pallas_call)
# ---------------------------------------------------------------------------
def critic_forward(params, obs, state, action, use_state_input=True):
    """obs: [B,Cin,H,W] f32 (NCHW), state: [B|1, Sd], action: [n, Ad]."""
    B, Cin, H, W = obs.shape
    n = action.shape[0]
    assert obs.shape[0] in (n, 1)
    assert state.shape[0] in (n, 1)
    k = _K

    # expand conv weights into per-kh row-matmul matrices (wrapper side, tiny)
    wws, cbs, h_ins, h_outs = [], [], [], []
    h_in, w_in, cin = H, W, Cin
    for (w, b), s in zip(params["convs"], _STRIDES):
        cout = w.shape[0]
        ho = (h_in - k) // s + 1
        wo = (w_in - k) // s + 1
        wws.append(_expand_conv_weight(w, s, w_in))
        cbs.append(jnp.tile(b, wo)[None, :])      # bias per (wo, co) lane
        h_ins.append(h_in)
        h_outs.append(ho)
        h_in, w_in, cin = ho, wo, cout
    od, cout_last = h_in, cin

    # obs NCHW -> per-row slabs [H, B, W*Cin]  (one-time input layout plumbing)
    obs_rows = jnp.transpose(obs, (2, 0, 3, 1)).reshape(H, B, W * Cin)

    # fold the NCHW flatten order of the head into the head weight rows
    feat = params["head_w"].shape[1]
    hw = params["head_w"].reshape(cout_last, od, od, feat)
    hw = jnp.transpose(hw, (1, 2, 0, 3)).reshape(od * od * cout_last, feat)

    # merge Q1 / Q2 into one double-width MLP
    sd, ad = state.shape[1], action.shape[1]
    w1f, w1s, w1a, qb1, w2, qb2, w3, qb3 = _merge_q(
        params["q1"], params["q2"], feat, sd, ad, use_state_input)

    ins = [obs_rows, state, action,
           wws[0], cbs[0], wws[1], cbs[1], wws[2], cbs[2], wws[3], cbs[3],
           hw, params["head_b"], params["ln_g"], params["ln_b"],
           w1f, w1s, w1a, qb1, w2, qb2, w3, qb3]

    kernel = _make_critic_kernel(tuple(h_ins), tuple(h_outs), _STRIDES, k)
    q = pl.pallas_call(
        kernel,
        out_shape=jax.ShapeDtypeStruct((n, 2), jnp.float32),
        in_specs=[_VMEM] * len(ins),
        out_specs=_VMEM,
    )(*ins)
    # TODO(synk): at large batch, add a 1-D "parallel" grid over the batch dim
    # (BlockSpecs over B/n) so v7x's two TensorCores shard it; pointless at B=2.
    return q[:, 0:1], q[:, 1:2]


# ---------------------------------------------------------------------------
# Deterministic parameter initialization (shapes follow the PyTorch __init__)
# ---------------------------------------------------------------------------
def init_params(key, image_obs_shape, state_dim, action_dim, feature_dim,
                hidden_dim, use_state_input=True):
    H, W, Cin = image_obs_shape          # module stores obs_shape as (H, W, C)
    nf = 32
    keys = iter(jax.random.split(key, 48))

    def dense(fan_in, fan_out):
        w = jax.random.normal(next(keys), (fan_in, fan_out), jnp.float32) / jnp.sqrt(
            jnp.float32(fan_in))
        b = 0.01 * jax.random.normal(next(keys), (1, fan_out), jnp.float32)
        return w, b

    convs = []
    cin = Cin
    for _ in range(4):
        w = jax.random.normal(next(keys), (nf, cin, 3, 3), jnp.float32) / jnp.sqrt(
            jnp.float32(cin * 9))
        b = 0.01 * jax.random.normal(next(keys), (nf,), jnp.float32)
        convs.append((w, b))
        cin = nf

    od = H
    for s in _STRIDES:
        od = _conv_out(od, 0, 3, s)
    head_w, head_b = dense(nf * od * od, feature_dim)
    ln_g = jnp.ones((1, feature_dim), jnp.float32)
    ln_b = jnp.zeros((1, feature_dim), jnp.float32)

    latent = feature_dim + (state_dim if use_state_input else 0) + action_dim

    def q_params():                      # Linear, ReLU, Linear, ReLU, Linear(->1)
        w1, b1 = dense(latent, hidden_dim)
        w2, b2 = dense(hidden_dim, hidden_dim)
        w3, b3 = dense(hidden_dim, 1)
        return (w1, b1, w2, b2, w3, b3)

    return {"convs": convs, "head_w": head_w, "head_b": head_b,
            "ln_g": ln_g, "ln_b": ln_b, "q1": q_params(), "q2": q_params()}


if __name__ == "__main__":
    B = 2
    image_obs_shape = (16, 16, 4)        # (H, W, Cin): spatial 16 -> 7 -> 5 -> 3 -> 1
    state_dim, action_dim = 6, 4
    feature_dim, hidden_dim = 32, 32     # hidden_depth = 2 (fused inside the kernel)
    # TODO(synk): detach_encoder (stop-gradient) and the self.outputs logging dict
    # are training-time features with no forward-pass compute; not represented.

    key = jax.random.PRNGKey(0)
    kp, ko, ks, ka = jax.random.split(key, 4)
    params = init_params(kp, image_obs_shape, state_dim, action_dim,
                         feature_dim, hidden_dim, use_state_input=True)

    obs = jax.random.normal(
        ko, (B, image_obs_shape[2], image_obs_shape[0], image_obs_shape[1]),
        jnp.float32)                      # NCHW, as fed to nn.Conv2d
    state = jax.random.normal(ks, (B, state_dim), jnp.float32)
    action = jax.random.normal(ka, (B, action_dim), jnp.float32)

    fwd = jax.jit(critic_forward)
    q1, q2 = fwd(params, obs, state, action)
    jax.block_until_ready((q1, q2))
    assert q1.shape == (B, 1) and q2.shape == (B, 1)
    assert q1.dtype == jnp.float32 and q2.dtype == jnp.float32
    print("KERNEL_OK")
</pallas_src>

<mosaic_0001>
module attributes {stable_mosaic.version = 11 : i64} {
  func.func @kernel(%arg0: memref<16x2x64xf32, #tpu.memory_space<vmem>>, %arg1: memref<2x6xf32, #tpu.memory_space<vmem>>, %arg2: memref<2x4xf32, #tpu.memory_space<vmem>>, %arg3: memref<3x64x224xf32, #tpu.memory_space<vmem>>, %arg4: memref<1x224xf32, #tpu.memory_space<vmem>>, %arg5: memref<3x224x160xf32, #tpu.memory_space<vmem>>, %arg6: memref<1x160xf32, #tpu.memory_space<vmem>>, %arg7: memref<3x160x96xf32, #tpu.memory_space<vmem>>, %arg8: memref<1x96xf32, #tpu.memory_space<vmem>>, %arg9: memref<3x96x32xf32, #tpu.memory_space<vmem>>, %arg10: memref<1x32xf32, #tpu.memory_space<vmem>>, %arg11: memref<32x32xf32, #tpu.memory_space<vmem>>, %arg12: memref<1x32xf32, #tpu.memory_space<vmem>>, %arg13: memref<1x32xf32, #tpu.memory_space<vmem>>, %arg14: memref<1x32xf32, #tpu.memory_space<vmem>>, %arg15: memref<32x64xf32, #tpu.memory_space<vmem>>, %arg16: memref<6x64xf32, #tpu.memory_space<vmem>>, %arg17: memref<4x64xf32, #tpu.memory_space<vmem>>, %arg18: memref<1x64xf32, #tpu.memory_space<vmem>>, %arg19: memref<64x64xf32, #tpu.memory_space<vmem>>, %arg20: memref<1x64xf32, #tpu.memory_space<vmem>>, %arg21: memref<64x2xf32, #tpu.memory_space<vmem>>, %arg22: memref<1x2xf32, #tpu.memory_space<vmem>>, %arg23: memref<2x2xf32, #tpu.memory_space<vmem>>) attributes {dimension_semantics = [], scalar_prefetch = 0 : i64, scratch_operands = 0 : i64, tpu.core_type = #tpu.core_type<tc>} {
    %c0 = arith.constant 0 : index
    %c0_0 = arith.constant 0 : index
    %c0_1 = arith.constant 0 : index
    %0 = vector.load %arg0[%c0, %c0_0, %c0_1] : memref<16x2x64xf32, #tpu.memory_space<vmem>>, vector<1x2x64xf32>
    %1 = vector.shape_cast %0 : vector<1x2x64xf32> to vector<2x64xf32>
    %c1 = arith.constant 1 : index
    %c0_2 = arith.constant 0 : index
    %c0_3 = arith.constant 0 : index
    %2 = vector.load %arg0[%c1, %c0_2, %c0_3] : memref<16x2x64xf32, #tpu.memory_space<vmem>>, vector<1x2x64xf32>
    %3 = vector.shape_cast %2 : vector<1x2x64xf32> to vector<2x64xf32>
    %c2 = arith.constant 2 : index
    %c0_4 = arith.constant 0 : index
    %c0_5 = arith.constant 0 : index
    %4 = vector.load %arg0[%c2, %c0_4, %c0_5] : memref<16x2x64xf32, #tpu.memory_space<vmem>>, vector<1x2x64xf32>
    %5 = vector.shape_cast %4 : vector<1x2x64xf32> to vector<2x64xf32>
    %c3 = arith.constant 3 : index
    %c0_6 = arith.constant 0 : index
    %c0_7 = arith.constant 0 : index
    %6 = vector.load %arg0[%c3, %c0_6, %c0_7] : memref<16x2x64xf32, #tpu.memory_space<vmem>>, vector<1x2x64xf32>
    %7 = vector.shape_cast %6 : vector<1x2x64xf32> to vector<2x64xf32>
    %c4 = arith.constant 4 : index
    %c0_8 = arith.constant 0 : index
    %c0_9 = arith.constant 0 : index
    %8 = vector.load %arg0[%c4, %c0_8, %c0_9] : memref<16x2x64xf32, #tpu.memory_space<vmem>>, vector<1x2x64xf32>
    %9 = vector.shape_cast %8 : vector<1x2x64xf32> to vector<2x64xf32>
    %c5 = arith.constant 5 : index
    %c0_10 = arith.constant 0 : index
    %c0_11 = arith.constant 0 : index
    %10 = vector.load %arg0[%c5, %c0_10, %c0_11] : memref<16x2x64xf32, #tpu.memory_space<vmem>>, vector<1x2x64xf32>
    %11 = vector.shape_cast %10 : vector<1x2x64xf32> to vector<2x64xf32>
    %c6 = arith.constant 6 : index
    %c0_12 = arith.constant 0 : index
    %c0_13 = arith.constant 0 : index
    %12 = vector.load %arg0[%c6, %c0_12, %c0_13] : memref<16x2x64xf32, #tpu.memory_space<vmem>>, vector<1x2x64xf32>
    %13 = vector.shape_cast %12 : vector<1x2x64xf32> to vector<2x64xf32>
    %c7 = arith.constant 7 : index
    %c0_14 = arith.constant 0 : index
    %c0_15 = arith.constant 0 : index
    %14 = vector.load %arg0[%c7, %c0_14, %c0_15] : memref<16x2x64xf32, #tpu.memory_space<vmem>>, vector<1x2x64xf32>
    %15 = vector.shape_cast %14 : vector<1x2x64xf32> to vector<2x64xf32>
    %c8 = arith.constant 8 : index
    %c0_16 = arith.constant 0 : index
    %c0_17 = arith.constant 0 : index
    %16 = vector.load %arg0[%c8, %c0_16, %c0_17] : memref<16x2x64xf32, #tpu.memory_space<vmem>>, vector<1x2x64xf32>
    %17 = vector.shape_cast %16 : vector<1x2x64xf32> to vector<2x64xf32>
    %c9 = arith.constant 9 : index
    %c0_18 = arith.constant 0 : index
    %c0_19 = arith.constant 0 : index
    %18 = vector.load %arg0[%c9, %c0_18, %c0_19] : memref<16x2x64xf32, #tpu.memory_space<vmem>>, vector<1x2x64xf32>
    %19 = vector.shape_cast %18 : vector<1x2x64xf32> to vector<2x64xf32>
    %c10 = arith.constant 10 : index
    %c0_20 = arith.constant 0 : index
    %c0_21 = arith.constant 0 : index
    %20 = vector.load %arg0[%c10, %c0_20, %c0_21] : memref<16x2x64xf32, #tpu.memory_space<vmem>>, vector<1x2x64xf32>
    %21 = vector.shape_cast %20 : vector<1x2x64xf32> to vector<2x64xf32>
    %c11 = arith.constant 11 : index
    %c0_22 = arith.constant 0 : index
    %c0_23 = arith.constant 0 : index
    %22 = vector.load %arg0[%c11, %c0_22, %c0_23] : memref<16x2x64xf32, #tpu.memory_space<vmem>>, vector<1x2x64xf32>
    %23 = vector.shape_cast %22 : vector<1x2x64xf32> to vector<2x64xf32>
    %c12 = arith.constant 12 : index
    %c0_24 = arith.constant 0 : index
    %c0_25 = arith.constant 0 : index
    %24 = vector.load %arg0[%c12, %c0_24, %c0_25] : memref<16x2x64xf32, #tpu.memory_space<vmem>>, vector<1x2x64xf32>
    %25 = vector.shape_cast %24 : vector<1x2x64xf32> to vector<2x64xf32>
    %c13 = arith.constant 13 : index
    %c0_26 = arith.constant 0 : index
    %c0_27 = arith.constant 0 : index
    %26 = vector.load %arg0[%c13, %c0_26, %c0_27] : memref<16x2x64xf32, #tpu.memory_space<vmem>>, vector<1x2x64xf32>
    %27 = vector.shape_cast %26 : vector<1x2x64xf32> to vector<2x64xf32>
    %c14 = arith.constant 14 : index
    %c0_28 = arith.constant 0 : index
    %c0_29 = arith.constant 0 : index
    %28 = vector.load %arg0[%c14, %c0_28, %c0_29] : memref<16x2x64xf32, #tpu.memory_space<vmem>>, vector<1x2x64xf32>
    %29 = vector.shape_cast %28 : vector<1x2x64xf32> to vector<2x64xf32>
    %c0_30 = arith.constant 0 : index
    %c0_31 = arith.constant 0 : index
    %30 = vector.load %arg4[%c0_30, %c0_31] : memref<1x224xf32, #tpu.memory_space<vmem>>, vector<1x224xf32>
    %c0_32 = arith.constant 0 : index
    %c0_33 = arith.constant 0 : index
    %c0_34 = arith.constant 0 : index
    %31 = vector.load %arg3[%c0_32, %c0_33, %c0_34] : memref<3x64x224xf32, #tpu.memory_space<vmem>>, vector<1x64x224xf32>
    %32 = vector.shape_cast %31 : vector<1x64x224xf32> to vector<64x224xf32>
    %cst = arith.constant dense<0.000000e+00> : vector<2x224xf32>
    %33 = tpu.matmul %1, %32, %cst {dimension_numbers = #tpu.dot_dimension_numbers<[1], [0], [0], [1], [0, 0, 1, 1], [], []>} : vector<2x64xf32>, vector<64x224xf32>, vector<2x224xf32> -> vector<2x224xf32>
    %34 = vector.broadcast %30 : vector<1x224xf32> to vector<2x224xf32>
    %35 = arith.addf %34, %33 : vector<2x224xf32>
    %c1_35 = arith.constant 1 : index
    %c0_36 = arith.constant 0 : index
    %c0_37 = arith.constant 0 : index
    %36 = vector.load %arg3[%c1_35, %c0_36, %c0_37] : memref<3x64x224xf32, #tpu.memory_space<vmem>>, vector<1x64x224xf32>
    %37 = vector.shape_cast %36 : vector<1x64x224xf32> to vector<64x224xf32>
    %cst_38 = arith.constant dense<0.000000e+00> : vector<2x224xf32>
    %38 = tpu.matmul %3, %37, %cst_38 {dimension_numbers = #tpu.dot_dimension_numbers<[1], [0], [0], [1], [0, 0, 1, 1], [], []>} : vector<2x64xf32>, vector<64x224xf32>, vector<2x224xf32> -> vector<2x224xf32>
    %39 = arith.addf %35, %38 : vector<2x224xf32>
    %c2_39 = arith.constant 2 : index
    %c0_40 = arith.constant 0 : index
    %c0_41 = arith.constant 0 : index
    %40 = vector.load %arg3[%c2_39, %c0_40, %c0_41] : memref<3x64x224xf32, #tpu.memory_space<vmem>>, vector<1x64x224xf32>
    %41 = vector.shape_cast %40 : vector<1x64x224xf32> to vector<64x224xf32>
    %cst_42 = arith.constant dense<0.000000e+00> : vector<2x224xf32>
    %42 = tpu.matmul %5, %41, %cst_42 {dimension_numbers = #tpu.dot_dimension_numbers<[1], [0], [0], [1], [0, 0, 1, 1], [], []>} : vector<2x64xf32>, vector<64x224xf32>, vector<2x224xf32> -> vector<2x224xf32>
    %43 = arith.addf %39, %42 : vector<2x224xf32>
    %cst_43 = arith.constant 0.000000e+00 : f32
    %44 = vector.broadcast %cst_43 : f32 to vector<2x224xf32>
    %45 = arith.maximumf %43, %44 : vector<2x224xf32>
    %c0_44 = arith.constant 0 : index
    %c0_45 = arith.constant 0 : index
    %46 = vector.load %arg4[%c0_44, %c0_45] : memref<1x224xf32, #tpu.memory_space<vmem>>, vector<1x224xf32>
    %c0_46 = arith.constant 0 : index
    %c0_47 = arith.constant 0 : index
    %c0_48 = arith.constant 0 : index
    %47 = vector.load %arg3[%c0_46, %c0_47, %c0_48] : memref<3x64x224xf32, #tpu.memory_space<vmem>>, vector<1x64x224xf32>
    %48 = vector.shape_cast %47 : vector<1x64x224xf32> to vector<64x224xf32>
    %cst_49 = arith.constant dense<0.000000e+00> : vector<2x224xf32>
    %49 = tpu.matmul %5, %48, %cst_49 {dimension_numbers = #tpu.dot_dimension_numbers<[1], [0], [0], [1], [0, 0, 1, 1], [], []>} : vector<2x64xf32>, vector<64x224xf32>, vector<2x224xf32> -> vector<2x224xf32>
    %50 = vector.broadcast %46 : vector<1x224xf32> to vector<2x224xf32>
    %51 = arith.addf %50, %49 : vector<2x224xf32>
    %c1_50 = arith.constant 1 : index
    %c0_51 = arith.constant 0 : index
    %c0_52 = arith.constant 0 : index
    %52 = vector.load %arg3[%c1_50, %c0_51, %c0_52] : memref<3x64x224xf32, #tpu.memory_space<vmem>>, vector<1x64x224xf32>
    %53 = vector.shape_cast %52 : vector<1x64x224xf32> to vector<64x224xf32>
    %cst_53 = arith.constant dense<0.000000e+00> : vector<2x224xf32>
    %54 = tpu.matmul %7, %53, %cst_53 {dimension_numbers = #tpu.dot_dimension_numbers<[1], [0], [0], [1], [0, 0, 1, 1], [], []>} : vector<2x64xf32>, vector<64x224xf32>, vector<2x224xf32> -> vector<2x224xf32>
    %55 = arith.addf %51, %54 : vector<2x224xf32>
    %c2_54 = arith.constant 2 : index
    %c0_55 = arith.constant 0 : index
    %c0_56 = arith.constant 0 : index
    %56 = vector.load %arg3[%c2_54, %c0_55, %c0_56] : memref<3x64x224xf32, #tpu.memory_space<vmem>>, vector<1x64x224xf32>
    %57 = vector.shape_cast %56 : vector<1x64x224xf32> to vector<64x224xf32>
    %cst_57 = arith.constant dense<0.000000e+00> : vector<2x224xf32>
    %58 = tpu.matmul %9, %57, %cst_57 {dimension_numbers = #tpu.dot_dimension_numbers<[1], [0], [0], [1], [0, 0, 1, 1], [], []>} : vector<2x64xf32>, vector<64x224xf32>, vector<2x224xf32> -> vector<2x224xf32>
    %59 = arith.addf %55, %58 : vector<2x224xf32>
    %cst_58 = arith.constant 0.000000e+00 : f32
    %60 = vector.broadcast %cst_58 : f32 to vector<2x224xf32>
    %61 = arith.maximumf %59, %60 : vector<2x224xf32>
    %c0_59 = arith.constant 0 : index
    %c0_60 = arith.constant 0 : index
    %62 = vector.load %arg4[%c0_59, %c0_60] : memref<1x224xf32, #tpu.memory_space<vmem>>, vector<1x224xf32>
    %c0_61 = arith.constant 0 : index
    %c0_62 = arith.constant 0 : index
    %c0_63 = arith.constant 0 : index
    %63 = vector.load %arg3[%c0_61, %c0_62, %c0_63] : memref<3x64x224xf32, #tpu.memory_space<vmem>>, vector<1x64x224xf32>
    %64 = vector.shape_cast %63 : vector<1x64x224xf32> to vector<64x224xf32>
    %cst_64 = arith.constant dense<0.000000e+00> : vector<2x224xf32>
    %65 = tpu.matmul %9, %64, %cst_64 {dimension_numbers = #tpu.dot_dimension_numbers<[1], [0], [0], [1], [0, 0, 1, 1], [], []>} : vector<2x64xf32>, vector<64x224xf32>, vector<2x224xf32> -> vector<2x224xf32>
    %66 = vector.broadcast %62 : vector<1x224xf32> to vector<2x224xf32>
    %67 = arith.addf %66, %65 : vector<2x224xf32>
    %c1_65 = arith.constant 1 : index
    %c0_66 = arith.constant 0 : index
    %c0_67 = arith.constant 0 : index
    %68 = vector.load %arg3[%c1_65, %c0_66, %c0_67] : memref<3x64x224xf32, #tpu.memory_space<vmem>>, vector<1x64x224xf32>
    %69 = vector.shape_cast %68 : vector<1x64x224xf32> to vector<64x224xf32>
    %cst_68 = arith.constant dense<0.000000e+00> : vector<2x224xf32>
    %70 = tpu.matmul %11, %69, %cst_68 {dimension_numbers = #tpu.dot_dimension_numbers<[1], [0], [0], [1], [0, 0, 1, 1], [], []>} : vector<2x64xf32>, vector<64x224xf32>, vector<2x224xf32> -> vector<2x224xf32>
    %71 = arith.addf %67, %70 : vector<2x224xf32>
    %c2_69 = arith.constant 2 : index
    %c0_70 = arith.constant 0 : index
    %c0_71 = arith.constant 0 : index
    %72 = vector.load %arg3[%c2_69, %c0_70, %c0_71] : memref<3x64x224xf32, #tpu.memory_space<vmem>>, vector<1x64x224xf32>
    %73 = vector.shape_cast %72 : vector<1x64x224xf32> to vector<64x224xf32>
    %cst_72 = arith.constant dense<0.000000e+00> : vector<2x224xf32>
    %74 = tpu.matmul %13, %73, %cst_72 {dimension_numbers = #tpu.dot_dimension_numbers<[1], [0], [0], [1], [0, 0, 1, 1], [], []>} : vector<2x64xf32>, vector<64x224xf32>, vector<2x224xf32> -> vector<2x224xf32>
    %75 = arith.addf %71, %74 : vector<2x224xf32>
    %cst_73 = arith.constant 0.000000e+00 : f32
    %76 = vector.broadcast %cst_73 : f32 to vector<2x224xf32>
    %77 = arith.maximumf %75, %76 : vector<2x224xf32>
    %c0_74 = arith.constant 0 : index
    %c0_75 = arith.constant 0 : index
    %78 = vector.load %arg4[%c0_74, %c0_75] : memref<1x224xf32, #tpu.memory_space<vmem>>, vector<1x224xf32>
    %c0_76 = arith.constant 0 : index
    %c0_77 = arith.constant 0 : index
    %c0_78 = arith.constant 0 : index
    %79 = vector.load %arg3[%c0_76, %c0_77, %c0_78] : memref<3x64x224xf32, #tpu.memory_space<vmem>>, vector<1x64x224xf32>
    %80 = vector.shape_cast %79 : vector<1x64x224xf32> to vector<64x224xf32>
    %cst_79 = arith.constant dense<0.000000e+00> : vector<2x224xf32>
    %81 = tpu.matmul %13, %80, %cst_79 {dimension_numbers = #tpu.dot_dimension_numbers<[1], [0], [0], [1], [0, 0, 1, 1], [], []>} : vector<2x64xf32>, vector<64x224xf32>, vector<2x224xf32> -> vector<2x224xf32>
    %82 = vector.broadcast %78 : vector<1x224xf32> to vector<2x224xf32>
    %83 = arith.addf %82, %81 : vector<2x224xf32>
    %c1_80 = arith.constant 1 : index
    %c0_81 = arith.constant 0 : index
    %c0_82 = arith.constant 0 : index
    %84 = vector.load %arg3[%c1_80, %c0_81, %c0_82] : memref<3x64x224xf32, #tpu.memory_space<vmem>>, vector<1x64x224xf32>
    %85 = vector.shape_cast %84 : vector<1x64x224xf32> to vector<64x224xf32>
    %cst_83 = arith.constant dense<0.000000e+00> : vector<2x224xf32>
    %86 = tpu.matmul %15, %85, %cst_83 {dimension_numbers = #tpu.dot_dimension_numbers<[1], [0], [0], [1], [0, 0, 1, 1], [], []>} : vector<2x64xf32>, vector<64x224xf32>, vector<2x224xf32> -> vector<2x224xf32>
    %87 = arith.addf %83, %86 : vector<2x224xf32>
    %c2_84 = arith.constant 2 : index
    %c0_85 = arith.constant 0 : index
    %c0_86 = arith.constant 0 : index
    %88 = vector.load %arg3[%c2_84, %c0_85, %c0_86] : memref<3x64x224xf32, #tpu.memory_space<vmem>>, vector<1x64x224xf32>
    %89 = vector.shape_cast %88 : vector<1x64x224xf32> to vector<64x224xf32>
    %cst_87 = arith.constant dense<0.000000e+00> : vector<2x224xf32>
    %90 = tpu.matmul %17, %89, %cst_87 {dimension_numbers = #tpu.dot_dimension_numbers<[1], [0], [0], [1], [0, 0, 1, 1], [], []>} : vector<2x64xf32>, vector<64x224xf32>, vector<2x224xf32> -> vector<2x224xf32>
    %91 = arith.addf %87, %90 : vector<2x224xf32>
    %cst_88 = arith.constant 0.000000e+00 : f32
    %92 = vector.broadcast %cst_88 : f32 to vector<2x224xf32>
    %93 = arith.maximumf %91, %92 : vector<2x224xf32>
    %c0_89 = arith.constant 0 : index
    %c0_90 = arith.constant 0 : index
    %94 = vector.load %arg4[%c0_89, %c0_90] : memref<1x224xf32, #tpu.memory_space<vmem>>, vector<1x224xf32>
    %c0_91 = arith.constant 0 : index
    %c0_92 = arith.constant 0 : index
    %c0_93 = arith.constant 0 : index
    %95 = vector.load %arg3[%c0_91, %c0_92, %c0_93] : memref<3x64x224xf32, #tpu.memory_space<vmem>>, vector<1x64x224xf32>
    %96 = vector.shape_cast %95 : vector<1x64x224xf32> to vector<64x224xf32>
    %cst_94 = arith.constant dense<0.000000e+00> : vector<2x224xf32>
    %97 = tpu.matmul %17, %96, %cst_94 {dimension_numbers = #tpu.dot_dimension_numbers<[1], [0], [0], [1], [0, 0, 1, 1], [], []>} : vector<2x64xf32>, vector<64x224xf32>, vector<2x224xf32> -> vector<2x224xf32>
    %98 = vector.broadcast %94 : vector<1x224xf32> to vector<2x224xf32>
    %99 = arith.addf %98, %97 : vector<2x224xf32>
    %c1_95 = arith.constant 1 : index
    %c0_96 = arith.constant 0 : index
    %c0_97 = arith.constant 0 : index
    %100 = vector.load %arg3[%c1_95, %c0_96, %c0_97] : memref<3x64x224xf32, #tpu.memory_space<vmem>>, vector<1x64x224xf32>
    %101 = vector.shape_cast %100 : vector<1x64x224xf32> to vector<64x224xf32>
    %cst_98 = arith.constant dense<0.000000e+00> : vector<2x224xf32>
    %102 = tpu.matmul %19, %101, %cst_98 {dimension_numbers = #tpu.dot_dimension_numbers<[1], [0], [0], [1], [0, 0, 1, 1], [], []>} : vector<2x64xf32>, vector<64x224xf32>, vector<2x224xf32> -> vector<2x224xf32>
    %103 = arith.addf %99, %102 : vector<2x224xf32>
    %c2_99 = arith.constant 2 : index
    %c0_100 = arith.constant 0 : index
    %c0_101 = arith.constant 0 : index
    %104 = vector.load %arg3[%c2_99, %c0_100, %c0_101] : memref<3x64x224xf32, #tpu.memory_space<vmem>>, vector<1x64x224xf32>
    %105 = vector.shape_cast %104 : vector<1x64x224xf32> to vector<64x224xf32>
    %cst_102 = arith.constant dense<0.000000e+00> : vector<2x224xf32>
    %106 = tpu.matmul %21, %105, %cst_102 {dimension_numbers = #tpu.dot_dimension_numbers<[1], [0], [0], [1], [0, 0, 1, 1], [], []>} : vector<2x64xf32>, vector<64x224xf32>, vector<2x224xf32> -> vector<2x224xf32>
    %107 = arith.addf %103, %106 : vector<2x224xf32>
    %cst_103 = arith.constant 0.000000e+00 : f32
    %108 = vector.broadcast %cst_103 : f32 to vector<2x224xf32>
    %109 = arith.maximumf %107, %108 : vector<2x224xf32>
    %c0_104 = arith.constant 0 : index
    %c0_105 = arith.constant 0 : index
    %110 = vector.load %arg4[%c0_104, %c0_105] : memref<1x224xf32, #tpu.memory_space<vmem>>, vector<1x224xf32>
    %c0_106 = arith.constant 0 : index
    %c0_107 = arith.constant 0 : index
    %c0_108 = arith.constant 0 : index
    %111 = vector.load %arg3[%c0_106, %c0_107, %c0_108] : memref<3x64x224xf32, #tpu.memory_space<vmem>>, vector<1x64x224xf32>
    %112 = vector.shape_cast %111 : vector<1x64x224xf32> to vector<64x224xf32>
    %cst_109 = arith.constant dense<0.000000e+00> : vector<2x224xf32>
    %113 = tpu.matmul %21, %112, %cst_109 {dimension_numbers = #tpu.dot_dimension_numbers<[1], [0], [0], [1], [0, 0, 1, 1], [], []>} : vector<2x64xf32>, vector<64x224xf32>, vector<2x224xf32> -> vector<2x224xf32>
    %114 = vector.broadcast %110 : vector<1x224xf32> to vector<2x224xf32>
    %115 = arith.addf %114, %113 : vector<2x224xf32>
    %c1_110 = arith.constant 1 : index
    %c0_111 = arith.constant 0 : index
    %c0_112 = arith.constant 0 : index
    %116 = vector.load %arg3[%c1_110, %c0_111, %c0_112] : memref<3x64x224xf32, #tpu.memory_space<vmem>>, vector<1x64x224xf32>
    %117 = vector.shape_cast %116 : vector<1x64x224xf32> to vector<64x224xf32>
    %cst_113 = arith.constant dense<0.000000e+00> : vector<2x224xf32>
    %118 = tpu.matmul %23, %117, %cst_113 {dimension_numbers = #tpu.dot_dimension_numbers<[1], [0], [0], [1], [0, 0, 1, 1], [], []>} : vector<2x64xf32>, vector<64x224xf32>, vector<2x224xf32> -> vector<2x224xf32>
    %119 = arith.addf %115, %118 : vector<2x224xf32>
    %c2_114 = arith.constant 2 : index
    %c0_115 = arith.constant 0 : index
    %c0_116 = arith.constant 0 : index
    %120 = vector.load %arg3[%c2_114, %c0_115, %c0_116] : memref<3x64x224xf32, #tpu.memory_space<vmem>>, vector<1x64x224xf32>
    %121 = vector.shape_cast %120 : vector<1x64x224xf32> to vector<64x224xf32>
    %cst_117 = arith.constant dense<0.000000e+00> : vector<2x224xf32>
    %122 = tpu.matmul %25, %121, %cst_117 {dimension_numbers = #tpu.dot_dimension_numbers<[1], [0], [0], [1], [0, 0, 1, 1], [], []>} : vector<2x64xf32>, vector<64x224xf32>, vector<2x224xf32> -> vector<2x224xf32>
    %123 = arith.addf %119, %122 : vector<2x224xf32>
    %cst_118 = arith.constant 0.000000e+00 : f32
    %124 = vector.broadcast %cst_118 : f32 to vector<2x224xf32>
    %125 = arith.maximumf %123, %124 : vector<2x224xf32>
    %c0_119 = arith.constant 0 : index
    %c0_120 = arith.constant 0 : index
    %126 = vector.load %arg4[%c0_119, %c0_120] : memref<1x224xf32, #tpu.memory_space<vmem>>, vector<1x224xf32>
    %c0_121 = arith.constant 0 : index
    %c0_122 = arith.constant 0 : index
    %c0_123 = arith.constant 0 : index
    %127 = vector.load %arg3[%c0_121, %c0_122, %c0_123] : memref<3x64x224xf32, #tpu.memory_space<vmem>>, vector<1x64x224xf32>
    %128 = vector.shape_cast %127 : vector<1x64x224xf32> to vector<64x224xf32>
    %cst_124 = arith.constant dense<0.000000e+00> : vector<2x224xf32>
    %129 = tpu.matmul %25, %128, %cst_124 {dimension_numbers = #tpu.dot_dimension_numbers<[1], [0], [0], [1], [0, 0, 1, 1], [], []>} : vector<2x64xf32>, vector<64x224xf32>, vector<2x224xf32> -> vector<2x224xf32>
    %130 = vector.broadcast %126 : vector<1x224xf32> to vector<2x224xf32>
    %131 = arith.addf %130, %129 : vector<2x224xf32>
    %c1_125 = arith.constant 1 : index
    %c0_126 = arith.constant 0 : index
    %c0_127 = arith.constant 0 : index
    %132 = vector.load %arg3[%c1_125, %c0_126, %c0_127] : memref<3x64x224xf32, #tpu.memory_space<vmem>>, vector<1x64x224xf32>
    %133 = vector.shape_cast %132 : vector<1x64x224xf32> to vector<64x224xf32>
    %cst_128 = arith.constant dense<0.000000e+00> : vector<2x224xf32>
    %134 = tpu.matmul %27, %133, %cst_128 {dimension_numbers = #tpu.dot_dimension_numbers<[1], [0], [0], [1], [0, 0, 1, 1], [], []>} : vector<2x64xf32>, vector<64x224xf32>, vector<2x224xf32> -> vector<2x224xf32>
    %135 = arith.addf %131, %134 : vector<2x224xf32>
    %c2_129 = arith.constant 2 : index
    %c0_130 = arith.constant 0 : index
    %c0_131 = arith.constant 0 : index
    %136 = vector.load %arg3[%c2_129, %c0_130, %c0_131] : memref<3x64x224xf32, #tpu.memory_space<vmem>>, vector<1x64x224xf32>
    %137 = vector.shape_cast %136 : vector<1x64x224xf32> to vector<64x224xf32>
    %cst_132 = arith.constant dense<0.000000e+00> : vector<2x224xf32>
    %138 = tpu.matmul %29, %137, %cst_132 {dimension_numbers = #tpu.dot_dimension_numbers<[1], [0], [0], [1], [0, 0, 1, 1], [], []>} : vector<2x64xf32>, vector<64x224xf32>, vector<2x224xf32> -> vector<2x224xf32>
    %139 = arith.addf %135, %138 : vector<2x224xf32>
    %cst_133 = arith.constant 0.000000e+00 : f32
    %140 = vector.broadcast %cst_133 : f32 to vector<2x224xf32>
    %141 = arith.maximumf %139, %140 : vector<2x224xf32>
    %c0_134 = arith.constant 0 : index
    %c0_135 = arith.constant 0 : index
    %142 = vector.load %arg6[%c0_134, %c0_135] : memref<1x160xf32, #tpu.memory_space<vmem>>, vector<1x160xf32>
    %c0_136 = arith.constant 0 : index
    %c0_137 = arith.constant 0 : index
    %c0_138 = arith.constant 0 : index
    %143 = vector.load %arg5[%c0_136, %c0_137, %c0_138] : memref<3x224x160xf32, #tpu.memory_space<vmem>>, vector<1x224x160xf32>
    %144 = vector.shape_cast %143 : vector<1x224x160xf32> to vector<224x160xf32>
    %cst_139 = arith.constant dense<0.000000e+00> : vector<2x160xf32>
    %145 = tpu.matmul %45, %144, %cst_139 {dimension_numbers = #tpu.dot_dimension_numbers<[1], [0], [0], [1], [0, 0, 1, 1], [], []>} : vector<2x224xf32>, vector<224x160xf32>, vector<2x160xf32> -> vector<2x160xf32>
    %146 = vector.broadcast %142 : vector<1x160xf32> to vector<2x160xf32>
    %147 = arith.addf %146, %145 : vector<2x160xf32>
    %c1_140 = arith.constant 1 : index
    %c0_141 = arith.constant 0 : index
    %c0_142 = arith.constant 0 : index
    %148 = vector.load %arg5[%c1_140, %c0_141, %c0_142] : memref<3x224x160xf32, #tpu.memory_space<vmem>>, vector<1x224x160xf32>
    %149 = vector.shape_cast %148 : vector<1x224x160xf32> to vector<224x160xf32>
    %cst_143 = arith.constant dense<0.000000e+00> : vector<2x160xf32>
    %150 = tpu.matmul %61, %149, %cst_143 {dimension_numbers = #tpu.dot_dimension_numbers<[1], [0], [0], [1], [0, 0, 1, 1], [], []>} : vector<2x224xf32>, vector<224x160xf32>, vector<2x160xf32> -> vector<2x160xf32>
    %151 = arith.addf %147, %150 : vector<2x160xf32>
    %c2_144 = arith.constant 2 : index
    %c0_145 = arith.constant 0 : index
    %c0_146 = arith.constant 0 : index
    %152 = vector.load %arg5[%c2_144, %c0_145, %c0_146] : memref<3x224x160xf32, #tpu.memory_space<vmem>>, vector<1x224x160xf32>
    %153 = vector.shape_cast %152 : vector<1x224x160xf32> to vector<224x160xf32>
    %cst_147 = arith.constant dense<0.000000e+00> : vector<2x160xf32>
    %154 = tpu.matmul %77, %153, %cst_147 {dimension_numbers = #tpu.dot_dimension_numbers<[1], [0], [0], [1], [0, 0, 1, 1], [], []>} : vector<2x224xf32>, vector<224x160xf32>, vector<2x160xf32> -> vector<2x160xf32>
    %155 = arith.addf %151, %154 : vector<2x160xf32>
    %cst_148 = arith.constant 0.000000e+00 : f32
    %156 = vector.broadcast %cst_148 : f32 to vector<2x160xf32>
    %157 = arith.maximumf %155, %156 : vector<2x160xf32>
    %c0_149 = arith.constant 0 : index
    %c0_150 = arith.constant 0 : index
    %158 = vector.load %arg6[%c0_149, %c0_150] : memref<1x160xf32, #tpu.memory_space<vmem>>, vector<1x160xf32>
    %c0_151 = arith.constant 0 : index
    %c0_152 = arith.constant 0 : index
    %c0_153 = arith.constant 0 : index
    %159 = vector.load %arg5[%c0_151, %c0_152, %c0_153] : memref<3x224x160xf32, #tpu.memory_space<vmem>>, vector<1x224x160xf32>
    %160 = vector.shape_cast %159 : vector<1x224x160xf32> to vector<224x160xf32>
    %cst_154 = arith.constant dense<0.000000e+00> : vector<2x160xf32>
    %161 = tpu.matmul %61, %160, %cst_154 {dimension_numbers = #tpu.dot_dimension_numbers<[1], [0], [0], [1], [0, 0, 1, 1], [], []>} : vector<2x224xf32>, vector<224x160xf32>, vector<2x160xf32> -> vector<2x160xf32>
    %162 = vector.broadcast %158 : vector<1x160xf32> to vector<2x160xf32>
    %163 = arith.addf %162, %161 : vector<2x160xf32>
    %c1_155 = arith.constant 1 : index
    %c0_156 = arith.constant 0 : index
    %c0_157 = arith.constant 0 : index
    %164 = vector.load %arg5[%c1_155, %c0_156, %c0_157] : memref<3x224x160xf32, #tpu.memory_space<vmem>>, vector<1x224x160xf32>
    %165 = vector.shape_cast %164 : vector<1x224x160xf32> to vector<224x160xf32>
    %cst_158 = arith.constant dense<0.000000e+00> : vector<2x160xf32>
    %166 = tpu.matmul %77, %165, %cst_158 {dimension_numbers = #tpu.dot_dimension_numbers<[1], [0], [0], [1], [0, 0, 1, 1], [], []>} : vector<2x224xf32>, vector<224x160xf32>, vector<2x160xf32> -> vector<2x160xf32>
    %167 = arith.addf %163, %166 : vector<2x160xf32>
    %c2_159 = arith.constant 2 : index
    %c0_160 = arith.constant 0 : index
    %c0_161 = arith.constant 0 : index
    %168 = vector.load %arg5[%c2_159, %c0_160, %c0_161] : memref<3x224x160xf32, #tpu.memory_space<vmem>>, vector<1x224x160xf32>
    %169 = vector.shape_cast %168 : vector<1x224x160xf32> to vector<224x160xf32>
    %cst_162 = arith.constant dense<0.000000e+00> : vector<2x160xf32>
    %170 = tpu.matmul %93, %169, %cst_162 {dimension_numbers = #tpu.dot_dimension_numbers<[1], [0], [0], [1], [0, 0, 1, 1], [], []>} : vector<2x224xf32>, vector<224x160xf32>, vector<2x160xf32> -> vector<2x160xf32>
    %171 = arith.addf %167, %170 : vector<2x160xf32>
    %cst_163 = arith.constant 0.000000e+00 : f32
    %172 = vector.broadcast %cst_163 : f32 to vector<2x160xf32>
    %173 = arith.maximumf %171, %172 : vector<2x160xf32>
    %c0_164 = arith.constant 0 : index
    %c0_165 = arith.constant 0 : index
    %174 = vector.load %arg6[%c0_164, %c0_165] : memref<1x160xf32, #tpu.memory_space<vmem>>, vector<1x160xf32>
    %c0_166 = arith.constant 0 : index
    %c0_167 = arith.constant 0 : index
    %c0_168 = arith.constant 0 : index
    %175 = vector.load %arg5[%c0_166, %c0_167, %c0_168] : memref<3x224x160xf32, #tpu.memory_space<vmem>>, vector<1x224x160xf32>
    %176 = vector.shape_cast %175 : vector<1x224x160xf32> to vector<224x160xf32>
    %cst_169 = arith.constant dense<0.000000e+00> : vector<2x160xf32>
    %177 = tpu.matmul %77, %176, %cst_169 {dimension_numbers = #tpu.dot_dimension_numbers<[1], [0], [0], [1], [0, 0, 1, 1], [], []>} : vector<2x224xf32>, vector<224x160xf32>, vector<2x160xf32> -> vector<2x160xf32>
    %178 = vector.broadcast %174 : vector<1x160xf32> to vector<2x160xf32>
    %179 = arith.addf %178, %177 : vector<2x160xf32>
    %c1_170 = arith.constant 1 : index
    %c0_171 = arith.constant 0 : index
    %c0_172 = arith.constant 0 : index
    %180 = vector.load %arg5[%c1_170, %c0_171, %c0_172] : memref<3x224x160xf32, #tpu.memory_space<vmem>>, vector<1x224x160xf32>
    %181 = vector.shape_cast %180 : vector<1x224x160xf32> to vector<224x160xf32>
    %cst_173 = arith.constant dense<0.000000e+00> : vector<2x160xf32>
    %182 = tpu.matmul %93, %181, %cst_173 {dimension_numbers = #tpu.dot_dimension_numbers<[1], [0], [0], [1], [0, 0, 1, 1], [], []>} : vector<2x224xf32>, vector<224x160xf32>, vector<2x160xf32> -> vector<2x160xf32>
    %183 = arith.addf %179, %182 : vector<2x160xf32>
    %c2_174 = arith.constant 2 : index
    %c0_175 = arith.constant 0 : index
    %c0_176 = arith.constant 0 : index
    %184 = vector.load %arg5[%c2_174, %c0_175, %c0_176] : memref<3x224x160xf32, #tpu.memory_space<vmem>>, vector<1x224x160xf32>
    %185 = vector.shape_cast %184 : vector<1x224x160xf32> to vector<224x160xf32>
    %cst_177 = arith.constant dense<0.000000e+00> : vector<2x160xf32>
    %186 = tpu.matmul %109, %185, %cst_177 {dimension_numbers = #tpu.dot_dimension_numbers<[1], [0], [0], [1], [0, 0, 1, 1], [], []>} : vector<2x224xf32>, vector<224x160xf32>, vector<2x160xf32> -> vector<2x160xf32>
    %187 = arith.addf %183, %186 : vector<2x160xf32>
    %cst_178 = arith.constant 0.000000e+00 : f32
    %188 = vector.broadcast %cst_178 : f32 to vector<2x160xf32>
    %189 = arith.maximumf %187, %188 : vector<2x160xf32>
    %c0_179 = arith.constant 0 : index
    %c0_180 = arith.constant 0 : index
    %190 = vector.load %arg6[%c0_179, %c0_180] : memref<1x160xf32, #tpu.memory_space<vmem>>, vector<1x160xf32>
    %c0_181 = arith.constant 0 : index
    %c0_182 = arith.constant 0 : index
    %c0_183 = arith.constant 0 : index
    %191 = vector.load %arg5[%c0_181, %c0_182, %c0_183] : memref<3x224x160xf32, #tpu.memory_space<vmem>>, vector<1x224x160xf32>
    %192 = vector.shape_cast %191 : vector<1x224x160xf32> to vector<224x160xf32>
    %cst_184 = arith.constant dense<0.000000e+00> : vector<2x160xf32>
    %193 = tpu.matmul %93, %192, %cst_184 {dimension_numbers = #tpu.dot_dimension_numbers<[1], [0], [0], [1], [0, 0, 1, 1], [], []>} : vector<2x224xf32>, vector<224x160xf32>, vector<2x160xf32> -> vector<2x160xf32>
    %194 = vector.broadcast %190 : vector<1x160xf32> to vector<2x160xf32>
    %195 = arith.addf %194, %193 : vector<2x160xf32>
    %c1_185 = arith.constant 1 : index
    %c0_186 = arith.constant 0 : index
    %c0_187 = arith.constant 0 : index
    %196 = vector.load %arg5[%c1_185, %c0_186, %c0_187] : memref<3x224x160xf32, #tpu.memory_space<vmem>>, vector<1x224x160xf32>
    %197 = vector.shape_cast %196 : vector<1x224x160xf32> to vector<224x160xf32>
    %cst_188 = arith.constant dense<0.000000e+00> : vector<2x160xf32>
    %198 = tpu.matmul %109, %197, %cst_188 {dimension_numbers = #tpu.dot_dimension_numbers<[1], [0], [0], [1], [0, 0, 1, 1], [], []>} : vector<2x224xf32>, vector<224x160xf32>, vector<2x160xf32> -> vector<2x160xf32>
    %199 = arith.addf %195, %198 : vector<2x160xf32>
    %c2_189 = arith.constant 2 : index
    %c0_190 = arith.constant 0 : index
    %c0_191 = arith.constant 0 : index
    %200 = vector.load %arg5[%c2_189, %c0_190, %c0_191] : memref<3x224x160xf32, #tpu.memory_space<vmem>>, vector<1x224x160xf32>
    %201 = vector.shape_cast %200 : vector<1x224x160xf32> to vector<224x160xf32>
    %cst_192 = arith.constant dense<0.000000e+00> : vector<2x160xf32>
    %202 = tpu.matmul %125, %201, %cst_192 {dimension_numbers = #tpu.dot_dimension_numbers<[1], [0], [0], [1], [0, 0, 1, 1], [], []>} : vector<2x224xf32>, vector<224x160xf32>, vector<2x160xf32> -> vector<2x160xf32>
    %203 = arith.addf %199, %202 : vector<2x160xf32>
    %cst_193 = arith.constant 0.000000e+00 : f32
    %204 = vector.broadcast %cst_193 : f32 to vector<2x160xf32>
    %205 = arith.maximumf %203, %204 : vector<2x160xf32>
    %c0_194 = arith.constant 0 : index
    %c0_195 = arith.constant 0 : index
    %206 = vector.load %arg6[%c0_194, %c0_195] : memref<1x160xf32, #tpu.memory_space<vmem>>, vector<1x160xf32>
    %c0_196 = arith.constant 0 : index
    %c0_197 = arith.constant 0 : index
    %c0_198 = arith.constant 0 : index
    %207 = vector.load %arg5[%c0_196, %c0_197, %c0_198] : memref<3x224x160xf32, #tpu.memory_space<vmem>>, vector<1x224x160xf32>
    %208 = vector.shape_cast %207 : vector<1x224x160xf32> to vector<224x160xf32>
    %cst_199 = arith.constant dense<0.000000e+00> : vector<2x160xf32>
    %209 = tpu.matmul %109, %208, %cst_199 {dimension_numbers = #tpu.dot_dimension_numbers<[1], [0], [0], [1], [0, 0, 1, 1], [], []>} : vector<2x224xf32>, vector<224x160xf32>, vector<2x160xf32> -> vector<2x160xf32>
    %210 = vector.broadcast %206 : vector<1x160xf32> to vector<2x160xf32>
    %211 = arith.addf %210, %209 : vector<2x160xf32>
    %c1_200 = arith.constant 1 : index
    %c0_201 = arith.constant 0 : index
    %c0_202 = arith.constant 0 : index
    %212 = vector.load %arg5[%c1_200, %c0_201, %c0_202] : memref<3x224x160xf32, #tpu.memory_space<vmem>>, vector<1x224x160xf32>
    %213 = vector.shape_cast %212 : vector<1x224x160xf32> to vector<224x160xf32>
    %cst_203 = arith.constant dense<0.000000e+00> : vector<2x160xf32>
    %214 = tpu.matmul %125, %213, %cst_203 {dimension_numbers = #tpu.dot_dimension_numbers<[1], [0], [0], [1], [0, 0, 1, 1], [], []>} : vector<2x224xf32>, vector<224x160xf32>, vector<2x160xf32> -> vector<2x160xf32>
    %215 = arith.addf %211, %214 : vector<2x160xf32>
    %c2_204 = arith.constant 2 : index
    %c0_205 = arith.constant 0 : index
    %c0_206 = arith.constant 0 : index
    %216 = vector.load %arg5[%c2_204, %c0_205, %c0_206] : memref<3x224x160xf32, #tpu.memory_space<vmem>>, vector<1x224x160xf32>
    %217 = vector.shape_cast %216 : vector<1x224x160xf32> to vector<224x160xf32>
    %cst_207 = arith.constant dense<0.000000e+00> : vector<2x160xf32>
    %218 = tpu.matmul %141, %217, %cst_207 {dimension_numbers = #tpu.dot_dimension_numbers<[1], [0], [0], [1], [0, 0, 1, 1], [], []>} : vector<2x224xf32>, vector<224x160xf32>, vector<2x160xf32> -> vector<2x160xf32>
    %219 = arith.addf %215, %218 : vector<2x160xf32>
    %cst_208 = arith.constant 0.000000e+00 : f32
    %220 = vector.broadcast %cst_208 : f32 to vector<2x160xf32>
    %221 = arith.maximumf %219, %220 : vector<2x160xf32>
    %c0_209 = arith.constant 0 : index
    %c0_210 = arith.constant 0 : index
    %222 = vector.load %arg8[%c0_209, %c0_210] : memref<1x96xf32, #tpu.memory_space<vmem>>, vector<1x96xf32>
    %c0_211 = arith.constant 0 : index
    %c0_212 = arith.constant 0 : index
    %c0_213 = arith.constant 0 : index
    %223 = vector.load %arg7[%c0_211, %c0_212, %c0_213] : memref<3x160x96xf32, #tpu.memory_space<vmem>>, vector<1x160x96xf32>
    %224 = vector.shape_cast %223 : vector<1x160x96xf32> to vector<160x96xf32>
    %cst_214 = arith.constant dense<0.000000e+00> : vector<2x96xf32>
    %225 = tpu.matmul %157, %224, %cst_214 {dimension_numbers = #tpu.dot_dimension_numbers<[1], [0], [0], [1], [0, 0, 1, 1], [], []>} : vector<2x160xf32>, vector<160x96xf32>, vector<2x96xf32> -> vector<2x96xf32>
    %226 = vector.broadcast %222 : vector<1x96xf32> to vector<2x96xf32>
    %227 = arith.addf %226, %225 : vector<2x96xf32>
    %c1_215 = arith.constant 1 : index
    %c0_216 = arith.constant 0 : index
    %c0_217 = arith.constant 0 : index
    %228 = vector.load %arg7[%c1_215, %c0_216, %c0_217] : memref<3x160x96xf32, #tpu.memory_space<vmem>>, vector<1x160x96xf32>
    %229 = vector.shape_cast %228 : vector<1x160x96xf32> to vector<160x96xf32>
    %cst_218 = arith.constant dense<0.000000e+00> : vector<2x96xf32>
    %230 = tpu.matmul %173, %229, %cst_218 {dimension_numbers = #tpu.dot_dimension_numbers<[1], [0], [0], [1], [0, 0, 1, 1], [], []>} : vector<2x160xf32>, vector<160x96xf32>, vector<2x96xf32> -> vector<2x96xf32>
    %231 = arith.addf %227, %230 : vector<2x96xf32>
    %c2_219 = arith.constant 2 : index
    %c0_220 = arith.constant 0 : index
    %c0_221 = arith.constant 0 : index
    %232 = vector.load %arg7[%c2_219, %c0_220, %c0_221] : memref<3x160x96xf32, #tpu.memory_space<vmem>>, vector<1x160x96xf32>
    %233 = vector.shape_cast %232 : vector<1x160x96xf32> to vector<160x96xf32>
    %cst_222 = arith.constant dense<0.000000e+00> : vector<2x96xf32>
    %234 = tpu.matmul %189, %233, %cst_222 {dimension_numbers = #tpu.dot_dimension_numbers<[1], [0], [0], [1], [0, 0, 1, 1], [], []>} : vector<2x160xf32>, vector<160x96xf32>, vector<2x96xf32> -> vector<2x96xf32>
    %235 = arith.addf %231, %234 : vector<2x96xf32>
    %cst_223 = arith.constant 0.000000e+00 : f32
    %236 = vector.broadcast %cst_223 : f32 to vector<2x96xf32>
    %237 = arith.maximumf %235, %236 : vector<2x96xf32>
    %c0_224 = arith.constant 0 : index
    %c0_225 = arith.constant 0 : index
    %238 = vector.load %arg8[%c0_224, %c0_225] : memref<1x96xf32, #tpu.memory_space<vmem>>, vector<1x96xf32>
    %c0_226 = arith.constant 0 : index
    %c0_227 = arith.constant 0 : index
    %c0_228 = arith.constant 0 : index
    %239 = vector.load %arg7[%c0_226, %c0_227, %c0_228] : memref<3x160x96xf32, #tpu.memory_space<vmem>>, vector<1x160x96xf32>
    %240 = vector.shape_cast %239 : vector<1x160x96xf32> to vector<160x96xf32>
    %cst_229 = arith.constant dense<0.000000e+00> : vector<2x96xf32>
    %241 = tpu.matmul %173, %240, %cst_229 {dimension_numbers = #tpu.dot_dimension_numbers<[1], [0], [0], [1], [0, 0, 1, 1], [], []>} : vector<2x160xf32>, vector<160x96xf32>, vector<2x96xf32> -> vector<2x96xf32>
    %242 = vector.broadcast %238 : vector<1x96xf32> to vector<2x96xf32>
    %243 = arith.addf %242, %241 : vector<2x96xf32>
    %c1_230 = arith.constant 1 : index
    %c0_231 = arith.constant 0 : index
    %c0_232 = arith.constant 0 : index
    %244 = vector.load %arg7[%c1_230, %c0_231, %c0_232] : memref<3x160x96xf32, #tpu.memory_space<vmem>>, vector<1x160x96xf32>
    %245 = vector.shape_cast %244 : vector<1x160x96xf32> to vector<160x96xf32>
    %cst_233 = arith.constant dense<0.000000e+00> : vector<2x96xf32>
    %246 = tpu.matmul %189, %245, %cst_233 {dimension_numbers = #tpu.dot_dimension_numbers<[1], [0], [0], [1], [0, 0, 1, 1], [], []>} : vector<2x160xf32>, vector<160x96xf32>, vector<2x96xf32> -> vector<2x96xf32>
    %247 = arith.addf %243, %246 : vector<2x96xf32>
    %c2_234 = arith.constant 2 : index
    %c0_235 = arith.constant 0 : index
    %c0_236 = arith.constant 0 : index
    %248 = vector.load %arg7[%c2_234, %c0_235, %c0_236] : memref<3x160x96xf32, #tpu.memory_space<vmem>>, vector<1x160x96xf32>
    %249 = vector.shape_cast %248 : vector<1x160x96xf32> to vector<160x96xf32>
    %cst_237 = arith.constant dense<0.000000e+00> : vector<2x96xf32>
    %250 = tpu.matmul %205, %249, %cst_237 {dimension_numbers = #tpu.dot_dimension_numbers<[1], [0], [0], [1], [0, 0, 1, 1], [], []>} : vector<2x160xf32>, vector<160x96xf32>, vector<2x96xf32> -> vector<2x96xf32>
    %251 = arith.addf %247, %250 : vector<2x96xf32>
    %cst_238 = arith.constant 0.000000e+00 : f32
    %252 = vector.broadcast %cst_238 : f32 to vector<2x96xf32>
    %253 = arith.maximumf %251, %252 : vector<2x96xf32>
    %c0_239 = arith.constant 0 : index
    %c0_240 = arith.constant 0 : index
    %254 = vector.load %arg8[%c0_239, %c0_240] : memref<1x96xf32, #tpu.memory_space<vmem>>, vector<1x96xf32>
    %c0_241 = arith.constant 0 : index
    %c0_242 = arith.constant 0 : index
    %c0_243 = arith.constant 0 : index
    %255 = vector.load %arg7[%c0_241, %c0_242, %c0_243] : memref<3x160x96xf32, #tpu.memory_space<vmem>>, vector<1x160x96xf32>
    %256 = vector.shape_cast %255 : vector<1x160x96xf32> to vector<160x96xf32>
    %cst_244 = arith.constant dense<0.000000e+00> : vector<2x96xf32>
    %257 = tpu.matmul %189, %256, %cst_244 {dimension_numbers = #tpu.dot_dimension_numbers<[1], [0], [0], [1], [0, 0, 1, 1], [], []>} : vector<2x160xf32>, vector<160x96xf32>, vector<2x96xf32> -> vector<2x96xf32>
    %258 = vector.broadcast %254 : vector<1x96xf32> to vector<2x96xf32>
    %259 = arith.addf %258, %257 : vector<2x96xf32>
    %c1_245 = arith.constant 1 : index
    %c0_246 = arith.constant 0 : index
    %c0_247 = arith.constant 0 : index
    %260 = vector.load %arg7[%c1_245, %c0_246, %c0_247] : memref<3x160x96xf32, #tpu.memory_space<vmem>>, vector<1x160x96xf32>
    %261 = vector.shape_cast %260 : vector<1x160x96xf32> to vector<160x96xf32>
    %cst_248 = arith.constant dense<0.000000e+00> : vector<2x96xf32>
    %262 = tpu.matmul %205, %261, %cst_248 {dimension_numbers = #tpu.dot_dimension_numbers<[1], [0], [0], [1], [0, 0, 1, 1], [], []>} : vector<2x160xf32>, vector<160x96xf32>, vector<2x96xf32> -> vector<2x96xf32>
    %263 = arith.addf %259, %262 : vector<2x96xf32>
    %c2_249 = arith.constant 2 : index
    %c0_250 = arith.constant 0 : index
    %c0_251 = arith.constant 0 : index
    %264 = vector.load %arg7[%c2_249, %c0_250, %c0_251] : memref<3x160x96xf32, #tpu.memory_space<vmem>>, vector<1x160x96xf32>
    %265 = vector.shape_cast %264 : vector<1x160x96xf32> to vector<160x96xf32>
    %cst_252 = arith.constant dense<0.000000e+00> : vector<2x96xf32>
    %266 = tpu.matmul %221, %265, %cst_252 {dimension_numbers = #tpu.dot_dimension_numbers<[1], [0], [0], [1], [0, 0, 1, 1], [], []>} : vector<2x160xf32>, vector<160x96xf32>, vector<2x96xf32> -> vector<2x96xf32>
    %267 = arith.addf %263, %266 : vector<2x96xf32>
    %cst_253 = arith.constant 0.000000e+00 : f32
    %268 = vector.broadcast %cst_253 : f32 to vector<2x96xf32>
    %269 = arith.maximumf %267, %268 : vector<2x96xf32>
    %c0_254 = arith.constant 0 : index
    %c0_255 = arith.constant 0 : index
    %270 = vector.load %arg10[%c0_254, %c0_255] : memref<1x32xf32, #tpu.memory_space<vmem>>, vector<1x32xf32>
    %c0_256 = arith.constant 0 : index
    %c0_257 = arith.constant 0 : index
    %c0_258 = arith.constant 0 : index
    %271 = vector.load %arg9[%c0_256, %c0_257, %c0_258] : memref<3x96x32xf32, #tpu.memory_space<vmem>>, vector<1x96x32xf32>
    %272 = vector.shape_cast %271 : vector<1x96x32xf32> to vector<96x32xf32>
    %cst_259 = arith.constant dense<0.000000e+00> : vector<2x32xf32>
    %273 = tpu.matmul %237, %272, %cst_259 {dimension_numbers = #tpu.dot_dimension_numbers<[1], [0], [0], [1], [0, 0, 1, 1], [], []>} : vector<2x96xf32>, vector<96x32xf32>, vector<2x32xf32> -> vector<2x32xf32>
    %274 = vector.broadcast %270 : vector<1x32xf32> to vector<2x32xf32>
    %275 = arith.addf %274, %273 : vector<2x32xf32>
    %c1_260 = arith.constant 1 : index
    %c0_261 = arith.constant 0 : index
    %c0_262 = arith.constant 0 : index
    %276 = vector.load %arg9[%c1_260, %c0_261, %c0_262] : memref<3x96x32xf32, #tpu.memory_space<vmem>>, vector<1x96x32xf32>
    %277 = vector.shape_cast %276 : vector<1x96x32xf32> to vector<96x32xf32>
    %cst_263 = arith.constant dense<0.000000e+00> : vector<2x32xf32>
    %278 = tpu.matmul %253, %277, %cst_263 {dimension_numbers = #tpu.dot_dimension_numbers<[1], [0], [0], [1], [0, 0, 1, 1], [], []>} : vector<2x96xf32>, vector<96x32xf32>, vector<2x32xf32> -> vector<2x32xf32>
    %279 = arith.addf %275, %278 : vector<2x32xf32>
    %c2_264 = arith.constant 2 : index
    %c0_265 = arith.constant 0 : index
    %c0_266 = arith.constant 0 : index
    %280 = vector.load %arg9[%c2_264, %c0_265, %c0_266] : memref<3x96x32xf32, #tpu.memory_space<vmem>>, vector<1x96x32xf32>
    %281 = vector.shape_cast %280 : vector<1x96x32xf32> to vector<96x32xf32>
    %cst_267 = arith.constant dense<0.000000e+00> : vector<2x32xf32>
    %282 = tpu.matmul %269, %281, %cst_267 {dimension_numbers = #tpu.dot_dimension_numbers<[1], [0], [0], [1], [0, 0, 1, 1], [], []>} : vector<2x96xf32>, vector<96x32xf32>, vector<2x32xf32> -> vector<2x32xf32>
    %283 = arith.addf %279, %282 : vector<2x32xf32>
    %cst_268 = arith.constant 0.000000e+00 : f32
    %284 = vector.broadcast %cst_268 : f32 to vector<2x32xf32>
    %285 = arith.maximumf %283, %284 : vector<2x32xf32>
    %c0_269 = arith.constant 0 : index
    %c0_270 = arith.constant 0 : index
    %286 = vector.load %arg11[%c0_269, %c0_270] : memref<32x32xf32, #tpu.memory_space<vmem>>, vector<32x32xf32>
    %cst_271 = arith.constant dense<0.000000e+00> : vector<2x32xf32>
    %287 = tpu.matmul %285, %286, %cst_271 {dimension_numbers = #tpu.dot_dimension_numbers<[1], [0], [0], [1], [0, 0, 1, 1], [], []>} : vector<2x32xf32>, vector<32x32xf32>, vector<2x32xf32> -> vector<2x32xf32>
    %c0_272 = arith.constant 0 : index
    %c0_273 = arith.constant 0 : index
    %288 = vector.load %arg12[%c0_272, %c0_273] : memref<1x32xf32, #tpu.memory_space<vmem>>, vector<1x32xf32>
    %289 = vector.broadcast %288 : vector<1x32xf32> to vector<2x32xf32>
    %290 = arith.addf %287, %289 : vector<2x32xf32>
    %cst_274 = arith.constant dense<0.000000e+00> : vector<2xf32>
    %291 = vector.multi_reduction <add>, %290, %cst_274 [1] : vector<2x32xf32> to vector<2xf32>
    %292 = vector.shape_cast %291 : vector<2xf32> to vector<2x1xf32>
    %cst_275 = arith.constant 3.200000e+01 : f32
    %293 = vector.broadcast %cst_275 : f32 to vector<2x1xf32>
    %294 = arith.divf %292, %293 : vector<2x1xf32>
    %295 = vector.broadcast %294 : vector<2x1xf32> to vector<2x32xf32>
    %296 = arith.subf %290, %295 : vector<2x32xf32>
    %297 = vector.broadcast %294 : vector<2x1xf32> to vector<2x32xf32>
    %298 = arith.subf %290, %297 : vector<2x32xf32>
    %299 = arith.mulf %296, %298 : vector<2x32xf32>
    %cst_276 = arith.constant dense<0.000000e+00> : vector<2xf32>
    %300 = vector.multi_reduction <add>, %299, %cst_276 [1] : vector<2x32xf32> to vector<2xf32>
    %301 = vector.shape_cast %300 : vector<2xf32> to vector<2x1xf32>
    %cst_277 = arith.constant 3.200000e+01 : f32
    %302 = vector.broadcast %cst_277 : f32 to vector<2x1xf32>
    %303 = arith.divf %301, %302 : vector<2x1xf32>
    %304 = vector.broadcast %294 : vector<2x1xf32> to vector<2x32xf32>
    %305 = arith.subf %290, %304 : vector<2x32xf32>
    %cst_278 = arith.constant 9.99999974E-6 : f32
    %306 = vector.broadcast %cst_278 : f32 to vector<2x1xf32>
    %307 = arith.addf %303, %306 : vector<2x1xf32>
    %308 = math.rsqrt %307 : vector<2x1xf32>
    %309 = vector.broadcast %308 : vector<2x1xf32> to vector<2x32xf32>
    %310 = arith.mulf %305, %309 : vector<2x32xf32>
    %c0_279 = arith.constant 0 : index
    %c0_280 = arith.constant 0 : index
    %311 = vector.load %arg13[%c0_279, %c0_280] : memref<1x32xf32, #tpu.memory_space<vmem>>, vector<1x32xf32>
    %312 = vector.broadcast %311 : vector<1x32xf32> to vector<2x32xf32>
    %313 = arith.mulf %310, %312 : vector<2x32xf32>
    %c0_281 = arith.constant 0 : index
    %c0_282 = arith.constant 0 : index
    %314 = vector.load %arg14[%c0_281, %c0_282] : memref<1x32xf32, #tpu.memory_space<vmem>>, vector<1x32xf32>
    %315 = vector.broadcast %314 : vector<1x32xf32> to vector<2x32xf32>
    %316 = arith.addf %313, %315 : vector<2x32xf32>
    %317 = math.tanh %316 : vector<2x32xf32>
    %c0_283 = arith.constant 0 : index
    %c0_284 = arith.constant 0 : index
    %318 = vector.load %arg1[%c0_283, %c0_284] : memref<2x6xf32, #tpu.memory_space<vmem>>, vector<2x6xf32>
    %c0_285 = arith.constant 0 : index
    %c0_286 = arith.constant 0 : index
    %319 = vector.load %arg2[%c0_285, %c0_286] : memref<2x4xf32, #tpu.memory_space<vmem>>, vector<2x4xf32>
    %c0_287 = arith.constant 0 : index
    %c0_288 = arith.constant 0 : index
    %320 = vector.load %arg15[%c0_287, %c0_288] : memref<32x64xf32, #tpu.memory_space<vmem>>, vector<32x64xf32>
    %cst_289 = arith.constant dense<0.000000e+00> : vector<2x64xf32>
    %321 = tpu.matmul %317, %320, %cst_289 {dimension_numbers = #tpu.dot_dimension_numbers<[1], [0], [0], [1], [0, 0, 1, 1], [], []>} : vector<2x32xf32>, vector<32x64xf32>, vector<2x64xf32> -> vector<2x64xf32>
    %c0_290 = arith.constant 0 : index
    %c0_291 = arith.constant 0 : index
    %322 = vector.load %arg16[%c0_290, %c0_291] : memref<6x64xf32, #tpu.memory_space<vmem>>, vector<6x64xf32>
    %cst_292 = arith.constant dense<0.000000e+00> : vector<2x64xf32>
    %323 = tpu.matmul %318, %322, %cst_292 {dimension_numbers = #tpu.dot_dimension_numbers<[1], [0], [0], [1], [0, 0, 1, 1], [], []>} : vector<2x6xf32>, vector<6x64xf32>, vector<2x64xf32> -> vector<2x64xf32>
    %324 = arith.addf %321, %323 : vector<2x64xf32>
    %c0_293 = arith.constant 0 : index
    %c0_294 = arith.constant 0 : index
    %325 = vector.load %arg17[%c0_293, %c0_294] : memref<4x64xf32, #tpu.memory_space<vmem>>, vector<4x64xf32>
    %cst_295 = arith.constant dense<0.000000e+00> : vector<2x64xf32>
    %326 = tpu.matmul %319, %325, %cst_295 {dimension_numbers = #tpu.dot_dimension_numbers<[1], [0], [0], [1], [0, 0, 1, 1], [], []>} : vector<2x4xf32>, vector<4x64xf32>, vector<2x64xf32> -> vector<2x64xf32>
    %327 = arith.addf %324, %326 : vector<2x64xf32>
    %c0_296 = arith.constant 0 : index
    %c0_297 = arith.constant 0 : index
    %328 = vector.load %arg18[%c0_296, %c0_297] : memref<1x64xf32, #tpu.memory_space<vmem>>, vector<1x64xf32>
    %329 = vector.broadcast %328 : vector<1x64xf32> to vector<2x64xf32>
    %330 = arith.addf %327, %329 : vector<2x64xf32>
    %cst_298 = arith.constant 0.000000e+00 : f32
    %331 = vector.broadcast %cst_298 : f32 to vector<2x64xf32>
    %332 = arith.maximumf %330, %331 : vector<2x64xf32>
    %c0_299 = arith.constant 0 : index
    %c0_300 = arith.constant 0 : index
    %333 = vector.load %arg19[%c0_299, %c0_300] : memref<64x64xf32, #tpu.memory_space<vmem>>, vector<64x64xf32>
    %cst_301 = arith.constant dense<0.000000e+00> : vector<2x64xf32>
    %334 = tpu.matmul %332, %333, %cst_301 {dimension_numbers = #tpu.dot_dimension_numbers<[1], [0], [0], [1], [0, 0, 1, 1], [], []>} : vector<2x64xf32>, vector<64x64xf32>, vector<2x64xf32> -> vector<2x64xf32>
    %c0_302 = arith.constant 0 : index
    %c0_303 = arith.constant 0 : index
    %335 = vector.load %arg20[%c0_302, %c0_303] : memref<1x64xf32, #tpu.memory_space<vmem>>, vector<1x64xf32>
    %336 = vector.broadcast %335 : vector<1x64xf32> to vector<2x64xf32>
    %337 = arith.addf %334, %336 : vector<2x64xf32>
    %cst_304 = arith.constant 0.000000e+00 : f32
    %338 = vector.broadcast %cst_304 : f32 to vector<2x64xf32>
    %339 = arith.maximumf %337, %338 : vector<2x64xf32>
    %c0_305 = arith.constant 0 : index
    %c0_306 = arith.constant 0 : index
    %340 = vector.load %arg21[%c0_305, %c0_306] : memref<64x2xf32, #tpu.memory_space<vmem>>, vector<64x2xf32>
    %cst_307 = arith.constant dense<0.000000e+00> : vector<2x2xf32>
    %341 = tpu.matmul %339, %340, %cst_307 {dimension_numbers = #tpu.dot_dimension_numbers<[1], [0], [0], [1], [0, 0, 1, 1], [], []>} : vector<2x64xf32>, vector<64x2xf32>, vector<2x2xf32> -> vector<2x2xf32>
    %c0_308 = arith.constant 0 : index
    %c0_309 = arith.constant 0 : index
    %342 = vector.load %arg22[%c0_308, %c0_309] : memref<1x2xf32, #tpu.memory_space<vmem>>, vector<1x2xf32>
    %343 = vector.broadcast %342 : vector<1x2xf32> to vector<2x2xf32>
    %344 = arith.addf %341, %343 : vector<2x2xf32>
    %c0_310 = arith.constant 0 : index
    %c0_311 = arith.constant 0 : index
    %345 = vector.load %arg23[%c0_310, %c0_311] : memref<2x2xf32, #tpu.memory_space<vmem>>, vector<2x2xf32>
    tpu.vector_store %arg23[%c0_310, %c0_311], %344 {strides = array<i32>} : memref<2x2xf32, #tpu.memory_space<vmem>>, vector<2x2xf32>,
    return
  }
}

</mosaic_0001>

<bundles_post_ra>
// kernel: tile.19
= control target key start
LH: loop header
LB: loop body
LE: loop exit
PB: predicated region body
PF: predicated region fallthrough
CT: control target
= control target key end

     0   :  { %s22_s0 = inlined_call_operand.vmem [shape: f32[32], index: 0, kind: input, shape index: {}]   ;;  %s23_s1 = inlined_call_operand.vmem [shape: f32[7,32], index: 1, kind: output, shape index: {}]  }
   0x1   :  { %v4_v0 = vld [vmem:[%s22_s0] ss:$0 sm:$0xff] }
   0x2   :  { %5 = vst [vmem:[%s23_s1] sm:$0xff] %v4_v0 }

// kernel: tile.20
= control target key start
LH: loop header
LB: loop body
LE: loop exit
PB: predicated region body
PF: predicated region fallthrough
CT: control target
= control target key end

     0   :  { %s45_s8 = smov 96   ;;  %s20_s9 = smov 3  ;;  %vm4_vm0 = vcmask 261120   ;;  %vm10_vm1 = vcmask 1048320   ;;  %vm17_vm2 = vcmask 785920   ;;  %vm24_vm3 = vcmask 523520   ;;  %s76_s0 = inlined_call_operand.vmem [shape: f32[7,32], index: 0, kind: input, shape index: {}]   ;;  %s77_s1 = inlined_call_operand.vmem [shape: f32[1,224], index: 1, kind: output, shape index: {}]  }
   0x1   :  { %v38_v0 = vld [vmem:[%s76_s0 + $0x3] sm:$0x1]   ;;  %v40_v1 = vld [vmem:[%s76_s0 + $0x1] ss:$4 sm:%s20_s9]   ;;  %s13_s12 = smov 3  ;;  %s46_s13 = smov 32  }
   0x2   :  { %8 = vrot.lane.b32.xlu0 %v38_v0, %s45_s8  ;;  %22 = vrot.lane.b32.xlu1 %v40_v1, %s46_s13  ;;  %v39_v2 = vld [vmem:[%s76_s0 + $0x2] ss:$4 sm:%s13_s12]   ;;  %s47_s16 = smov 64   ;;  %s2_s17 = smov 3 }
   0x3   :  { %v3_v3 = vld [vmem:[%s76_s0] ss:$4 sm:%s2_s17]  }
   0x4   :  { %5 = vst.msk [vmem:[#allocation0] ss:$8 sm:$0x3] %vm4_vm0, %v3_v3  }
   0xa   :  { %15 = vrot.lane.b32.xlu0 %v39_v2, %s47_s16 }
  0x74   :  { %v9_v4 = vpop.permute.xlu0 %8   ;;  %v23_v5 = vpop.permute.xlu1 %22  }
  0x75   :  { %11 = vst.msk [vmem:[#allocation0] sm:$0x1] %vm10_vm1, %v9_v4  }
  0x7c   :  { %v16_v6 = vpop.permute.xlu0 %15  }
  0x7d   :  { %18 = vst.msk [vmem:[#allocation0] ss:$8 sm:$0x3] %vm17_vm2, %v16_v6  }
  0x7e   :  { %25 = vst.msk [vmem:[#allocation0] ss:$8 sm:$0x3] %vm24_vm3, %v23_v5  }
  0x85   :  { %v28_v7 = vld [vmem:[#allocation0] sm:$0x1]  ;;  %v33_v8 = vld [vmem:[#allocation0 + $0x8] sm:$0x1] }
  0x86   :  { %31 = vst [vmem:[%s77_s1] sm:$0x1] %v28_v7 }
  0x87   :  { %41 = vst [vmem:[%s77_s1 + $0x1] sm:$0x1] %v33_v8 }

// kernel: tile.24
= control target key start
LH: loop header
LB: loop body
LE: loop exit
PB: predicated region body
PF: predicated region fallthrough
CT: control target
= control target key end

     0   :  { %s22_s0 = inlined_call_operand.vmem [shape: f32[32], index: 0, kind: input, shape index: {}]   ;;  %s23_s1 = inlined_call_operand.vmem [shape: f32[5,32], index: 1, kind: output, shape index: {}]  }
   0x1   :  { %v4_v0 = vld [vmem:[%s22_s0] ss:$0 sm:$0xff] }
   0x2   :  { %5 = vst [vmem:[%s23_s1] sm:$0xff] %v4_v0 }

// kernel: tile.25
= control target key start
LH: loop header
LB: loop body
LE: loop exit
PB: predicated region body
PF: predicated region fallthrough
CT: control target
= control target key end

     0   :  { %s43_s8 = smov 96   ;;  %s44_s11 = smov 32   ;;  %vm4_vm0 = vcmask 261120   ;;  %vm10_vm1 = vcmask 1048320   ;;  %vm16_vm2 = vcmask 785920   ;;  %vm22_vm3 = vcmask 523520   ;;  %s74_s0 = inlined_call_operand.vmem [shape: f32[5,32], index: 0, kind: input, shape index: {}]   ;;  %s75_s1 = inlined_call_operand.vmem [shape: f32[1,160], index: 1, kind: output, shape index: {}]  }
   0x1   :  { %v36_v0 = vld [vmem:[%s74_s0 + $0x3] sm:$0x1]   ;;  %v38_v1 = vld [vmem:[%s74_s0 + $0x1] sm:$0x1]   ;;  %v37_v2 = vld [vmem:[%s74_s0 + $0x2] sm:$0x1]  }
   0x2   :  { %8 = vrot.lane.b32.xlu0 %v36_v0, %s43_s8  ;;  %20 = vrot.lane.b32.xlu1 %v38_v1, %s44_s11  ;;  %s45_s14 = smov 64   ;;  %s2_s15 = smov 3 }
   0x3   :  { %v3_v3 = vld [vmem:[%s74_s0] ss:$4 sm:%s2_s15]  }
   0x4   :  { %5 = vst.msk [vmem:[#allocation0] ss:$8 sm:$0x3] %vm4_vm0, %v3_v3  }
   0xa   :  { %14 = vrot.lane.b32.xlu0 %v37_v2, %s45_s14 }
   0xb   :  { %v31_v4 = vld [vmem:[#allocation0 + $0x8] sm:$0x1] }
   0xc   :  { %39 = vst [vmem:[%s75_s1 + $0x1] sm:$0x1] %v31_v4 }
  0x74   :  { %v9_v5 = vpop.permute.xlu0 %8   ;;  %v21_v6 = vpop.permute.xlu1 %20  }
  0x75   :  { %11 = vst.msk [vmem:[#allocation0] sm:$0x1] %vm10_vm1, %v9_v5  }
  0x7c   :  { %v15_v7 = vpop.permute.xlu0 %14  }
  0x7d   :  { %17 = vst.msk [vmem:[#allocation0] sm:$0x1] %vm16_vm2, %v15_v7  }
  0x7e   :  { %23 = vst.msk [vmem:[#allocation0] sm:$0x1] %vm22_vm3, %v21_v6  }
  0x85   :  { %v26_v8 = vld [vmem:[#allocation0] sm:$0x1] }
  0x86   :  { %29 = vst [vmem:[%s75_s1] sm:$0x1] %v26_v8 }

// kernel: tile.29
= control target key start
LH: loop header
LB: loop body
LE: loop exit
PB: predicated region body
PF: predicated region fallthrough
CT: control target
= control target key end

     0   :  { %s22_s0 = inlined_call_operand.vmem [shape: f32[32], index: 0, kind: input, shape index: {}]   ;;  %s23_s1 = inlined_call_operand.vmem [shape: f32[3,32], index: 1, kind: output, shape index: {}]  }
   0x1   :  { %v4_v0 = vld [vmem:[%s22_s0] ss:$0 sm:$0xff] }
   0x2   :  { %5 = vst [vmem:[%s23_s1] sm:$0xf] %v4_v0 }

// kernel: tile.30
= control target key start
LH: loop header
LB: loop body
LE: loop exit
PB: predicated region body
PF: predicated region fallthrough
CT: control target
= control target key end

     0   :  { %s30_s8 = smov 32   ;;  %vm7_vm0 = vcmask 261120   ;;  %vm13_vm1 = vcmask 785920   ;;  %vm19_vm2 = vcmask 523520   ;;  %s47_s0 = inlined_call_operand.vmem [shape: f32[3,32], index: 0, kind: input, shape index: {}]   ;;  %s48_s1 = inlined_call_operand.vmem [shape: f32[1,96], index: 1, kind: output, shape index: {}]  }
   0x1   :  { %v4_v0 = vld [vmem:[%s47_s0] sm:$0xf]  ;;  %s29_s0 = smov 64  }
   0x2   :  { %5 = vst [vmem:[#allocation1] sm:$0xf] %v4_v0 }
   0x9   :  { %v10_v1 = vld [vmem:[#allocation1 + $0x2] sm:$0x1]   ;;  %v16_v2 = vld [vmem:[#allocation1 + $0x1] sm:$0x1]   ;;  %v6_v3 = vld [vmem:[#allocation1] sm:$0x1]  }
   0xa   :  { %11 = vrot.lane.b32.xlu0 %v10_v1, %s29_s0  ;;  %8 = vst.msk [vmem:[#allocation0] sm:$0x1] %vm7_vm0, %v6_v3  }
  0x12   :  { %17 = vrot.lane.b32.xlu0 %v16_v2, %s30_s8 }
  0x7c   :  { %v12_v4 = vpop.permute.xlu0 %11  }
  0x7d   :  { %14 = vst.msk [vmem:[#allocation0] sm:$0x1] %vm13_vm1, %v12_v4  }
  0x84   :  { %v18_v5 = vpop.permute.xlu0 %17  }
  0x85   :  { %20 = vst.msk [vmem:[#allocation0] sm:$0x1] %vm19_vm2, %v18_v5  }
  0x8c   :  { %v23_v6 = vld [vmem:[#allocation0] sm:$0x1] }
  0x8d   :  { %26 = vst [vmem:[%s48_s1] sm:$0x1] %v23_v6 }

// kernel: critic_forward.1
= control target key start
LH: loop header
LB: loop body
LE: loop exit
PB: predicated region body
PF: predicated region fallthrough
CT: control target
= control target key end

     0   :  { %vm120_vm0 = vcmask 523264   ;;  %vm1158_vm1 = vcmask 785408   ;;  %vm2560_vm2 = vcmask 261120   ;;  %vm3139_vm3 = vcmask 254976   ;;  %s8165_s3 = inlined_call_operand.vmem [shape: f32[3,64,224], index: 3, kind: input, shape index: {}]   ;;  %s8166_s0 = inlined_call_operand.vmem [shape: f32[16,2,64], index: 0, kind: input, shape index: {}]   ;;  %s8167_s5 = inlined_call_operand.vmem [shape: f32[3,224,160], index: 5, kind: input, shape index: {}]   ;;  %s8168_s4 = inlined_call_operand.vmem [shape: f32[1,224], index: 4, kind: input, shape index: {}]   ;;  %s8169_s7 = inlined_call_operand.vmem [shape: f32[3,160,96], index: 7, kind: input, shape index: {}]   ;;  %s8170_s6 = inlined_call_operand.vmem [shape: f32[1,160], index: 6, kind: input, shape index: {}]   ;;  %s8171_s8 = inlined_call_operand.vmem [shape: f32[1,96], index: 8, kind: input, shape index: {}]   ;;  %s8172_s9 = inlined_call_operand.vmem [shape: f32[3,96,32], index: 9, kind: input, shape index: {}]   ;;  %s8173_s10 = inlined_call_operand.vmem [shape: f32[1,32], index: 10, kind: input, shape index: {}]   ;;  %s8174_s12 = inlined_call_operand.vmem [shape: f32[1,32], index: 12, kind: input, shape index: {}]   ;;  %s8175_s11 = inlined_call_operand.vmem [shape: f32[32,32], index: 11, kind: input, shape index: {}]   ;;  %s8176_s13 = inlined_call_operand.vmem [shape: f32[1,32], index: 13, kind: input, shape index: {}]   ;;  %s8177_s14 = inlined_call_operand.vmem [shape: f32[1,32], index: 14, kind: input, shape index: {}]   ;;  %s8178_s17 = inlined_call_operand.vmem [shape: f32[4,64], index: 17, kind: input, shape index: {}]   ;;  %s8179_s16 = inlined_call_operand.vmem [shape: f32[6,64], index: 16, kind: input, shape index: {}]   ;;  %s8180_s15 = inlined_call_operand.vmem [shape: f32[32,64], index: 15, kind: input, shape index: {}]   ;;  %s8181_s2 = inlined_call_operand.vmem [shape: f32[2,4], index: 2, kind: input, shape index: {}]   ;;  %s8182_s1 = inlined_call_operand.vmem [shape: f32[2,6], index: 1, kind: input, shape index: {}]   ;;  %s8183_s19 = inlined_call_operand.vmem [shape: f32[64,64], index: 19, kind: input, shape index: {}]   ;;  %s8184_s18 = inlined_call_operand.vmem [shape: f32[1,64], index: 18, kind: input, shape index: {}]   ;;  %s8185_s20 = inlined_call_operand.vmem [shape: f32[1,64], index: 20, kind: input, shape index: {}]   ;;  %s8186_s21 = inlined_call_operand.vmem [shape: f32[64,2], index: 21, kind: input, shape index: {}]   ;;  %s8187_s22 = inlined_call_operand.vmem [shape: f32[1,2], index: 22, kind: input, shape index: {}]   ;;  %s8188_s23 = inlined_call_operand.vmem [shape: f32[2,2], index: 23, kind: output, shape index: {}]  }
   0x1   :  { %8604 = sst [smem:[#allocation117_spill]] %s8165_s3  ;;  %vm3243_vm5 = vcmask 1043456   ;;  %vm3191_vm6 = vcmask 1045504   ;;  %vm3239_vm7 = vcmask 31744   ;;  %vm3187_vm8 = vcmask 48128  }
   0x2   :  { %8605 = sst [smem:[#allocation118_spill]] %s8166_s0  ;;  %vm3345_vm12 = vcmask 9216  }
   0x3   :  { %8606 = sst [smem:[#allocation119_spill]] %s8167_s5 }
   0x4   :  { %8607 = sst [smem:[#allocation120_spill]] %s8168_s4 }
   0x5   :  { %8608 = sst [smem:[#allocation121_spill]] %s8169_s7 }
   0x6   :  { %8609 = sst [smem:[#allocation122_spill]] %s8170_s6 }
   0x7   :  { %8610 = sst [smem:[#allocation123_spill]] %s8171_s8 }
   0x8   :  { %8611 = sst [smem:[#allocation124_spill]] %s8172_s9 }
   0x9   :  { %s8612_s24 = sld [smem:[#allocation117_spill]] }
   0xa   :  { %s8613_s5 = sld [smem:[#allocation118_spill]] }
   0xb   :  { %s8614_s3 = sld [smem:[#allocation119_spill]] }
   0xc   :  { %s9169_s9 = sld [smem:[#allocation121_spill]] }
   0xd   :  { %s9202_s25 = sld [smem:[#allocation123_spill]] }
   0xf   :  { %v3972_v0 = vld [vmem:[%s8612_s24 + $0x70] sm:$0xff]  ;;  %v3977_v1 = vld [vmem:[%s8612_s24 + $0x78] sm:$0xff]  ;;  %v3994_v4 = vld [vmem:[%s8612_s24 + $0x60] sm:$0xff] }
  0x10   :  { %v3982_v2 = vld [vmem:[%s8612_s24 + $0xf0] sm:$0xff]  ;;  %132 = vmatpush.msra.mxu0 %v3972_v0  ;;  %152 = vmatpush.msra.mxu1 %v3977_v1  ;;  %v3989_v3 = vld [vmem:[%s8612_s24 + $0xf8] sm:$0xff]  ;;  %v3999_v5 = vld [vmem:[%s8612_s24 + $0x68] sm:$0xff] }
  0x11   :  { %199 = vmatpush.msra.mxu2 %v3982_v2  ;;  %219 = vmatpush.msra.mxu3 %v3989_v3  ;;  %v4006_v6 = vld [vmem:[%s8612_s24 + $0xe0] sm:$0xff]  ;;  %v4011_v7 = vld [vmem:[%s8612_s24 + $0xe8] sm:$0xff]  ;;  %v4016_v8 = vld [vmem:[%s8612_s24 + $0x50] sm:$0xff] }
  0x12   :  { %133 = vmatpush.msra.mxu0 %v3994_v4  ;;  %153 = vmatpush.msra.mxu1 %v3999_v5  ;;  %v4023_v9 = vld [vmem:[%s8612_s24 + $0x58] sm:$0xff]  ;;  %v4028_v10 = vld [vmem:[%s8612_s24 + $0xd0] sm:$0xff]  ;;  %v4040_v12 = vld [vmem:[%s8612_s24 + $0x40] sm:$0xff] }
  0x13   :  { %v4033_v11 = vld [vmem:[%s8612_s24 + $0xd8] sm:$0xff]  ;;  %200 = vmatpush.msra.mxu2 %v4006_v6  ;;  %220 = vmatpush.msra.mxu3 %v4011_v7  ;;  %v4045_v13 = vld [vmem:[%s8612_s24 + $0x48] sm:$0xff]  ;;  %v4052_v14 = vld [vmem:[%s8612_s24 + $0xc0] sm:$0xff] }
  0x14   :  { %134 = vmatpush.msra.mxu0 %v4016_v8  ;;  %154 = vmatpush.msra.mxu1 %v4023_v9  ;;  %v4057_v15 = vld [vmem:[%s8612_s24 + $0xc8] sm:$0xff]  ;;  %v4064_v16 = vld [vmem:[%s8612_s24 + $0x30] sm:$0xff]  ;;  %v4069_v17 = vld [vmem:[%s8612_s24 + $0x38] sm:$0xff] }
  0x15   :  { %201 = vmatpush.msra.mxu2 %v4028_v10  ;;  %221 = vmatpush.msra.mxu3 %v4033_v11  ;;  %v4076_v18 = vld [vmem:[%s8612_s24 + $0xb0] sm:$0xff]  ;;  %v4081_v19 = vld [vmem:[%s8612_s24 + $0xb8] sm:$0xff]  ;;  %v4088_v20 = vld [vmem:[%s8612_s24 + $0x20] sm:$0xff] }
  0x16   :  { %135 = vmatpush.msra.mxu0 %v4040_v12  ;;  %155 = vmatpush.msra.mxu1 %v4045_v13  ;;  %v4093_v21 = vld [vmem:[%s8612_s24 + $0x28] sm:$0xff]  ;;  %v4100_v22 = vld [vmem:[%s8612_s24 + $0xa0] sm:$0xff]  ;;  %v4112_v24 = vld [vmem:[%s8612_s24 + $0x10] sm:$0xff] }
  0x17   :  { %202 = vmatpush.msra.mxu2 %v4052_v14  ;;  %222 = vmatpush.msra.mxu3 %v4057_v15  ;;  %v4105_v23 = vld [vmem:[%s8612_s24 + $0xa8] sm:$0xff]  ;;  %v4117_v25 = vld [vmem:[%s8612_s24 + $0x18] sm:$0xff]  ;;  %v4124_v26 = vld [vmem:[%s8612_s24 + $0x90] sm:$0xff] }
  0x18   :  { %136 = vmatpush.msra.mxu0 %v4064_v16  ;;  %156 = vmatpush.msra.mxu1 %v4069_v17  ;;  %v4129_v27 = vld [vmem:[%s8612_s24 + $0x98] sm:$0xff]  ;;  %v4136_v28 = vld [vmem:[%s8612_s24] sm:$0xff]  ;;  %v4141_v29 = vld [vmem:[%s8612_s24 + $0x8] sm:$0xff] }
  0x19   :  { %203 = vmatpush.msra.mxu2 %v4076_v18  ;;  %223 = vmatpush.msra.mxu3 %v4081_v19  ;;  %v4148_v30 = vld [vmem:[%s8612_s24 + $0x80] sm:$0xff]  ;;  %v4153_v31 = vld [vmem:[%s8612_s24 + $0x88] sm:$0xff]  ;;  %v4160_v32 = vld [vmem:[%s8612_s24 + $0x170] sm:$0xff] }
  0x1a   :  { %137 = vmatpush.msra.mxu0 %v4088_v20  ;;  %157 = vmatpush.msra.mxu1 %v4093_v21  ;;  %v4165_v33 = vld [vmem:[%s8612_s24 + $0x178] sm:$0xff]  ;;  %v4174_v34 = vld [vmem:[%s8612_s24 + $0x160] sm:$0xff]  ;;  %v4179_v35 = vld [vmem:[%s8612_s24 + $0x168] sm:$0xff] }
  0x1b   :  { %204 = vmatpush.msra.mxu2 %v4100_v22  ;;  %224 = vmatpush.msra.mxu3 %v4105_v23  ;;  %v4188_v36 = vld [vmem:[%s8612_s24 + $0x150] sm:$0xff]  ;;  %v4193_v37 = vld [vmem:[%s8612_s24 + $0x158] sm:$0xff]  ;;  %v4202_v38 = vld [vmem:[%s8612_s24 + $0x140] sm:$0xff] }
  0x1c   :  { %138 = vmatpush.msra.mxu0 %v4112_v24  ;;  %158 = vmatpush.msra.mxu1 %v4117_v25  ;;  %v4207_v39 = vld [vmem:[%s8612_s24 + $0x148] sm:$0xff]  ;;  %v4216_v40 = vld [vmem:[%s8612_s24 + $0x130] sm:$0xff]  ;;  %v4221_v41 = vld [vmem:[%s8612_s24 + $0x138] sm:$0xff] }
  0x1d   :  { %205 = vmatpush.msra.mxu2 %v4124_v26  ;;  %225 = vmatpush.msra.mxu3 %v4129_v27  ;;  %v4230_v42 = vld [vmem:[%s8612_s24 + $0x120] sm:$0xff]  ;;  %v4235_v43 = vld [vmem:[%s8612_s24 + $0x128] sm:$0xff]  ;;  %v4252_v46 = vld [vmem:[%s8612_s24 + $0x110] sm:$0xff] }
  0x1e   :  { %139 = vmatpush.msra.mxu0 %v4136_v28  ;;  %159 = vmatpush.msra.mxu1 %v4141_v29  ;;  %v74_v44 = vld [vmem:[%s8613_s5] sm:$0x3]  ;;  %v3351_v45 = vld [vmem:[%s8613_s5 + $0x2] sm:$0x3]  ;;  %v4257_v47 = vld [vmem:[%s8612_s24 + $0x118] sm:$0xff] }
  0x1f   :  { %206 = vmatpush.msra.mxu2 %v4148_v30  ;;  %226 = vmatpush.msra.mxu3 %v4153_v31  ;;  %v4266_v48 = vld [vmem:[%s8612_s24 + $0x100] sm:$0xff]  ;;  %v4271_v49 = vld [vmem:[%s8612_s24 + $0x108] sm:$0xff]  ;;  %v3358_v55 = vld [vmem:[%s8613_s5 + $0x10] sm:$0x3]  ;;  %s8615_s24 = sld [smem:[#allocation120_spill]] }
  0x20   :  { %261 = vmatpush.msrb.mxu0 %v4160_v32  ;;  %281 = vmatpush.msrb.mxu1 %v4165_v33  ;;  %v3352_v50 = vld [vmem:[%s8613_s5 + $0x4] sm:$0x3]  ;;  %v3354_v51 = vld [vmem:[%s8613_s5 + $0x8] sm:$0x3]  ;;  %v3353_v52 = vld [vmem:[%s8613_s5 + $0x6] sm:$0x3] }
  0x21   :  { %305 = vmatpush.msrb.mxu2 %v3972_v0  ;;  %325 = vmatpush.msrb.mxu3 %v3977_v1  ;;  %v3355_v53 = vld [vmem:[%s8613_s5 + $0xa] sm:$0x3]  ;;  %v3356_v54 = vld [vmem:[%s8613_s5 + $0xc] sm:$0x3]  ;;  %v3357_v56 = vld [vmem:[%s8613_s5 + $0xe] sm:$0x3] }
  0x22   :  { %262 = vmatpush.msrb.mxu0 %v4174_v34  ;;  %282 = vmatpush.msrb.mxu1 %v4179_v35  ;;  %v3359_v57 = vld [vmem:[%s8613_s5 + $0x12] sm:$0x3]  ;;  %v3360_v58 = vld [vmem:[%s8613_s5 + $0x14] sm:$0x3]  ;;  %v4585_v59 = vld [vmem:[%s8613_s5 + $0x18] sm:$0x3] }
  0x23   :  { %306 = vmatpush.msrb.mxu2 %v3994_v4  ;;  %326 = vmatpush.msrb.mxu3 %v3999_v5  ;;  %v3361_v60 = vld [vmem:[%s8613_s5 + $0x16] sm:$0x3]  ;;  %v4623_v63 = vld [vmem:[%s8614_s3 + $0xe0] sm:$0xff] }
  0x24   :  { %263 = vmatpush.msrb.mxu0 %v4188_v36  ;;  %283 = vmatpush.msrb.mxu1 %v4193_v37  ;;  %v4608_v61 = vld [vmem:[%s8614_s3 + $0xf0] sm:$0xff] }
  0x25   :  { %307 = vmatpush.msrb.mxu2 %v4016_v8  ;;  %327 = vmatpush.msrb.mxu3 %v4023_v9  ;;  %v4613_v62 = vld [vmem:[%s8614_s3 + $0x1b0] sm:$0xff] }
  0x26   :  { %264 = vmatpush.msrb.mxu0 %v4202_v38  ;;  %284 = vmatpush.msrb.mxu1 %v4207_v39 }
  0x27   :  { %308 = vmatpush.msrb.mxu2 %v4040_v12  ;;  %328 = vmatpush.msrb.mxu3 %v4045_v13 }
  0x28   :  { %265 = vmatpush.msrb.mxu0 %v4216_v40  ;;  %285 = vmatpush.msrb.mxu1 %v4221_v41 }
  0x29   :  { %309 = vmatpush.msrb.mxu2 %v4064_v16  ;;  %329 = vmatpush.msrb.mxu3 %v4069_v17 }
  0x2a   :  { %266 = vmatpush.msrb.mxu0 %v4230_v42  ;;  %286 = vmatpush.msrb.mxu1 %v4235_v43 }
  0x2b   :  { %310 = vmatpush.msrb.mxu2 %v4088_v20  ;;  %330 = vmatpush.msrb.mxu3 %v4093_v21 }
  0x2c   :  { %3365 = vmatmul.msk.f32.vlgmr.msra.gmra.mxu0 %vm120_vm0, %v74_v44  ;;  %3383 = vmatmul.msk.f32.vlgmr.msra.gmra.mxu2 %vm120_vm0, %v3351_v45 }
  0x2d   :  { %267 = vmatpush.msrb.mxu0 %v4252_v46  ;;  %287 = vmatpush.msrb.mxu1 %v4257_v47 }
  0x2e   :  { %311 = vmatpush.msrb.mxu2 %v4112_v24  ;;  %331 = vmatpush.msrb.mxu3 %v4117_v25 }
  0x2f   :  { %268 = vmatpush.msrb.mxu0 %v4266_v48  ;;  %288 = vmatpush.msrb.mxu1 %v4271_v49 }
  0x30   :  { %312 = vmatpush.msrb.mxu2 %v4136_v28  ;;  %332 = vmatpush.msrb.mxu3 %v4141_v29 }
  0x31   :  { %3366 = vmatmul.msk.f32.vlgmr.msra.gmra.mxu1 %vm120_vm0, %v74_v44  ;;  %3384 = vmatmul.msk.f32.vlgmr.msra.gmra.mxu3 %vm120_vm0, %v3351_v45  ;;  %v4839_v44 = vld [vmem:[%s8614_s3 + $0x178] sm:$0xff] }
  0x32   :  { %350 = vmatpush.msra.mxu0 %v3982_v2  ;;  %370 = vmatpush.msra.mxu1 %v3989_v3  ;;  %v4846_v45 = vld [vmem:[%s8614_s3 + $0xb8] sm:$0xff] }
  0x33   :  { %395 = vmatpush.msra.mxu2 %v4160_v32  ;;  %415 = vmatpush.msra.mxu3 %v4165_v33 }
  0x34   :  { %351 = vmatpush.msra.mxu0 %v4006_v6  ;;  %371 = vmatpush.msra.mxu1 %v4011_v7 }
  0x35   :  { %396 = vmatpush.msra.mxu2 %v4174_v34  ;;  %416 = vmatpush.msra.mxu3 %v4179_v35 }
  0x36   :  { %3401 = vmatmul.msk.f32.vlgmr.msrb.gmra.mxu0 %vm120_vm0, %v3352_v50  ;;  %372 = vmatpush.msra.mxu1 %v4033_v11 }
  0x37   :  { %352 = vmatpush.msra.mxu0 %v4028_v10  ;;  %397 = vmatpush.msra.mxu2 %v4188_v36 }
  0x38   :  { %417 = vmatpush.msra.mxu3 %v4193_v37  ;;  %373 = vmatpush.msra.mxu1 %v4057_v15 }
  0x39   :  { %353 = vmatpush.msra.mxu0 %v4052_v14  ;;  %398 = vmatpush.msra.mxu2 %v4202_v38 }
  0x3a   :  { %418 = vmatpush.msra.mxu3 %v4207_v39  ;;  %374 = vmatpush.msra.mxu1 %v4081_v19 }
  0x3b   :  { %354 = vmatpush.msra.mxu0 %v4076_v18  ;;  %399 = vmatpush.msra.mxu2 %v4216_v40 }
  0x3c   :  { %419 = vmatpush.msra.mxu3 %v4221_v41  ;;  %375 = vmatpush.msra.mxu1 %v4105_v23 }
  0x3d   :  { %355 = vmatpush.msra.mxu0 %v4100_v22  ;;  %400 = vmatpush.msra.mxu2 %v4230_v42 }
  0x3e   :  { %420 = vmatpush.msra.mxu3 %v4235_v43  ;;  %3402 = vmatmul.msk.f32.vlgmr.msrb.gmra.mxu1 %vm120_vm0, %v3352_v50 }
  0x3f   :  { %356 = vmatpush.msra.mxu0 %v4124_v26  ;;  %376 = vmatpush.msra.mxu1 %v4129_v27 }
  0x40   :  { %401 = vmatpush.msra.mxu2 %v4252_v46  ;;  %421 = vmatpush.msra.mxu3 %v4257_v47 }
  0x41   :  { %357 = vmatpush.msra.mxu0 %v4148_v30  ;;  %377 = vmatpush.msra.mxu1 %v4153_v31 }
  0x42   :  { %402 = vmatpush.msra.mxu2 %v4266_v48  ;;  %422 = vmatpush.msra.mxu3 %v4271_v49 }
  0x43   :  { %3403 = vmatmul.msk.f32.vlgmr.msrb.gmra.mxu2 %vm120_vm0, %v3352_v50  ;;  %3404 = vmatmul.msk.f32.vlgmr.msrb.gmra.mxu3 %vm120_vm0, %v3352_v50  ;;  %v4870_v50 = vld [vmem:[%s8614_s3 + $0x168] sm:$0xff] }
  0x44   :  { %439 = vmatpush.msrb.mxu0 %v3972_v0  ;;  %459 = vmatpush.msrb.mxu1 %v3977_v1 }
  0x45   :  { %484 = vmatpush.msrb.mxu2 %v3982_v2  ;;  %504 = vmatpush.msrb.mxu3 %v3989_v3 }
  0x46   :  { %440 = vmatpush.msrb.mxu0 %v3994_v4  ;;  %460 = vmatpush.msrb.mxu1 %v3999_v5 }
  0x47   :  { %485 = vmatpush.msrb.mxu2 %v4006_v6  ;;  %505 = vmatpush.msrb.mxu3 %v4011_v7 }
  0x48   :  { %441 = vmatpush.msrb.mxu0 %v4016_v8  ;;  %461 = vmatpush.msrb.mxu1 %v4023_v9 }
  0x49   :  { %486 = vmatpush.msrb.mxu2 %v4028_v10  ;;  %506 = vmatpush.msrb.mxu3 %v4033_v11 }
  0x4a   :  { %442 = vmatpush.msrb.mxu0 %v4040_v12  ;;  %462 = vmatpush.msrb.mxu1 %v4045_v13 }
  0x4b   :  { %487 = vmatpush.msrb.mxu2 %v4052_v14  ;;  %507 = vmatpush.msrb.mxu3 %v4057_v15 }
  0x4c   :  { %443 = vmatpush.msrb.mxu0 %v4064_v16  ;;  %463 = vmatpush.msrb.mxu1 %v4069_v17 }
  0x4d   :  { %488 = vmatpush.msrb.mxu2 %v4076_v18  ;;  %508 = vmatpush.msrb.mxu3 %v4081_v19 }
  0x4e   :  { %444 = vmatpush.msrb.mxu0 %v4088_v20  ;;  %464 = vmatpush.msrb.mxu1 %v4093_v21 }
  0x4f   :  { %489 = vmatpush.msrb.mxu2 %v4100_v22  ;;  %509 = vmatpush.msrb.mxu3 %v4105_v23 }
  0x50   :  { %3407 = vmatmul.msk.f32.vlgmr.msra.gmra.mxu2 %vm120_vm0, %v3354_v51  ;;  %445 = vmatpush.msrb.mxu0 %v4112_v24 }
  0x51   :  { %465 = vmatpush.msrb.mxu1 %v4117_v25  ;;  %490 = vmatpush.msrb.mxu2 %v4124_v26 }
  0x52   :  { %510 = vmatpush.msrb.mxu3 %v4129_v27  ;;  %446 = vmatpush.msrb.mxu0 %v4136_v28 }
  0x53   :  { %466 = vmatpush.msrb.mxu1 %v4141_v29  ;;  %491 = vmatpush.msrb.mxu2 %v4148_v30 }
  0x54   :  { %511 = vmatpush.msrb.mxu3 %v4153_v31  ;;  %3405 = vmatmul.msk.f32.vlgmr.msra.gmra.mxu0 %vm120_vm0, %v3353_v52 }
  0x55   :  { %3406 = vmatmul.msk.f32.vlgmr.msra.gmra.mxu1 %vm120_vm0, %v3353_v52  ;;  %3408 = vmatmul.msk.f32.vlgmr.msra.gmra.mxu3 %vm120_vm0, %v3354_v51  ;;  %v4879_v52 = vld [vmem:[%s8614_s3 + $0x2a0] sm:$0xff] }
  0x56   :  { %529 = vmatpush.msra.mxu0 %v4160_v32  ;;  %549 = vmatpush.msra.mxu1 %v4165_v33  ;;  %8618 = vst [vmem:[#allocation4_spill] sm:$0xff] %v4879_v52 }
  0x57   :  { %573 = vmatpush.msra.mxu2 %v3972_v0  ;;  %593 = vmatpush.msra.mxu3 %v3977_v1 }
  0x58   :  { %530 = vmatpush.msra.mxu0 %v4174_v34  ;;  %550 = vmatpush.msra.mxu1 %v4179_v35 }
  0x59   :  { %574 = vmatpush.msra.mxu2 %v3994_v4  ;;  %594 = vmatpush.msra.mxu3 %v3999_v5 }
  0x5a   :  { %531 = vmatpush.msra.mxu0 %v4188_v36  ;;  %551 = vmatpush.msra.mxu1 %v4193_v37 }
  0x5b   :  { %575 = vmatpush.msra.mxu2 %v4016_v8  ;;  %595 = vmatpush.msra.mxu3 %v4023_v9 }
  0x5c   :  { %532 = vmatpush.msra.mxu0 %v4202_v38  ;;  %552 = vmatpush.msra.mxu1 %v4207_v39 }
  0x5d   :  { %576 = vmatpush.msra.mxu2 %v4040_v12  ;;  %596 = vmatpush.msra.mxu3 %v4045_v13 }
  0x5e   :  { %533 = vmatpush.msra.mxu0 %v4216_v40  ;;  %553 = vmatpush.msra.mxu1 %v4221_v41 }
  0x5f   :  { %577 = vmatpush.msra.mxu2 %v4064_v16  ;;  %597 = vmatpush.msra.mxu3 %v4069_v17 }
  0x60   :  { %534 = vmatpush.msra.mxu0 %v4230_v42  ;;  %554 = vmatpush.msra.mxu1 %v4235_v43 }
  0x61   :  { %578 = vmatpush.msra.mxu2 %v4088_v20  ;;  %598 = vmatpush.msra.mxu3 %v4093_v21 }
  0x62   :  { %3409 = vmatmul.msk.f32.vlgmr.msrb.gmra.mxu0 %vm120_vm0, %v3354_v51  ;;  %3411 = vmatmul.msk.f32.vlgmr.msrb.gmra.mxu2 %vm120_vm0, %v3355_v53 }
  0x63   :  { %535 = vmatpush.msra.mxu0 %v4252_v46  ;;  %555 = vmatpush.msra.mxu1 %v4257_v47 }
  0x64   :  { %579 = vmatpush.msra.mxu2 %v4112_v24  ;;  %599 = vmatpush.msra.mxu3 %v4117_v25 }
  0x65   :  { %536 = vmatpush.msra.mxu0 %v4266_v48  ;;  %556 = vmatpush.msra.mxu1 %v4271_v49 }
  0x66   :  { %580 = vmatpush.msra.mxu2 %v4136_v28  ;;  %600 = vmatpush.msra.mxu3 %v4141_v29 }
  0x67   :  { %3410 = vmatmul.msk.f32.vlgmr.msrb.gmra.mxu1 %vm120_vm0, %v3354_v51  ;;  %3412 = vmatmul.msk.f32.vlgmr.msrb.gmra.mxu3 %vm120_vm0, %v3355_v53  ;;  %v4884_v53 = vld [vmem:[%s8614_s3 + $0x20] sm:$0xff] }
  0x68   :  { %618 = vmatpush.msrb.mxu0 %v3982_v2  ;;  %638 = vmatpush.msrb.mxu1 %v3989_v3 }
  0x69   :  { %663 = vmatpush.msrb.mxu2 %v4160_v32  ;;  %683 = vmatpush.msrb.mxu3 %v4165_v33 }
  0x6a   :  { %619 = vmatpush.msrb.mxu0 %v4006_v6  ;;  %639 = vmatpush.msrb.mxu1 %v4011_v7 }
  0x6b   :  { %664 = vmatpush.msrb.mxu2 %v4174_v34  ;;  %684 = vmatpush.msrb.mxu3 %v4179_v35 }
  0x6c   :  { %3413 = vmatmul.msk.f32.vlgmr.msra.gmra.mxu0 %vm120_vm0, %v3356_v54  ;;  %640 = vmatpush.msrb.mxu1 %v4033_v11 }
  0x6d   :  { %620 = vmatpush.msrb.mxu0 %v4028_v10  ;;  %665 = vmatpush.msrb.mxu2 %v4188_v36 }
  0x6e   :  { %685 = vmatpush.msrb.mxu3 %v4193_v37  ;;  %641 = vmatpush.msrb.mxu1 %v4057_v15 }
  0x6f   :  { %621 = vmatpush.msrb.mxu0 %v4052_v14  ;;  %666 = vmatpush.msrb.mxu2 %v4202_v38 }
  0x70   :  { %686 = vmatpush.msrb.mxu3 %v4207_v39  ;;  %642 = vmatpush.msrb.mxu1 %v4081_v19 }
  0x71   :  { %622 = vmatpush.msrb.mxu0 %v4076_v18  ;;  %667 = vmatpush.msrb.mxu2 %v4216_v40 }
  0x72   :  { %687 = vmatpush.msrb.mxu3 %v4221_v41  ;;  %643 = vmatpush.msrb.mxu1 %v4105_v23 }
  0x73   :  { %623 = vmatpush.msrb.mxu0 %v4100_v22  ;;  %668 = vmatpush.msrb.mxu2 %v4230_v42 }
  0x74   :  { %688 = vmatpush.msrb.mxu3 %v4235_v43  ;;  %3414 = vmatmul.msk.f32.vlgmr.msra.gmra.mxu1 %vm120_vm0, %v3356_v54 }
  0x75   :  { %624 = vmatpush.msrb.mxu0 %v4124_v26  ;;  %644 = vmatpush.msrb.mxu1 %v4129_v27 }
  0x76   :  { %669 = vmatpush.msrb.mxu2 %v4252_v46  ;;  %689 = vmatpush.msrb.mxu3 %v4257_v47 }
  0x77   :  { %625 = vmatpush.msrb.mxu0 %v4148_v30  ;;  %645 = vmatpush.msrb.mxu1 %v4153_v31 }
  0x78   :  { %670 = vmatpush.msrb.mxu2 %v4266_v48  ;;  %690 = vmatpush.msrb.mxu3 %v4271_v49 }
  0x79   :  { %3415 = vmatmul.msk.f32.vlgmr.msra.gmra.mxu2 %vm120_vm0, %v3356_v54  ;;  %3416 = vmatmul.msk.f32.vlgmr.msra.gmra.mxu3 %vm120_vm0, %v3356_v54  ;;  %v4891_v54 = vld [vmem:[%s8614_s3 + $0x98] sm:$0xff] }
  0x7a   :  { %707 = vmatpush.msra.mxu0 %v3972_v0  ;;  %727 = vmatpush.msra.mxu1 %v3977_v1 }
  0x7b   :  { %752 = vmatpush.msra.mxu2 %v3982_v2  ;;  %772 = vmatpush.msra.mxu3 %v3989_v3 }
  0x7c   :  { %708 = vmatpush.msra.mxu0 %v3994_v4  ;;  %728 = vmatpush.msra.mxu1 %v3999_v5 }
  0x7d   :  { %753 = vmatpush.msra.mxu2 %v4006_v6  ;;  %773 = vmatpush.msra.mxu3 %v4011_v7 }
  0x7e   :  { %709 = vmatpush.msra.mxu0 %v4016_v8  ;;  %729 = vmatpush.msra.mxu1 %v4023_v9 }
  0x7f   :  { %754 = vmatpush.msra.mxu2 %v4028_v10  ;;  %774 = vmatpush.msra.mxu3 %v4033_v11 }
  0x80   :  { %710 = vmatpush.msra.mxu0 %v4040_v12  ;;  %730 = vmatpush.msra.mxu1 %v4045_v13 }
  0x81   :  { %755 = vmatpush.msra.mxu2 %v4052_v14  ;;  %775 = vmatpush.msra.mxu3 %v4057_v15 }
  0x82   :  { %711 = vmatpush.msra.mxu0 %v4064_v16  ;;  %731 = vmatpush.msra.mxu1 %v4069_v17 }
  0x83   :  { %756 = vmatpush.msra.mxu2 %v4076_v18  ;;  %776 = vmatpush.msra.mxu3 %v4081_v19 }
  0x84   :  { %712 = vmatpush.msra.mxu0 %v4088_v20  ;;  %732 = vmatpush.msra.mxu1 %v4093_v21 }
  0x85   :  { %757 = vmatpush.msra.mxu2 %v4100_v22  ;;  %777 = vmatpush.msra.mxu3 %v4105_v23 }
  0x86   :  { %3419 = vmatmul.msk.f32.vlgmr.msrb.gmra.mxu2 %vm120_vm0, %v3358_v55  ;;  %713 = vmatpush.msra.mxu0 %v4112_v24 }
  0x87   :  { %733 = vmatpush.msra.mxu1 %v4117_v25  ;;  %758 = vmatpush.msra.mxu2 %v4124_v26 }
  0x88   :  { %778 = vmatpush.msra.mxu3 %v4129_v27  ;;  %714 = vmatpush.msra.mxu0 %v4136_v28 }
  0x89   :  { %734 = vmatpush.msra.mxu1 %v4141_v29  ;;  %759 = vmatpush.msra.mxu2 %v4148_v30 }
  0x8a   :  { %779 = vmatpush.msra.mxu3 %v4153_v31  ;;  %3417 = vmatmul.msk.f32.vlgmr.msrb.gmra.mxu0 %vm120_vm0, %v3357_v56 }
  0x8b   :  { %3418 = vmatmul.msk.f32.vlgmr.msrb.gmra.mxu1 %vm120_vm0, %v3357_v56  ;;  %3420 = vmatmul.msk.f32.vlgmr.msrb.gmra.mxu3 %vm120_vm0, %v3358_v55  ;;  %v4903_v56 = vld [vmem:[%s8614_s3 + $0x290] sm:$0xff] }
  0x8c   :  { %797 = vmatpush.msrb.mxu0 %v4160_v32  ;;  %817 = vmatpush.msrb.mxu1 %v4165_v33  ;;  %8620 = vst [vmem:[#allocation6_spill] sm:$0xff] %v4903_v56 }
  0x8d   :  { %841 = vmatpush.msrb.mxu2 %v3972_v0  ;;  %861 = vmatpush.msrb.mxu3 %v3977_v1 }
  0x8e   :  { %798 = vmatpush.msrb.mxu0 %v4174_v34  ;;  %818 = vmatpush.msrb.mxu1 %v4179_v35 }
  0x8f   :  { %842 = vmatpush.msrb.mxu2 %v3994_v4  ;;  %862 = vmatpush.msrb.mxu3 %v3999_v5 }
  0x90   :  { %799 = vmatpush.msrb.mxu0 %v4188_v36  ;;  %819 = vmatpush.msrb.mxu1 %v4193_v37 }
  0x91   :  { %843 = vmatpush.msrb.mxu2 %v4016_v8  ;;  %863 = vmatpush.msrb.mxu3 %v4023_v9 }
  0x92   :  { %800 = vmatpush.msrb.mxu0 %v4202_v38  ;;  %820 = vmatpush.msrb.mxu1 %v4207_v39 }
  0x93   :  { %844 = vmatpush.msrb.mxu2 %v4040_v12  ;;  %864 = vmatpush.msrb.mxu3 %v4045_v13 }
  0x94   :  { %801 = vmatpush.msrb.mxu0 %v4216_v40  ;;  %821 = vmatpush.msrb.mxu1 %v4221_v41 }
  0x95   :  { %845 = vmatpush.msrb.mxu2 %v4064_v16  ;;  %865 = vmatpush.msrb.mxu3 %v4069_v17 }
  0x96   :  { %802 = vmatpush.msrb.mxu0 %v4230_v42  ;;  %822 = vmatpush.msrb.mxu1 %v4235_v43 }
  0x97   :  { %846 = vmatpush.msrb.mxu2 %v4088_v20  ;;  %866 = vmatpush.msrb.mxu3 %v4093_v21 }
  0x98   :  { %3421 = vmatmul.msk.f32.vlgmr.msra.gmra.mxu0 %vm120_vm0, %v3358_v55  ;;  %3423 = vmatmul.msk.f32.vlgmr.msra.gmra.mxu2 %vm120_vm0, %v3359_v57 }
  0x99   :  { %803 = vmatpush.msrb.mxu0 %v4252_v46  ;;  %823 = vmatpush.msrb.mxu1 %v4257_v47 }
  0x9a   :  { %847 = vmatpush.msrb.mxu2 %v4112_v24  ;;  %867 = vmatpush.msrb.mxu3 %v4117_v25 }
  0x9b   :  { %804 = vmatpush.msrb.mxu0 %v4266_v48  ;;  %824 = vmatpush.msrb.mxu1 %v4271_v49 }
  0x9c   :  { %848 = vmatpush.msrb.mxu2 %v4136_v28  ;;  %868 = vmatpush.msrb.mxu3 %v4141_v29 }
  0x9d   :  { %3422 = vmatmul.msk.f32.vlgmr.msra.gmra.mxu1 %vm120_vm0, %v3358_v55  ;;  %3424 = vmatmul.msk.f32.vlgmr.msra.gmra.mxu3 %vm120_vm0, %v3359_v57  ;;  %v4898_v55 = vld [vmem:[%s8614_s3 + $0x158] sm:$0xff] }
  0x9e   :  { %886 = vmatpush.msra.mxu0 %v3982_v2  ;;  %906 = vmatpush.msra.mxu1 %v3989_v3  ;;  %8619 = vst [vmem:[#allocation5_spill] sm:$0xff] %v4898_v55 }
  0x9f   :  { %931 = vmatpush.msra.mxu2 %v4160_v32  ;;  %951 = vmatpush.msra.mxu3 %v4165_v33 }
  0xa0   :  { %887 = vmatpush.msra.mxu0 %v4006_v6  ;;  %907 = vmatpush.msra.mxu1 %v4011_v7 }
  0xa1   :  { %932 = vmatpush.msra.mxu2 %v4174_v34  ;;  %952 = vmatpush.msra.mxu3 %v4179_v35 }
  0xa2   :  { %3425 = vmatmul.msk.f32.vlgmr.msrb.gmra.mxu0 %vm120_vm0, %v3360_v58  ;;  %908 = vmatpush.msra.mxu1 %v4033_v11 }
  0xa3   :  { %888 = vmatpush.msra.mxu0 %v4028_v10  ;;  %933 = vmatpush.msra.mxu2 %v4188_v36 }
  0xa4   :  { %953 = vmatpush.msra.mxu3 %v4193_v37  ;;  %909 = vmatpush.msra.mxu1 %v4057_v15 }
  0xa5   :  { %889 = vmatpush.msra.mxu0 %v4052_v14  ;;  %934 = vmatpush.msra.mxu2 %v4202_v38 }
  0xa6   :  { %954 = vmatpush.msra.mxu3 %v4207_v39  ;;  %910 = vmatpush.msra.mxu1 %v4081_v19 }
  0xa7   :  { %890 = vmatpush.msra.mxu0 %v4076_v18  ;;  %935 = vmatpush.msra.mxu2 %v4216_v40 }
  0xa8   :  { %955 = vmatpush.msra.mxu3 %v4221_v41  ;;  %911 = vmatpush.msra.mxu1 %v4105_v23 }
  0xa9   :  { %891 = vmatpush.msra.mxu0 %v4100_v22  ;;  %936 = vmatpush.msra.mxu2 %v4230_v42 }
  0xaa   :  { %956 = vmatpush.msra.mxu3 %v4235_v43  ;;  %3426 = vmatmul.msk.f32.vlgmr.msrb.gmra.mxu1 %vm120_vm0, %v3360_v58 }
  0xab   :  { %892 = vmatpush.msra.mxu0 %v4124_v26  ;;  %912 = vmatpush.msra.mxu1 %v4129_v27 }
  0xac   :  { %937 = vmatpush.msra.mxu2 %v4252_v46  ;;  %957 = vmatpush.msra.mxu3 %v4257_v47 }
  0xad   :  { %893 = vmatpush.msra.mxu0 %v4148_v30  ;;  %913 = vmatpush.msra.mxu1 %v4153_v31 }
  0xae   :  { %938 = vmatpush.msra.mxu2 %v4266_v48  ;;  %958 = vmatpush.msra.mxu3 %v4271_v49 }
  0xaf   :  { %3427 = vmatmul.msk.f32.vlgmr.msrb.gmra.mxu2 %vm120_vm0, %v3360_v58  ;;  %3428 = vmatmul.msk.f32.vlgmr.msrb.gmra.mxu3 %vm120_vm0, %v3360_v58  ;;  %v4912_v58 = vld [vmem:[%s8614_s3 + $0x10] sm:$0xff] }
  0xb0   :  { %975 = vmatpush.msrb.mxu0 %v3972_v0  ;;  %995 = vmatpush.msrb.mxu1 %v3977_v1  ;;  %v4628_v0 = vld [vmem:[%s8614_s3 + $0x1a0] sm:$0xff]  ;;  %v4637_v1 = vld [vmem:[%s8614_s3 + $0xd0] sm:$0xff] }
  0xb1   :  { %1020 = vmatpush.msrb.mxu2 %v3982_v2  ;;  %1040 = vmatpush.msrb.mxu3 %v3989_v3  ;;  %v4642_v2 = vld [vmem:[%s8614_s3 + $0x190] sm:$0xff]  ;;  %v4651_v3 = vld [vmem:[%s8614_s3 + $0xc0] sm:$0xff] }
  0xb2   :  { %976 = vmatpush.msrb.mxu0 %v3994_v4  ;;  %996 = vmatpush.msrb.mxu1 %v3999_v5  ;;  %v4656_v4 = vld [vmem:[%s8614_s3 + $0x180] sm:$0xff] }
  0xb3   :  { %1021 = vmatpush.msrb.mxu2 %v4006_v6  ;;  %1041 = vmatpush.msrb.mxu3 %v4011_v7  ;;  %v103_v5 = vld [vmem:[%s8615_s24] sm:$0x3]  ;;  %v4668_v6 = vld [vmem:[%s8614_s3 + $0xb0] sm:$0xff]  ;;  %s9175_s24 = sld [smem:[#allocation122_spill]] }
  0xb4   :  { %977 = vmatpush.msrb.mxu0 %v4016_v8  ;;  %997 = vmatpush.msrb.mxu1 %v4023_v9  ;;  %v4673_v7 = vld [vmem:[%s8614_s3 + $0x170] sm:$0xff]  ;;  %v161_v8 = vpop.f32.mrf.mxu1  ;;  %v4677_v9 = vperm.slane %v103_v5, 1 }
  0xb5   :  { %1022 = vmatpush.msrb.mxu2 %v4028_v10  ;;  %1042 = vmatpush.msrb.mxu3 %v4033_v11  ;;  %v4684_v10 = vld [vmem:[%s8614_s3 + $0xa0] sm:$0xff] }
  0xb6   :  { %978 = vmatpush.msrb.mxu0 %v4040_v12  ;;  %998 = vmatpush.msrb.mxu1 %v4045_v13  ;;  %8616 = vst [vmem:[#allocation2_spill] sm:$0xff] %v4677_v9  ;;  %v4689_v11 = vld [vmem:[%s8614_s3 + $0x160] sm:$0xff]  ;;  %v3363_v12 = vld [vmem:[%s8613_s5 + $0x1a] sm:$0x3]  ;;  %v170_v13 = vadd.f32 %v4677_v9, %v161_v8 }
  0xb7   :  { %1023 = vmatpush.msrb.mxu2 %v4052_v14  ;;  %1043 = vmatpush.msrb.mxu3 %v4057_v15  ;;  %v4704_v14 = vld [vmem:[%s8614_s3 + $0x90] sm:$0xff]  ;;  %v4936_v8 = vld [vmem:[%s8614_s3] sm:$0xff] }
  0xb8   :  { %979 = vmatpush.msrb.mxu0 %v4064_v16  ;;  %999 = vmatpush.msrb.mxu1 %v4069_v17  ;;  %v4709_v15 = vld [vmem:[%s8614_s3 + $0x150] sm:$0xff]  ;;  %v228_v16 = vpop.f32.mrf.mxu3  ;;  %v4719_v17 = vld [vmem:[%s8614_s3 + $0x80] sm:$0xff] }
  0xb9   :  { %1024 = vmatpush.msrb.mxu2 %v4076_v18  ;;  %1044 = vmatpush.msrb.mxu3 %v4081_v19  ;;  %v4724_v18 = vld [vmem:[%s8614_s3 + $0x140] sm:$0xff]  ;;  %v232_v19 = vadd.f32 %v228_v16, %v170_v13  ;;  %v4948_v13 = vld [vmem:[%s8614_s3 + $0x138] sm:$0xff] }
  0xba   :  { %980 = vmatpush.msrb.mxu0 %v4088_v20  ;;  %1000 = vmatpush.msrb.mxu1 %v4093_v21  ;;  %v4733_v20 = vld [vmem:[%s8614_s3 + $0xf8] sm:$0xff]  ;;  %8623 = vst [vmem:[#allocation9_spill] sm:$0xff] %v4948_v13 }
  0xbb   :  { %1025 = vmatpush.msrb.mxu2 %v4100_v22  ;;  %1045 = vmatpush.msrb.mxu3 %v4105_v23  ;;  %v4738_v21 = vld [vmem:[%s8614_s3 + $0x1b8] sm:$0xff]  ;;  %v4745_v22 = vld [vmem:[%s8614_s3 + $0x70] sm:$0xff] }
  0xbc   :  { %3431 = vmatmul.msk.f32.vlgmr.msra.gmra.mxu2 %vm120_vm0, %v4585_v59  ;;  %981 = vmatpush.msrb.mxu0 %v4112_v24  ;;  %v4750_v23 = vld [vmem:[%s8614_s3 + $0x130] sm:$0xff]  ;;  %v290_v24 = vpop.f32.mrf.mxu1 }
  0xbd   :  { %1001 = vmatpush.msrb.mxu1 %v4117_v25  ;;  %1026 = vmatpush.msrb.mxu2 %v4124_v26  ;;  %v141_v25 = vpop.f32.mrf.mxu0  ;;  %v4758_v26 = vld [vmem:[%s8614_s3 + $0xe8] sm:$0xff] }
  0xbe   :  { %1046 = vmatpush.msrb.mxu3 %v4129_v27  ;;  %982 = vmatpush.msrb.mxu0 %v4136_v28  ;;  %v4763_v27 = vld [vmem:[%s8614_s3 + $0x1a8] sm:$0xff]  ;;  %v4765_v28 = vperm.slane %v103_v5, 0  ;;  %v4929_v5 = vld [vmem:[%s8614_s3 + $0x280] sm:$0xff] }
  0xbf   :  { %1002 = vmatpush.msrb.mxu1 %v4141_v29  ;;  %1027 = vmatpush.msrb.mxu2 %v4148_v30  ;;  %v4772_v29 = vld [vmem:[%s8614_s3 + $0x60] sm:$0xff]  ;;  %8622 = vst [vmem:[#allocation8_spill] sm:$0xff] %v4929_v5 }
  0xc0   :  { %1047 = vmatpush.msrb.mxu3 %v4153_v31  ;;  %3429 = vmatmul.msk.f32.vlgmr.msra.gmra.mxu0 %vm120_vm0, %v3361_v60  ;;  %8617 = vst [vmem:[#allocation3_spill] sm:$0xff] %v4765_v28  ;;  %v4777_v30 = vld [vmem:[%s8614_s3 + $0x120] sm:$0xff]  ;;  %v4781_v31 = vadd.f32 %v290_v24, %v232_v19  ;;  %v4956_v19 = vld [vmem:[%s8614_s3 + $0x270] sm:$0xff] }
  0xc1   :  { %3430 = vmatmul.msk.f32.vlgmr.msra.gmra.mxu1 %vm120_vm0, %v3361_v60  ;;  %3432 = vmatmul.msk.f32.vlgmr.msra.gmra.mxu3 %vm120_vm0, %v4585_v59  ;;  %v4924_v60 = vld [vmem:[%s8614_s3 + $0x148] sm:$0xff]  ;;  %8624 = vst [vmem:[#allocation10_spill] sm:$0xff] %v4956_v19  ;;  %v4961_v24 = vld [vmem:[%s8614_s3 + $0x370] sm:$0xff] }
  0xc2   :  { %1065 = vmatpush.msra.mxu0 %v4160_v32  ;;  %1085 = vmatpush.msra.mxu1 %v4165_v33  ;;  %v3364_v32 = vld [vmem:[%s8613_s5 + $0x1c] sm:$0x3]  ;;  %8621 = vst [vmem:[#allocation7_spill] sm:$0xff] %v4924_v60  ;;  %s9201_s5 = sld [smem:[#allocation124_spill]] }
  0xc3   :  { %1162 = vmatpush.msra.mxu2 %v4608_v61  ;;  %1186 = vmatpush.msra.mxu3 %v4613_v62  ;;  %v4789_v33 = vld [vmem:[%s8614_s3 + $0x198] sm:$0xff] }
  0xc4   :  { %1066 = vmatpush.msra.mxu0 %v4174_v34  ;;  %1086 = vmatpush.msra.mxu1 %v4179_v35  ;;  %v4796_v34 = vld [vmem:[%s8614_s3 + $0xd8] sm:$0xff]  ;;  %v4801_v35 = vld [vmem:[%s8614_s3 + $0x50] sm:$0xff] }
  0xc5   :  { %1163 = vmatpush.msra.mxu2 %v4623_v63  ;;  %1187 = vmatpush.msra.mxu3 %v4628_v0  ;;  %v270_v51 = vpop.f32.mrf.mxu0 }
  0xc6   :  { %1067 = vmatpush.msra.mxu0 %v4188_v36  ;;  %1087 = vmatpush.msra.mxu1 %v4193_v37  ;;  %v4808_v36 = vld [vmem:[%s8614_s3 + $0x110] sm:$0xff]  ;;  %v4813_v37 = vld [vmem:[%s8614_s3 + $0x188] sm:$0xff] }
  0xc7   :  { %1164 = vmatpush.msra.mxu2 %v4637_v1  ;;  %1188 = vmatpush.msra.mxu3 %v4642_v2 }
  0xc8   :  { %1068 = vmatpush.msra.mxu0 %v4202_v38  ;;  %1088 = vmatpush.msra.mxu1 %v4207_v39  ;;  %v169_v38 = vadd.f32 %v4765_v28, %v141_v25  ;;  %v4821_v39 = vld [vmem:[%s8614_s3 + $0xc8] sm:$0xff] }
  0xc9   :  { %1165 = vmatpush.msra.mxu2 %v4651_v3  ;;  %1189 = vmatpush.msra.mxu3 %v4656_v4  ;;  %v4968_v25 = vld [vmem:[%s8614_s3 + $0x68] sm:$0xff] }
  0xca   :  { %1069 = vmatpush.msra.mxu0 %v4216_v40  ;;  %1089 = vmatpush.msra.mxu1 %v4221_v41  ;;  %v4826_v40 = vld [vmem:[%s8614_s3 + $0x40] sm:$0xff]  ;;  %v208_v41 = vpop.f32.mrf.mxu2 }
  0xcb   :  { %1166 = vmatpush.msra.mxu2 %v4668_v6  ;;  %1190 = vmatpush.msra.mxu3 %v4673_v7 }
  0xcc   :  { %1070 = vmatpush.msra.mxu0 %v4230_v42  ;;  %1090 = vmatpush.msra.mxu1 %v4235_v43  ;;  %v8195_v42 = vmax.f32 %v4781_v31, 0.0  ;;  %v4834_v43 = vld [vmem:[%s8614_s3 + $0x100] sm:$0xff] }
  0xcd   :  { %1167 = vmatpush.msra.mxu2 %v4684_v10  ;;  %1191 = vmatpush.msra.mxu3 %v4689_v11 }
  0xce   :  { %3433 = vmatmul.msk.f32.vlgmr.msrb.gmra.mxu0 %vm120_vm0, %v4585_v59  ;;  %3435 = vmatmul.msk.f32.vlgmr.msrb.gmra.mxu2 %vm120_vm0, %v3363_v12 }
  0xcf   :  { %1071 = vmatpush.msra.mxu0 %v4252_v46  ;;  %1091 = vmatpush.msra.mxu1 %v4257_v47  ;;  %v4853_v46 = vld [vmem:[%s8614_s3 + $0x2b0] sm:$0xff] }
  0xd0   :  { %1168 = vmatpush.msra.mxu2 %v4704_v14  ;;  %1192 = vmatpush.msra.mxu3 %v4709_v15  ;;  %v4858_v47 = vld [vmem:[%s8614_s3 + $0x30] sm:$0xff] }
  0xd1   :  { %1072 = vmatpush.msra.mxu0 %v4266_v48  ;;  %1092 = vmatpush.msra.mxu1 %v4271_v49  ;;  %v231_v48 = vadd.f32 %v208_v41, %v169_v38  ;;  %v4865_v49 = vld [vmem:[%s8614_s3 + $0xa8] sm:$0xff]  ;;  %v4981_v38 = vld [vmem:[%s8614_s3 + $0x260] sm:$0xff] }
  0xd2   :  { %1169 = vmatpush.msra.mxu2 %v4719_v17  ;;  %1193 = vmatpush.msra.mxu3 %v4724_v18  ;;  %8626 = vst [vmem:[#allocation12_spill] sm:$0xff] %v4981_v38  ;;  %v4986_v41 = vld [vmem:[%s8614_s3 + $0x360] sm:$0xff] }
  0xd3   :  { %3434 = vmatmul.msk.f32.vlgmr.msrb.gmra.mxu1 %vm120_vm0, %v4585_v59  ;;  %3436 = vmatmul.msk.f32.vlgmr.msrb.gmra.mxu3 %vm120_vm0, %v3363_v12  ;;  %v4905_v57 = vadd.f32 %v270_v51, %v231_v48  ;;  %v4917_v59 = vld [vmem:[%s8614_s3 + $0x88] sm:$0xff]  ;;  %v4941_v12 = vld [vmem:[%s8614_s3 + $0x78] sm:$0xff]  ;;  %8627 = vst [vmem:[#allocation13_spill] sm:$0xff] %v4986_v41 }
  0xd4   :  { %1202 = vmatpush.msrb.mxu0 %v4733_v20  ;;  %1226 = vmatpush.msrb.mxu1 %v4738_v21  ;;  %v4993_v48 = vld [vmem:[%s8614_s3 + $0x58] sm:$0xff] }
  0xd5   :  { %1170 = vmatpush.msra.mxu2 %v4745_v22  ;;  %1194 = vmatpush.msra.mxu3 %v4750_v23  ;;  %v8194_v16 = vmax.f32 %v4905_v57, 0.0  ;;  %8628 = vst [vmem:[#allocation14_spill] sm:$0xff] %v4993_v48  ;;  %v4998_v51 = vld [vmem:[%s8614_s3 + $0x118] sm:$0xff] }
  0xd6   :  { %1203 = vmatpush.msrb.mxu0 %v4758_v26  ;;  %1227 = vmatpush.msrb.mxu1 %v4763_v27  ;;  %8629 = vst [vmem:[#allocation15_spill] sm:$0xff] %v4998_v51 }
  0xd7   :  { %1171 = vmatpush.msra.mxu2 %v4772_v29  ;;  %1195 = vmatpush.msra.mxu3 %v4777_v30 }
  0xd8   :  { %3437 = vmatmul.msk.f32.vlgmr.msra.gmra.mxu0 %vm120_vm0, %v3364_v32  ;;  %1228 = vmatpush.msrb.mxu1 %v4789_v33 }
  0xd9   :  { %1204 = vmatpush.msrb.mxu0 %v4796_v34  ;;  %1172 = vmatpush.msra.mxu2 %v4801_v35 }
  0xda   :  { %1196 = vmatpush.msra.mxu3 %v4808_v36  ;;  %1229 = vmatpush.msrb.mxu1 %v4813_v37 }
  0xdb   :  { %1205 = vmatpush.msrb.mxu0 %v4821_v39  ;;  %1173 = vmatpush.msra.mxu2 %v4826_v40 }
  0xdc   :  { %1197 = vmatpush.msra.mxu3 %v4834_v43  ;;  %1230 = vmatpush.msrb.mxu1 %v4839_v44 }
  0xdd   :  { %3439 = vmatmul.msk.f32.vlgmr.msra.gmra.mxu3 %vm1158_vm1, %v8195_v42  ;;  %1206 = vmatpush.msrb.mxu0 %v4846_v45  ;;  %v5010_v42 = vld [vmem:[%s8614_s3 + $0x350] sm:$0xff] }
  0xde   :  { %1309 = vmatpush.msrb.mxu3 %v4853_v46  ;;  %1174 = vmatpush.msra.mxu2 %v4858_v47  ;;  %8631 = vst [vmem:[#allocation17_spill] sm:$0xff] %v5010_v42 }
  0xdf   :  { %1207 = vmatpush.msrb.mxu0 %v4865_v49  ;;  %1231 = vmatpush.msrb.mxu1 %v4870_v50 }
  0xe0   :  { %1310 = vmatpush.msrb.mxu3 %v4879_v52  ;;  %1175 = vmatpush.msra.mxu2 %v4884_v53 }
  0xe1   :  { %3438 = vmatmul.msk.f32.vlgmr.msra.gmra.mxu1 %vm120_vm0, %v3364_v32  ;;  %1208 = vmatpush.msrb.mxu0 %v4891_v54  ;;  %v4973_v32 = vld [vmem:[%s8614_s3 + $0x128] sm:$0xff] }
  0xe2   :  { %1232 = vmatpush.msrb.mxu1 %v4898_v55  ;;  %1311 = vmatpush.msrb.mxu3 %v4903_v56  ;;  %8625 = vst [vmem:[#allocation11_spill] sm:$0xff] %v4973_v32  ;;  %v5048_v56 = vld [vmem:[%s8614_s3 + $0x2b8] sm:$0xff] }
  0xe3   :  { %1176 = vmatpush.msra.mxu2 %v4912_v58  ;;  %1209 = vmatpush.msrb.mxu0 %v4917_v59  ;;  %8637 = vst [vmem:[#allocation23_spill] sm:$0xff] %v5048_v56 }
  0xe4   :  { %1233 = vmatpush.msrb.mxu1 %v4924_v60  ;;  %1312 = vmatpush.msrb.mxu3 %v4929_v5  ;;  %v5041_v5 = vld [vmem:[%s8614_s3 + $0x38] sm:$0xff]  ;;  %v334_v60 = vpop.f32.mrf.mxu3 }
  0xe5   :  { %1177 = vmatpush.msra.mxu2 %v4936_v8  ;;  %1210 = vmatpush.msrb.mxu0 %v4941_v12  ;;  %8636 = vst [vmem:[#allocation22_spill] sm:$0xff] %v5041_v5  ;;  %v338_v55 = vadd.f32 %v334_v60, %v4677_v9  ;;  %v5124_v60 = vld [vmem:[%s8614_s3 + $0x288] sm:$0xff] }
  0xe6   :  { %1178 = vmatmul.f32.vlgmr.msra.gmra.mxu2 %v8194_v16  ;;  %1234 = vmatpush.msrb.mxu1 %v4948_v13  ;;  %v5005_v16 = vld [vmem:[%s8614_s3 + $0x250] sm:$0xff]  ;;  %v5034_v13 = vld [vmem:[%s8614_s3 + $0x340] sm:$0xff]  ;;  %8650 = vst [vmem:[#allocation35_spill] sm:$0xff] %v5124_v60 }
  0xe7   :  { %1313 = vmatpush.msrb.mxu3 %v4956_v19  ;;  %1333 = vmatpush.msrb.mxu2 %v4961_v24  ;;  %8630 = vst [vmem:[#allocation16_spill] sm:$0xff] %v5005_v16  ;;  %v5017_v19 = vld [vmem:[%s8614_s3 + $0x48] sm:$0xff] }
  0xe8   :  { %1211 = vmatpush.msrb.mxu0 %v4968_v25  ;;  %1235 = vmatpush.msrb.mxu1 %v4973_v32  ;;  %8632 = vst [vmem:[#allocation18_spill] sm:$0xff] %v5017_v19  ;;  %v5022_v32 = vld [vmem:[%s8614_s3 + $0x108] sm:$0xff] }
  0xe9   :  { %1314 = vmatpush.msrb.mxu3 %v4981_v38  ;;  %1334 = vmatpush.msrb.mxu2 %v4986_v41  ;;  %8633 = vst [vmem:[#allocation19_spill] sm:$0xff] %v5022_v32  ;;  %v5029_v38 = vld [vmem:[%s8614_s3 + $0x240] sm:$0xff] }
  0xea   :  { %1212 = vmatpush.msrb.mxu0 %v4993_v48  ;;  %1236 = vmatpush.msrb.mxu1 %v4998_v51  ;;  %8634 = vst [vmem:[#allocation20_spill] sm:$0xff] %v5029_v38  ;;  %v314_v51 = vpop.f32.mrf.mxu2  ;;  %v359_v48 = vpop.f32.mrf.mxu0 }
  0xeb   :  { %8635 = vst [vmem:[#allocation21_spill] sm:$0xff] %v5034_v13  ;;  %1315 = vmatpush.msrb.mxu3 %v5005_v16  ;;  %1335 = vmatpush.msrb.mxu2 %v5010_v42  ;;  %v5053_v16 = vld [vmem:[%s8614_s3 + $0x230] sm:$0xff]  ;;  %v8641_v42 = vmax.f32 %v4781_v31, 0.0  ;;  %v5086_v31 = vld [vmem:[%s8614_s3 + $0x320] sm:$0xff] }
  0xec   :  { %1213 = vmatpush.msrb.mxu0 %v5017_v19  ;;  %1237 = vmatpush.msrb.mxu1 %v5022_v32  ;;  %8638 = vst [vmem:[#allocation24_spill] sm:$0xff] %v5053_v16  ;;  %v5060_v19 = vld [vmem:[%s8614_s3 + $0x330] sm:$0xff]  ;;  %v5065_v32 = vld [vmem:[%s8614_s3 + $0x28] sm:$0xff]  ;;  %v424_v52 = vpop.f32.mrf.mxu3 }
  0xed   :  { %1316 = vmatpush.msrb.mxu3 %v5029_v38  ;;  %1336 = vmatpush.msrb.mxu2 %v5034_v13  ;;  %8639 = vst [vmem:[#allocation25_spill] sm:$0xff] %v5060_v19  ;;  %v5074_v38 = vld [vmem:[%s8614_s3 + $0x2a8] sm:$0xff]  ;;  %v5079_v13 = vld [vmem:[%s8614_s3 + $0x220] sm:$0xff] }
  0xee   :  { %8640 = vst [vmem:[#allocation26_spill] sm:$0xff] %v5065_v32  ;;  %3440 = vmatmul.msk.f32.vlgmr.msrb.gmra.mxu1 %vm1158_vm1, %v8641_v42  ;;  %1214 = vmatpush.msrb.mxu0 %v5041_v5  ;;  %v5091_v42 = vld [vmem:[%s8614_s3 + $0x18] sm:$0xff]  ;;  %v337_v5 = vadd.f32 %v314_v51, %v4765_v28  ;;  %v379_v51 = vpop.f32.mrf.mxu1 }
  0xef   :  { %8642 = vst [vmem:[#allocation27_spill] sm:$0xff] %v5074_v38  ;;  %1349 = vmatpush.msra.mxu1 %v5048_v56  ;;  %1317 = vmatpush.msrb.mxu3 %v5053_v16  ;;  %v5098_v56 = vld [vmem:[%s8614_s3 + $0x298] sm:$0xff]  ;;  %v5103_v16 = vld [vmem:[%s8614_s3 + $0x210] sm:$0xff] }
  0xf0   :  { %8643 = vst [vmem:[#allocation28_spill] sm:$0xff] %v5079_v13  ;;  %1337 = vmatpush.msrb.mxu2 %v5060_v19  ;;  %1215 = vmatpush.msrb.mxu0 %v5065_v32  ;;  %v5112_v32 = vld [vmem:[%s8614_s3 + $0x310] sm:$0xff]  ;;  %v5117_v19 = vld [vmem:[%s8614_s3 + $0x8] sm:$0xff] }
  0xf1   :  { %8644 = vst [vmem:[#allocation29_spill] sm:$0xff] %v5086_v31  ;;  %1350 = vmatpush.msra.mxu1 %v5074_v38  ;;  %1318 = vmatpush.msrb.mxu3 %v5079_v13  ;;  %v5129_v13 = vld [vmem:[%s8614_s3 + $0x200] sm:$0xff] }
  0xf2   :  { %8645 = vst [vmem:[#allocation30_spill] sm:$0xff] %v5091_v42  ;;  %1338 = vmatpush.msrb.mxu2 %v5086_v31  ;;  %1216 = vmatpush.msrb.mxu0 %v5091_v42  ;;  %v5136_v38 = vld [vmem:[%s8614_s3 + $0x300] sm:$0xff]  ;;  %v5143_v42 = vld [vmem:[%s8614_s3 + $0x278] sm:$0xff]  ;;  %v383_v31 = vadd.f32 %v379_v51, %v338_v55  ;;  %v404_v41 = vpop.f32.mrf.mxu2  ;;  %v8655_v55 = vmax.f32 %v4905_v57, 0.0 }
  0xf3   :  { %8646 = vst [vmem:[#allocation31_spill] sm:$0xff] %v5098_v56  ;;  %1351 = vmatpush.msra.mxu1 %v5098_v56  ;;  %1319 = vmatpush.msrb.mxu3 %v5103_v16  ;;  %v5148_v56 = vld [vmem:[%s8614_s3 + $0x378] sm:$0xff]  ;;  %v5180_v51 = vld [vmem:[%s8614_s3 + $0x1e0] sm:$0xff] }
  0xf4   :  { %8647 = vst [vmem:[#allocation32_spill] sm:$0xff] %v5103_v16  ;;  %1339 = vmatpush.msrb.mxu2 %v5112_v32  ;;  %1217 = vmatpush.msrb.mxu0 %v5117_v19  ;;  %v382_v16 = vadd.f32 %v359_v48, %v337_v5  ;;  %v5168_v5 = vld [vmem:[%s8614_s3 + $0x268] sm:$0xff]  ;;  %v5185_v57 = vld [vmem:[%s8614_s3 + $0x2e0] sm:$0xff] }
  0xf5   :  { %8648 = vst [vmem:[#allocation33_spill] sm:$0xff] %v5112_v32  ;;  %1352 = vmatpush.msra.mxu1 %v5124_v60  ;;  %1320 = vmatpush.msrb.mxu3 %v5129_v13  ;;  %v5160_v32 = vld [vmem:[%s8614_s3 + $0x2f0] sm:$0xff]  ;;  %v5173_v48 = vld [vmem:[%s8614_s3 + $0x368] sm:$0xff]  ;;  %v428_v60 = vadd.f32 %v424_v52, %v383_v31  ;;  %v5233_v31 = vld [vmem:[%s8614_s3 + $0x2c0] sm:$0xff] }
  0xf6   :  { %8649 = vst [vmem:[#allocation34_spill] sm:$0xff] %v5117_v19  ;;  %v5155_v19 = vld [vmem:[%s8614_s3 + $0x1f0] sm:$0xff]  ;;  %1340 = vmatpush.msrb.mxu2 %v5136_v38  ;;  %1218 = vmatmul.f32.vlgmr.msrb.gmra.mxu0 %v8655_v55  ;;  %v5192_v55 = vld [vmem:[%s8614_s3 + $0x258] sm:$0xff]  ;;  %v5216_v52 = vld [vmem:[%s8614_s3 + $0x248] sm:$0xff] }
  0xf7   :  { %8651 = vst [vmem:[#allocation36_spill] sm:$0xff] %v5129_v13  ;;  %1353 = vmatpush.msra.mxu1 %v5143_v42  ;;  %1373 = vmatpush.msra.mxu0 %v5148_v56  ;;  %v427_v13 = vadd.f32 %v404_v41, %v382_v16  ;;  %v5221_v16 = vld [vmem:[%s8614_s3 + $0x348] sm:$0xff]  ;;  %v5228_v41 = vld [vmem:[%s8614_s3 + $0x1c0] sm:$0xff] }
  0xf8   :  { %8652 = vst [vmem:[#allocation37_spill] sm:$0xff] %v5143_v42  ;;  %1321 = vmatpush.msrb.mxu3 %v5155_v19  ;;  %1341 = vmatpush.msrb.mxu2 %v5160_v32  ;;  %v5197_v42 = vld [vmem:[%s8614_s3 + $0x358] sm:$0xff] }
  0xf9   :  { %8653 = vst [vmem:[#allocation38_spill] sm:$0xff] %v5155_v19  ;;  %1354 = vmatpush.msra.mxu1 %v5168_v5  ;;  %1374 = vmatpush.msra.mxu0 %v5173_v48  ;;  %v5204_v19 = vld [vmem:[%s8614_s3 + $0x1d0] sm:$0xff] }
  0xfa   :  { %8654 = vst [vmem:[#allocation39_spill] sm:$0xff] %v5160_v32  ;;  %v5209_v32 = vld [vmem:[%s8614_s3 + $0x2d0] sm:$0xff]  ;;  %1322 = vmatpush.msrb.mxu3 %v5180_v51  ;;  %1342 = vmatpush.msrb.mxu2 %v5185_v57 }
  0xfb   :  { %8656 = vst [vmem:[#allocation40_spill] sm:$0xff] %v5168_v5  ;;  %1355 = vmatpush.msra.mxu1 %v5192_v55  ;;  %1375 = vmatpush.msra.mxu0 %v5197_v42  ;;  %v5239_v5 = vmax.f32 %v428_v60, 0.0  ;;  %v5263_v60 = vld [vmem:[%s8614_s3 + $0x530] sm:$0xff] }
  0xfc   :  { %8657 = vst [vmem:[#allocation41_spill] sm:$0xff] %v5173_v48  ;;  %1323 = vmatpush.msrb.mxu3 %v5204_v19  ;;  %1343 = vmatpush.msrb.mxu2 %v5209_v32 }
  0xfd   :  { %8658 = vst [vmem:[#allocation42_spill] sm:$0xff] %v5180_v51  ;;  %v5237_v51 = vmax.f32 %v427_v13, 0.0  ;;  %1356 = vmatpush.msra.mxu1 %v5216_v52  ;;  %1376 = vmatpush.msra.mxu0 %v5221_v16  ;;  %v5258_v13 = vld [vmem:[%s8614_s3 + $0x470] sm:$0xff] }
  0xfe   :  { %8659 = vst [vmem:[#allocation43_spill] sm:$0xff] %v5185_v57  ;;  %1324 = vmatpush.msrb.mxu3 %v5228_v41  ;;  %1344 = vmatpush.msrb.mxu2 %v5233_v31  ;;  %v513_v57 = vpop.f32.mrf.mxu3 }
  0xff   :  { %8660 = vst [vmem:[#allocation44_spill] sm:$0xff] %v5192_v55  ;;  %v5246_v55 = vld [vmem:[%s8614_s3 + $0x238] sm:$0xff]  ;;  %1325 = vmatmul.f32.vlgmr.msrb.gmra.mxu3 %v5237_v51  ;;  %3497 = vmatmul.msk.f32.vlgmr.msrb.gmra.mxu2 %vm1158_vm1, %v5239_v5 }
 0x100   :  { %8661 = vst [vmem:[#allocation45_spill] sm:$0xff] %v5197_v42  ;;  %v5251_v42 = vld [vmem:[%s8614_s3 + $0x338] sm:$0xff]  ;;  %1357 = vmatpush.msra.mxu1 %v5246_v55  ;;  %1451 = vmatpush.msra.mxu2 %v5258_v13 }
 0x101   :  { %8662 = vst [vmem:[#allocation46_spill] sm:$0xff] %v5204_v19  ;;  %1377 = vmatpush.msra.mxu0 %v5251_v42  ;;  %v5283_v19 = vld [vmem:[%s8614_s3 + $0x460] sm:$0xff]  ;;  %1475 = vmatpush.msra.mxu3 %v5263_v60 }
 0x102   :  { %8663 = vst [vmem:[#allocation47_spill] sm:$0xff] %v5209_v32  ;;  %1452 = vmatpush.msra.mxu2 %v5283_v19 }
 0x103   :  { %8664 = vst [vmem:[#allocation48_spill] sm:$0xff] %v5216_v52  ;;  %v5276_v52 = vld [vmem:[%s8614_s3 + $0x328] sm:$0xff] }
 0x104   :  { %8665 = vst [vmem:[#allocation49_spill] sm:$0xff] %v5221_v16  ;;  %1378 = vmatpush.msra.mxu0 %v5276_v52  ;;  %v468_v16 = vpop.f32.mrf.mxu1 }
 0x105   :  { %8666 = vst [vmem:[#allocation50_spill] sm:$0xff] %v5228_v41  ;;  %v5271_v41 = vld [vmem:[%s8614_s3 + $0x228] sm:$0xff]  ;;  %v472_v32 = vadd.f32 %v468_v16, %v4677_v9  ;;  %v5428_v16 = vld [vmem:[%s8614_s3 + $0x400] sm:$0xff]  ;;  %v5447_v9 = vld [vmem:[%s8614_s3 + $0x538] sm:$0xff] }
 0x106   :  { %8667 = vst [vmem:[#allocation51_spill] sm:$0xff] %v5233_v31  ;;  %v5288_v31 = vld [vmem:[%s8614_s3 + $0x520] sm:$0xff]  ;;  %1358 = vmatpush.msra.mxu1 %v5271_v41 }
 0x107   :  { %8668 = vst [vmem:[#allocation52_spill] sm:$0xff] %v5246_v55  ;;  %v5295_v55 = vld [vmem:[%s8614_s3 + $0x218] sm:$0xff]  ;;  %1476 = vmatpush.msra.mxu3 %v5288_v31 }
 0x108   :  { %8669 = vst [vmem:[#allocation53_spill] sm:$0xff] %v5251_v42  ;;  %v5300_v42 = vld [vmem:[%s8614_s3 + $0x318] sm:$0xff]  ;;  %1359 = vmatpush.msra.mxu1 %v5295_v55 }
 0x109   :  { %8670 = vst [vmem:[#allocation54_spill] sm:$0xff] %v5258_v13  ;;  %v5307_v13 = vld [vmem:[%s8614_s3 + $0x450] sm:$0xff]  ;;  %1379 = vmatpush.msra.mxu0 %v5300_v42 }
 0x10a   :  { %8671 = vst [vmem:[#allocation55_spill] sm:$0xff] %v5263_v60  ;;  %v5312_v60 = vld [vmem:[%s8614_s3 + $0x510] sm:$0xff]  ;;  %1453 = vmatpush.msra.mxu2 %v5307_v13 }
 0x10b   :  { %8672 = vst [vmem:[#allocation56_spill] sm:$0xff] %v5271_v41  ;;  %v5319_v41 = vld [vmem:[%s8614_s3 + $0x208] sm:$0xff]  ;;  %1477 = vmatpush.msra.mxu3 %v5312_v60 }
 0x10c   :  { %8673 = vst [vmem:[#allocation57_spill] sm:$0xff] %v5276_v52  ;;  %v5324_v52 = vld [vmem:[%s8614_s3 + $0x308] sm:$0xff]  ;;  %1360 = vmatpush.msra.mxu1 %v5319_v41 }
 0x10d   :  { %8674 = vst [vmem:[#allocation58_spill] sm:$0xff] %v5283_v19  ;;  %v5331_v19 = vld [vmem:[%s8614_s3 + $0x440] sm:$0xff]  ;;  %1380 = vmatpush.msra.mxu0 %v5324_v52 }
 0x10e   :  { %8675 = vst [vmem:[#allocation59_spill] sm:$0xff] %v5288_v31  ;;  %v5336_v31 = vld [vmem:[%s8614_s3 + $0x500] sm:$0xff]  ;;  %1454 = vmatpush.msra.mxu2 %v5331_v19 }
 0x10f   :  { %8676 = vst [vmem:[#allocation60_spill] sm:$0xff] %v5295_v55  ;;  %v5343_v55 = vld [vmem:[%s8614_s3 + $0x1f8] sm:$0xff]  ;;  %1478 = vmatpush.msra.mxu3 %v5336_v31 }
 0x110   :  { %8677 = vst [vmem:[#allocation61_spill] sm:$0xff] %v5300_v42  ;;  %v5348_v42 = vld [vmem:[%s8614_s3 + $0x2f8] sm:$0xff]  ;;  %1361 = vmatpush.msra.mxu1 %v5343_v55 }
 0x111   :  { %8678 = vst [vmem:[#allocation62_spill] sm:$0xff] %v5307_v13  ;;  %v5355_v13 = vld [vmem:[%s8614_s3 + $0x430] sm:$0xff]  ;;  %1381 = vmatpush.msra.mxu0 %v5348_v42 }
 0x112   :  { %8679 = vst [vmem:[#allocation63_spill] sm:$0xff] %v5312_v60  ;;  %v5360_v60 = vld [vmem:[%s8614_s3 + $0x4f0] sm:$0xff]  ;;  %1455 = vmatpush.msra.mxu2 %v5355_v13 }
 0x113   :  { %8680 = vst [vmem:[#allocation64_spill] sm:$0xff] %v5319_v41  ;;  %v5367_v41 = vld [vmem:[%s8614_s3 + $0x1e8] sm:$0xff]  ;;  %1479 = vmatpush.msra.mxu3 %v5360_v60 }
 0x114   :  { %8681 = vst [vmem:[#allocation65_spill] sm:$0xff] %v5324_v52  ;;  %v5372_v52 = vld [vmem:[%s8614_s3 + $0x2e8] sm:$0xff]  ;;  %1362 = vmatpush.msra.mxu1 %v5367_v41 }
 0x115   :  { %8682 = vst [vmem:[#allocation66_spill] sm:$0xff] %v5331_v19  ;;  %v5379_v19 = vld [vmem:[%s8614_s3 + $0x420] sm:$0xff]  ;;  %1382 = vmatpush.msra.mxu0 %v5372_v52 }
 0x116   :  { %8683 = vst [vmem:[#allocation67_spill] sm:$0xff] %v5336_v31  ;;  %v5384_v31 = vld [vmem:[%s8614_s3 + $0x4e0] sm:$0xff]  ;;  %1456 = vmatpush.msra.mxu2 %v5379_v19 }
 0x117   :  { %8684 = vst [vmem:[#allocation68_spill] sm:$0xff] %v5343_v55  ;;  %v5391_v55 = vld [vmem:[%s8614_s3 + $0x1d8] sm:$0xff]  ;;  %1480 = vmatpush.msra.mxu3 %v5384_v31 }
 0x118   :  { %8685 = vst [vmem:[#allocation69_spill] sm:$0xff] %v5348_v42  ;;  %v5396_v42 = vld [vmem:[%s8614_s3 + $0x2d8] sm:$0xff]  ;;  %1363 = vmatpush.msra.mxu1 %v5391_v55 }
 0x119   :  { %8686 = vst [vmem:[#allocation70_spill] sm:$0xff] %v5355_v13  ;;  %v5403_v13 = vld [vmem:[%s8614_s3 + $0x410] sm:$0xff]  ;;  %1383 = vmatpush.msra.mxu0 %v5396_v42 }
 0x11a   :  { %8687 = vst [vmem:[#allocation71_spill] sm:$0xff] %v5360_v60  ;;  %v5408_v60 = vld [vmem:[%s8614_s3 + $0x4d0] sm:$0xff]  ;;  %1457 = vmatpush.msra.mxu2 %v5403_v13 }
 0x11b   :  { %8688 = vst [vmem:[#allocation72_spill] sm:$0xff] %v5367_v41  ;;  %v5416_v41 = vld [vmem:[%s8614_s3 + $0x1c8] sm:$0xff]  ;;  %1481 = vmatpush.msra.mxu3 %v5408_v60 }
 0x11c   :  { %8689 = vst [vmem:[#allocation73_spill] sm:$0xff] %v5372_v52  ;;  %v5421_v52 = vld [vmem:[%s8614_s3 + $0x2c8] sm:$0xff]  ;;  %1364 = vmatpush.msra.mxu1 %v5416_v41  ;;  %1458 = vmatpush.msra.mxu2 %v5428_v16 }
 0x11d   :  { %8690 = vst [vmem:[#allocation74_spill] sm:$0xff] %v5379_v19  ;;  %1384 = vmatpush.msra.mxu0 %v5421_v52  ;;  %v517_v19 = vadd.f32 %v513_v57, %v472_v32  ;;  %1365 = vmatmul.f32.vlgmr.msra.gmra.mxu1 %v5237_v51  ;;  %v5467_v32 = vld [vmem:[%s8614_s3 + $0x468] sm:$0xff] }
 0x11e   :  { %8691 = vst [vmem:[#allocation75_spill] sm:$0xff] %v5384_v31  ;;  %v5433_v31 = vld [vmem:[%s8614_s3 + $0x4c0] sm:$0xff]  ;;  %3498 = vmatmul.msk.f32.vlgmr.msra.gmra.mxu0 %vm1158_vm1, %v5239_v5  ;;  %v5472_v57 = vld [vmem:[%s8614_s3 + $0x528] sm:$0xff]  ;;  %1515 = vmatpush.msrb.mxu1 %v5447_v9 }
 0x11f   :  { %8692 = vst [vmem:[#allocation76_spill] sm:$0xff] %v5391_v55  ;;  %v5442_v55 = vld [vmem:[%s8614_s3 + $0x478] sm:$0xff]  ;;  %1482 = vmatpush.msra.mxu3 %v5433_v31 }
 0x120   :  { %8693 = vst [vmem:[#allocation77_spill] sm:$0xff] %v5396_v42  ;;  %v448_v42 = vpop.f32.mrf.mxu0  ;;  %1491 = vmatpush.msrb.mxu0 %v5442_v55  ;;  %1516 = vmatpush.msrb.mxu1 %v5472_v57 }
 0x121   :  { %8694 = vst [vmem:[#allocation78_spill] sm:$0xff] %v5403_v13  ;;  %v471_v48 = vadd.f32 %v448_v42, %v4765_v28  ;;  %v5528_v42 = vld [vmem:[%s8614_s3 + $0x3c0] sm:$0xff] }
 0x122   :  { %8695 = vst [vmem:[#allocation79_spill] sm:$0xff] %v5408_v60  ;;  %v5459_v60 = vld [vmem:[%s8614_s3 + $0x4b0] sm:$0xff]  ;;  %1492 = vmatpush.msrb.mxu0 %v5467_v32 }
 0x123   :  { %8696 = vst [vmem:[#allocation80_spill] sm:$0xff] %v5416_v41  ;;  %v5454_v41 = vld [vmem:[%s8614_s3 + $0x3f0] sm:$0xff]  ;;  %1483 = vmatpush.msra.mxu3 %v5459_v60 }
 0x124   :  { %8697 = vst [vmem:[#allocation81_spill] sm:$0xff] %v5421_v52  ;;  %v558_v52 = vpop.f32.mrf.mxu1  ;;  %1459 = vmatpush.msra.mxu2 %v5454_v41 }
 0x125   :  { %8698 = vst [vmem:[#allocation82_spill] sm:$0xff] %v5428_v16  ;;  %v5484_v16 = vld [vmem:[%s8614_s3 + $0x4a0] sm:$0xff]  ;;  %v562_v13 = vadd.f32 %v558_v52, %v517_v19  ;;  %v5516_v19 = vld [vmem:[%s8614_s3 + $0x448] sm:$0xff] }
 0x126   :  { %8699 = vst [vmem:[#allocation83_spill] sm:$0xff] %v5433_v31  ;;  %v5479_v31 = vld [vmem:[%s8614_s3 + $0x3e0] sm:$0xff]  ;;  %1484 = vmatpush.msra.mxu3 %v5484_v16  ;;  %v5521_v52 = vld [vmem:[%s8614_s3 + $0x508] sm:$0xff] }
 0x127   :  { %8700 = vst [vmem:[#allocation84_spill] sm:$0xff] %v5442_v55  ;;  %v5491_v55 = vld [vmem:[%s8614_s3 + $0x458] sm:$0xff]  ;;  %1460 = vmatpush.msra.mxu2 %v5479_v31 }
 0x128   :  { %8701 = vst [vmem:[#allocation85_spill] sm:$0xff] %v5447_v9  ;;  %v5496_v9 = vld [vmem:[%s8614_s3 + $0x518] sm:$0xff]  ;;  %1493 = vmatpush.msrb.mxu0 %v5491_v55 }
 0x129   :  { %8702 = vst [vmem:[#allocation86_spill] sm:$0xff] %v5454_v41  ;;  %v5503_v41 = vld [vmem:[%s8614_s3 + $0x3d0] sm:$0xff]  ;;  %1517 = vmatpush.msrb.mxu1 %v5496_v9 }
 0x12a   :  { %8703 = vst [vmem:[#allocation87_spill] sm:$0xff] %v5459_v60  ;;  %v5508_v60 = vld [vmem:[%s8614_s3 + $0x490] sm:$0xff]  ;;  %1461 = vmatpush.msra.mxu2 %v5503_v41  ;;  %1494 = vmatpush.msrb.mxu0 %v5516_v19 }
 0x12b   :  { %8704 = vst [vmem:[#allocation88_spill] sm:$0xff] %v5467_v32  ;;  %1485 = vmatpush.msra.mxu3 %v5508_v60  ;;  %1518 = vmatpush.msrb.mxu1 %v5521_v52 }
 0x12c   :  { %8705 = vst [vmem:[#allocation89_spill] sm:$0xff] %v5472_v57  ;;  %v493_v57 = vpop.f32.mrf.mxu2  ;;  %1462 = vmatpush.msra.mxu2 %v5528_v42 }
 0x12d   :  { %8706 = vst [vmem:[#allocation90_spill] sm:$0xff] %v5479_v31  ;;  %v5549_v31 = vld [vmem:[%s8614_s3 + $0x4f8] sm:$0xff]  ;;  %v516_v32 = vadd.f32 %v493_v57, %v471_v48  ;;  %v5569_v48 = vld [vmem:[%s8614_s3 + $0x4e8] sm:$0xff]  ;;  %v5576_v57 = vld [vmem:[%s8614_s3 + $0x3a0] sm:$0xff] }
 0x12e   :  { %8707 = vst [vmem:[#allocation91_spill] sm:$0xff] %v5484_v16  ;;  %v5533_v16 = vld [vmem:[%s8614_s3 + $0x480] sm:$0xff]  ;;  %1519 = vmatpush.msrb.mxu1 %v5549_v31 }
 0x12f   :  { %8708 = vst [vmem:[#allocation92_spill] sm:$0xff] %v5491_v55  ;;  %v5540_v55 = vld [vmem:[%s8614_s3 + $0x438] sm:$0xff]  ;;  %1486 = vmatpush.msra.mxu3 %v5533_v16 }
 0x130   :  { %8709 = vst [vmem:[#allocation93_spill] sm:$0xff] %v5496_v9  ;;  %v5542_v9 = vmax.f32 %v562_v13, 0.0  ;;  %v5561_v13 = vld [vmem:[%s8614_s3 + $0x428] sm:$0xff]  ;;  %1495 = vmatpush.msrb.mxu0 %v5540_v55  ;;  %1520 = vmatpush.msrb.mxu1 %v5569_v48 }
 0x131   :  { %8710 = vst [vmem:[#allocation94_spill] sm:$0xff] %v5503_v41  ;;  %1535 = vmatpush.msrb.mxu3 %v4608_v61 }
 0x132   :  { %8711 = vst [vmem:[#allocation95_spill] sm:$0xff] %v5508_v60  ;;  %v5556_v60 = vld [vmem:[%s8614_s3 + $0x3b0] sm:$0xff]  ;;  %3555 = vmatmul.msk.f32.vlgmr.msra.gmra.mxu3 %vm1158_vm1, %v5542_v9  ;;  %1496 = vmatpush.msrb.mxu0 %v5561_v13 }
 0x133   :  { %8712 = vst [vmem:[#allocation96_spill] sm:$0xff] %v5521_v52  ;;  %v538_v52 = vpop.f32.mrf.mxu0  ;;  %1463 = vmatpush.msra.mxu2 %v5556_v60  ;;  %1536 = vmatpush.msrb.mxu3 %v4623_v63  ;;  %v5614_v63 = vld [vmem:[%s8614_s3 + $0x380] sm:$0xff] }
 0x134   :  { %8713 = vst [vmem:[#allocation97_spill] sm:$0xff] %v5528_v42  ;;  %v561_v61 = vadd.f32 %v538_v52, %v516_v32  ;;  %v5607_v32 = vld [vmem:[%s8614_s3 + $0x4c8] sm:$0xff]  ;;  %v5619_v52 = vld [vmem:[%s8614_s3 + $0x3f8] sm:$0xff] }
 0x135   :  { %8714 = vst [vmem:[#allocation98_spill] sm:$0xff] %v5533_v16  ;;  %v5581_v16 = vld [vmem:[%s8614_s3 + $0x418] sm:$0xff]  ;;  %1464 = vmatpush.msra.mxu2 %v5576_v57  ;;  %1537 = vmatpush.msrb.mxu3 %v4637_v1 }
 0x136   :  { %8715 = vst [vmem:[#allocation99_spill] sm:$0xff] %v5540_v55  ;;  %v5595_v55 = vld [vmem:[%s8614_s3 + $0x390] sm:$0xff]  ;;  %1497 = vmatpush.msrb.mxu0 %v5581_v16  ;;  %v5628_v1 = vmax.f32 %v561_v61, 0.0  ;;  %v5656_v61 = vld [vmem:[%s8614_s3 + $0x498] sm:$0xff] }
 0x137   :  { %8716 = vst [vmem:[#allocation100_spill] sm:$0xff] %v5549_v31  ;;  %v5588_v31 = vld [vmem:[%s8614_s3 + $0x4d8] sm:$0xff]  ;;  %1465 = vmatpush.msra.mxu2 %v5595_v55  ;;  %1538 = vmatpush.msrb.mxu3 %v4651_v3 }
 0x138   :  { %8717 = vst [vmem:[#allocation101_spill] sm:$0xff] %v5556_v60  ;;  %v5600_v60 = vld [vmem:[%s8614_s3 + $0x408] sm:$0xff]  ;;  %1521 = vmatpush.msrb.mxu1 %v5588_v31  ;;  %v5651_v3 = vld [vmem:[%s8614_s3 + $0x3d8] sm:$0xff] }
 0x139   :  { %8718 = vst [vmem:[#allocation102_spill] sm:$0xff] %v5569_v48  ;;  %1498 = vmatpush.msrb.mxu0 %v5600_v60  ;;  %1466 = vmatpush.msra.mxu2 %v5614_v63  ;;  %v5637_v48 = vld [vmem:[%s8614_s3 + $0x3e8] sm:$0xff] }
 0x13a   :  { %8719 = vst [vmem:[#allocation103_spill] sm:$0xff] %v5581_v16  ;;  %1522 = vmatpush.msrb.mxu1 %v5607_v32  ;;  %1467 = vmatmul.f32.vlgmr.msra.gmra.mxu2 %v5628_v1 }
 0x13b   :  { %8720 = vst [vmem:[#allocation104_spill] sm:$0xff] %v5588_v31  ;;  %v5626_v31 = vld [vmem:[%s8614_s3 + $0x4b8] sm:$0xff]  ;;  %1499 = vmatpush.msrb.mxu0 %v5619_v52  ;;  %1539 = vmatpush.msrb.mxu3 %v4668_v6  ;;  %v5670_v6 = vld [vmem:[%s8614_s3 + $0x488] sm:$0xff] }
 0x13c   :  { %8721 = vst [vmem:[#allocation105_spill] sm:$0xff] %v5595_v55  ;;  %1523 = vmatpush.msrb.mxu1 %v5626_v31  ;;  %1559 = vmatpush.msrb.mxu2 %v4613_v62  ;;  %v5665_v62 = vld [vmem:[%s8614_s3 + $0x3c8] sm:$0xff] }
 0x13d   :  { %8722 = vst [vmem:[#allocation106_spill] sm:$0xff] %v5600_v60  ;;  %v5642_v60 = vld [vmem:[%s8614_s3 + $0x4a8] sm:$0xff]  ;;  %1500 = vmatpush.msrb.mxu0 %v5637_v48  ;;  %1540 = vmatpush.msrb.mxu3 %v4684_v10 }
 0x13e   :  { %8723 = vst [vmem:[#allocation107_spill] sm:$0xff] %v5614_v63  ;;  %1524 = vmatpush.msrb.mxu1 %v5642_v60  ;;  %1560 = vmatpush.msrb.mxu2 %v4628_v0  ;;  %v5679_v0 = vld [vmem:[%s8614_s3 + $0x3b8] sm:$0xff]  ;;  %v5688_v10 = vld [vmem:[%s8614_s3 + $0x3a8] sm:$0xff] }
 0x13f   :  { %8724 = vst [vmem:[#allocation108_spill] sm:$0xff] %v5619_v52  ;;  %1501 = vmatpush.msrb.mxu0 %v5651_v3  ;;  %1541 = vmatpush.msrb.mxu3 %v4704_v14  ;;  %v8734_v14 = vld [vmem:[#allocation14_spill] sm:$0xff] }
 0x140   :  { %8725 = vst [vmem:[#allocation109_spill] sm:$0xff] %v5637_v48  ;;  %1525 = vmatpush.msrb.mxu1 %v5656_v61  ;;  %1561 = vmatpush.msrb.mxu2 %v4642_v2  ;;  %v5698_v2 = vld [vmem:[%s8614_s3 + $0x398] sm:$0xff] }
 0x141   :  { %8726 = vst [vmem:[#allocation110_spill] sm:$0xff] %v5651_v3  ;;  %1502 = vmatpush.msrb.mxu0 %v5665_v62  ;;  %1542 = vmatpush.msrb.mxu3 %v4719_v17  ;;  %v8736_v17 = vld [vmem:[#allocation6_spill] sm:$0xff] }
 0x142   :  { %8727 = vst [vmem:[#allocation111_spill] sm:$0xff] %v5665_v62  ;;  %1526 = vmatpush.msrb.mxu1 %v5670_v6  ;;  %1562 = vmatpush.msrb.mxu2 %v4656_v4  ;;  %v5707_v4 = vld [vmem:[%s8614_s3 + $0x388] sm:$0xff] }
 0x143   :  { %8728 = vst [vmem:[#allocation112_spill] sm:$0xff] %v5679_v0  ;;  %3556 = vmatmul.msk.f32.vlgmr.msrb.gmra.mxu1 %vm1158_vm1, %v5542_v9  ;;  %1503 = vmatpush.msrb.mxu0 %v5679_v0 }
 0x144   :  { %8729 = vst [vmem:[#allocation113_spill] sm:$0xff] %v5688_v10  ;;  %1575 = vmatpush.msra.mxu1 %v4733_v20  ;;  %1543 = vmatpush.msrb.mxu3 %v4745_v22  ;;  %v8738_v20 = vld [vmem:[#allocation18_spill] sm:$0xff]  ;;  %v8740_v22 = vld [vmem:[#allocation8_spill] sm:$0xff] }
 0x145   :  { %8730 = vst [vmem:[#allocation114_spill] sm:$0xff] %v5698_v2  ;;  %1563 = vmatpush.msrb.mxu2 %v4673_v7  ;;  %1504 = vmatpush.msrb.mxu0 %v5688_v10  ;;  %v8732_v7 = vld [vmem:[#allocation4_spill] sm:$0xff] }
 0x146   :  { %1576 = vmatpush.msra.mxu1 %v4758_v26  ;;  %1544 = vmatpush.msrb.mxu3 %v4772_v29  ;;  %8731 = vst [vmem:[#allocation115_spill] sm:$0xff] %v5707_v4  ;;  %v8742_v26 = vld [vmem:[#allocation22_spill] sm:$0xff] }
 0x147   :  { %1564 = vmatpush.msrb.mxu2 %v4689_v11  ;;  %1505 = vmatpush.msrb.mxu0 %v5698_v2  ;;  %v8733_v11 = vld [vmem:[#allocation13_spill] sm:$0xff]  ;;  %v8744_v29 = vld [vmem:[#allocation10_spill] sm:$0xff] }
 0x148   :  { %1577 = vmatpush.msra.mxu1 %v4796_v34  ;;  %1545 = vmatpush.msrb.mxu3 %v4801_v35  ;;  %v8747_v34 = vld [vmem:[#allocation11_spill] sm:$0xff]  ;;  %v8748_v35 = vld [vmem:[#allocation12_spill] sm:$0xff] }
 0x149   :  { %1565 = vmatpush.msrb.mxu2 %v4709_v15  ;;  %1506 = vmatpush.msrb.mxu0 %v5707_v4  ;;  %v8735_v15 = vld [vmem:[#allocation5_spill] sm:$0xff] }
 0x14a   :  { %1578 = vmatpush.msra.mxu1 %v4821_v39  ;;  %1546 = vmatpush.msrb.mxu3 %v4826_v40  ;;  %v8751_v39 = vld [vmem:[#allocation15_spill] sm:$0xff]  ;;  %v8752_v40 = vld [vmem:[#allocation16_spill] sm:$0xff] }
 0x14b   :  { %1566 = vmatpush.msrb.mxu2 %v4724_v18  ;;  %1507 = vmatmul.f32.vlgmr.msrb.gmra.mxu0 %v5628_v1  ;;  %v8737_v18 = vld [vmem:[#allocation17_spill] sm:$0xff] }
 0x14c   :  { %1579 = vmatpush.msra.mxu1 %v4846_v45  ;;  %1599 = vmatpush.msra.mxu0 %v4738_v21  ;;  %v8739_v21 = vld [vmem:[#allocation7_spill] sm:$0xff] }
 0x14d   :  { %1547 = vmatpush.msrb.mxu3 %v4858_v47  ;;  %1567 = vmatpush.msrb.mxu2 %v4750_v23  ;;  %v8741_v23 = vld [vmem:[#allocation21_spill] sm:$0xff]  ;;  %v8755_v45 = vld [vmem:[#allocation19_spill] sm:$0xff] }
 0x14e   :  { %1580 = vmatpush.msra.mxu1 %v4865_v49  ;;  %1600 = vmatpush.msra.mxu0 %v4763_v27  ;;  %v8743_v27 = vld [vmem:[#allocation9_spill] sm:$0xff]  ;;  %v8757_v47 = vld [vmem:[#allocation23_spill] sm:$0xff]  ;;  %v8758_v49 = vld [vmem:[#allocation24_spill] sm:$0xff] }
 0x14f   :  { %1548 = vmatpush.msrb.mxu3 %v4884_v53  ;;  %1568 = vmatpush.msrb.mxu2 %v4777_v30  ;;  %v8745_v30 = vld [vmem:[#allocation25_spill] sm:$0xff]  ;;  %v8760_v53 = vld [vmem:[#allocation27_spill] sm:$0xff] }
 0x150   :  { %1581 = vmatpush.msra.mxu1 %v4891_v54  ;;  %1601 = vmatpush.msra.mxu0 %v4789_v33  ;;  %v8746_v33 = vld [vmem:[#allocation26_spill] sm:$0xff]  ;;  %v8761_v54 = vld [vmem:[#allocation41_spill] sm:$0xff] }
 0x151   :  { %1549 = vmatpush.msrb.mxu3 %v4912_v58  ;;  %1569 = vmatpush.msrb.mxu2 %v4808_v36  ;;  %v8749_v36 = vld [vmem:[#allocation29_spill] sm:$0xff]  ;;  %v8762_v58 = vld [vmem:[#allocation28_spill] sm:$0xff] }
 0x152   :  { %1582 = vmatpush.msra.mxu1 %v4917_v59  ;;  %1602 = vmatpush.msra.mxu0 %v4813_v37  ;;  %v8750_v37 = vld [vmem:[#allocation30_spill] sm:$0xff]  ;;  %v8763_v59 = vld [vmem:[#allocation43_spill] sm:$0xff] }
 0x153   :  { %1550 = vmatpush.msrb.mxu3 %v4936_v8  ;;  %1570 = vmatpush.msrb.mxu2 %v4834_v43  ;;  %v8753_v43 = vld [vmem:[#allocation33_spill] sm:$0xff]  ;;  %v8764_v8 = vld [vmem:[#allocation31_spill] sm:$0xff] }
 0x154   :  { %1551 = vmatmul.f32.vlgmr.msrb.gmra.mxu3 %v5237_v51  ;;  %3557 = vmatmul.msk.f32.vlgmr.msrb.gmra.mxu2 %vm1158_vm1, %v5239_v5 }
 0x155   :  { %1583 = vmatpush.msra.mxu1 %v4941_v12  ;;  %1603 = vmatpush.msra.mxu0 %v4839_v44  ;;  %v8754_v44 = vld [vmem:[#allocation34_spill] sm:$0xff]  ;;  %v8765_v12 = vld [vmem:[#allocation45_spill] sm:$0xff] }
 0x156   :  { %1617 = vmatpush.msra.mxu2 %v4853_v46  ;;  %1641 = vmatpush.msra.mxu3 %v4961_v24  ;;  %v8756_v46 = vld [vmem:[#allocation20_spill] sm:$0xff] }
 0x157   :  { %1584 = vmatpush.msra.mxu1 %v4968_v25  ;;  %1604 = vmatpush.msra.mxu0 %v4870_v50  ;;  %v8759_v50 = vld [vmem:[#allocation39_spill] sm:$0xff]  ;;  %v8766_v24 = vld [vmem:[#allocation32_spill] sm:$0xff] }
 0x158   :  { %1618 = vmatpush.msra.mxu2 %v8732_v7  ;;  %1642 = vmatpush.msra.mxu3 %v8733_v11  ;;  %v8767_v25 = vld [vmem:[#allocation47_spill] sm:$0xff]  ;;  %v8770_v7 = vld [vmem:[#allocation36_spill] sm:$0xff] }
 0x159   :  { %1585 = vmatpush.msra.mxu1 %v8734_v14  ;;  %1605 = vmatpush.msra.mxu0 %v8735_v15  ;;  %v8771_v11 = vld [vmem:[#allocation51_spill] sm:$0xff]  ;;  %v8772_v14 = vld [vmem:[#allocation37_spill] sm:$0xff] }
 0x15a   :  { %1619 = vmatpush.msra.mxu2 %v8736_v17  ;;  %1643 = vmatpush.msra.mxu3 %v8737_v18  ;;  %v8773_v15 = vld [vmem:[#allocation53_spill] sm:$0xff]  ;;  %v8774_v17 = vld [vmem:[#allocation54_spill] sm:$0xff] }
 0x15b   :  { %1586 = vmatpush.msra.mxu1 %v8738_v20  ;;  %1606 = vmatpush.msra.mxu0 %v8739_v21  ;;  %v8775_v18 = vld [vmem:[#allocation38_spill] sm:$0xff]  ;;  %v8776_v20 = vld [vmem:[#allocation40_spill] sm:$0xff]  ;;  %v8777_v21 = vld [vmem:[#allocation57_spill] sm:$0xff] }
 0x15c   :  { %1620 = vmatpush.msra.mxu2 %v8740_v22  ;;  %1644 = vmatpush.msra.mxu3 %v8741_v23  ;;  %v8778_v22 = vld [vmem:[#allocation58_spill] sm:$0xff] }
 0x15d   :  { %1587 = vmatpush.msra.mxu1 %v8742_v26  ;;  %1607 = vmatpush.msra.mxu0 %v8743_v27  ;;  %v8779_v23 = vld [vmem:[#allocation42_spill] sm:$0xff]  ;;  %v8780_v27 = vld [vmem:[#allocation44_spill] sm:$0xff] }
 0x15e   :  { %1621 = vmatpush.msra.mxu2 %v8744_v29  ;;  %1645 = vmatpush.msra.mxu3 %v8745_v30  ;;  %v8781_v29 = vld [vmem:[#allocation61_spill] sm:$0xff] }
 0x15f   :  { %1588 = vmatpush.msra.mxu1 %v8746_v33  ;;  %1608 = vmatpush.msra.mxu0 %v8747_v34  ;;  %v8782_v34 = vld [vmem:[#allocation62_spill] sm:$0xff] }
 0x160   :  { %1622 = vmatpush.msra.mxu2 %v8748_v35  ;;  %1646 = vmatpush.msra.mxu3 %v8749_v36  ;;  %v8783_v35 = vld [vmem:[#allocation46_spill] sm:$0xff] }
 0x161   :  { %1589 = vmatpush.msra.mxu1 %v8750_v37  ;;  %1609 = vmatpush.msra.mxu0 %v8751_v39  ;;  %v8784_v39 = vld [vmem:[#allocation48_spill] sm:$0xff] }
 0x162   :  { %1623 = vmatpush.msra.mxu2 %v8752_v40  ;;  %1647 = vmatpush.msra.mxu3 %v8753_v43  ;;  %v8785_v40 = vld [vmem:[#allocation65_spill] sm:$0xff] }
 0x163   :  { %1590 = vmatpush.msra.mxu1 %v8754_v44  ;;  %1610 = vmatpush.msra.mxu0 %v8755_v45  ;;  %v8786_v45 = vld [vmem:[#allocation66_spill] sm:$0xff] }
 0x164   :  { %1624 = vmatpush.msra.mxu2 %v8756_v46  ;;  %1648 = vmatpush.msra.mxu3 %v5136_v38  ;;  %v8787_v46 = vld [vmem:[#allocation50_spill] sm:$0xff] }
 0x165   :  { %1591 = vmatmul.f32.vlgmr.msra.gmra.mxu1 %v5237_v51  ;;  %3558 = vmatmul.msk.f32.vlgmr.msra.gmra.mxu0 %vm1158_vm1, %v5239_v5  ;;  %v8768_v5 = vld [vmem:[#allocation35_spill] sm:$0xff]  ;;  %v8769_v51 = vld [vmem:[#allocation49_spill] sm:$0xff] }
 0x166   :  { %1657 = vmatpush.msrb.mxu0 %v8757_v47  ;;  %1681 = vmatpush.msrb.mxu1 %v5148_v56 }
 0x167   :  { %1625 = vmatpush.msra.mxu2 %v8758_v49  ;;  %1649 = vmatpush.msra.mxu3 %v8759_v50 }
 0x168   :  { %1658 = vmatpush.msrb.mxu0 %v8760_v53  ;;  %1682 = vmatpush.msrb.mxu1 %v8761_v54 }
 0x169   :  { %1626 = vmatpush.msra.mxu2 %v8762_v58  ;;  %1650 = vmatpush.msra.mxu3 %v8763_v59 }
 0x16a   :  { %1659 = vmatpush.msrb.mxu0 %v8764_v8  ;;  %1683 = vmatpush.msrb.mxu1 %v8765_v12  ;;  %v8812_v12 = vld [vmem:[#allocation75_spill] sm:$0xff] }
 0x16b   :  { %1627 = vmatpush.msra.mxu2 %v8766_v24  ;;  %1651 = vmatpush.msra.mxu3 %v8767_v25  ;;  %v627_v25 = vpop.f32.mrf.mxu0 }
 0x16c   :  { %1660 = vmatpush.msrb.mxu0 %v8768_v5  ;;  %1684 = vmatpush.msrb.mxu1 %v8769_v51  ;;  %v8799_v51 = vld [vmem:[#allocation63_spill] sm:$0xff] }
 0x16d   :  { %1628 = vmatpush.msra.mxu2 %v8770_v7  ;;  %1652 = vmatpush.msra.mxu3 %v8771_v11  ;;  %v8794_v11 = vld [vmem:[#allocation74_spill] sm:$0xff] }
 0x16e   :  { %3559 = vmatmul.msk.f32.vlgmr.msra.gmra.mxu3 %vm1158_vm1, %v5542_v9  ;;  %1661 = vmatpush.msrb.mxu0 %v8772_v14 }
 0x16f   :  { %1685 = vmatpush.msrb.mxu1 %v8773_v15  ;;  %1702 = vmatpush.msrb.mxu3 %v8774_v17  ;;  %v8790_v17 = vld [vmem:[#allocation70_spill] sm:$0xff]  ;;  %v8793_v15 = vld [vmem:[#allocation73_spill] sm:$0xff] }
 0x170   :  { %1629 = vmatpush.msra.mxu2 %v8775_v18  ;;  %1662 = vmatpush.msrb.mxu0 %v8776_v20 }
 0x171   :  { %1686 = vmatpush.msrb.mxu1 %v8777_v21  ;;  %1703 = vmatpush.msrb.mxu3 %v8778_v22  ;;  %v8788_v21 = vld [vmem:[#allocation52_spill] sm:$0xff]  ;;  %v8789_v22 = vld [vmem:[#allocation69_spill] sm:$0xff] }
 0x172   :  { %1630 = vmatpush.msra.mxu2 %v8779_v23  ;;  %1663 = vmatpush.msrb.mxu0 %v8780_v27 }
 0x173   :  { %1687 = vmatpush.msrb.mxu1 %v8781_v29  ;;  %1704 = vmatpush.msrb.mxu3 %v8782_v34  ;;  %v8791_v29 = vld [vmem:[#allocation55_spill] sm:$0xff]  ;;  %v8792_v34 = vld [vmem:[#allocation56_spill] sm:$0xff] }
 0x174   :  { %1631 = vmatpush.msra.mxu2 %v8783_v35  ;;  %1664 = vmatpush.msrb.mxu0 %v8784_v39  ;;  %v8800_v39 = vld [vmem:[#allocation64_spill] sm:$0xff]  ;;  %v647_v35 = vpop.f32.mrf.mxu1 }
 0x175   :  { %1688 = vmatpush.msrb.mxu1 %v8785_v40  ;;  %1705 = vmatpush.msrb.mxu3 %v8786_v45  ;;  %v8795_v40 = vld [vmem:[#allocation59_spill] sm:$0xff]  ;;  %v8796_v45 = vld [vmem:[#allocation60_spill] sm:$0xff] }
 0x176   :  { %1632 = vmatpush.msra.mxu2 %v8787_v46  ;;  %1665 = vmatpush.msrb.mxu0 %v8788_v21  ;;  %v8797_v46 = vld [vmem:[#allocation77_spill] sm:$0xff]  ;;  %v8798_v21 = vld [vmem:[#allocation78_spill] sm:$0xff] }
 0x177   :  { %1633 = vmatmul.f32.vlgmr.msra.gmra.mxu2 %v5628_v1  ;;  %1689 = vmatpush.msrb.mxu1 %v8789_v22  ;;  %v582_v22 = vpop.f32.mrf.mxu2 }
 0x178   :  { %1706 = vmatpush.msrb.mxu3 %v8790_v17  ;;  %1726 = vmatpush.msrb.mxu2 %v8791_v29  ;;  %v602_v17 = vpop.f32.mrf.mxu3  ;;  %v8801_v29 = vld [vmem:[#allocation81_spill] sm:$0xff] }
 0x179   :  { %1666 = vmatpush.msrb.mxu0 %v8792_v34  ;;  %1690 = vmatpush.msrb.mxu1 %v8793_v15  ;;  %v8802_v34 = vld [vmem:[#allocation82_spill] sm:$0xff]  ;;  %v8803_v15 = vld [vmem:[#allocation67_spill] sm:$0xff] }
 0x17a   :  { %1707 = vmatpush.msrb.mxu3 %v8794_v11  ;;  %1727 = vmatpush.msrb.mxu2 %v8795_v40  ;;  %v8804_v11 = vld [vmem:[#allocation68_spill] sm:$0xff] }
 0x17b   :  { %1667 = vmatpush.msrb.mxu0 %v8796_v45  ;;  %1691 = vmatpush.msrb.mxu1 %v8797_v46  ;;  %v8805_v46 = vld [vmem:[#allocation84_spill] sm:$0xff] }
 0x17c   :  { %1708 = vmatpush.msrb.mxu3 %v8798_v21  ;;  %1728 = vmatpush.msrb.mxu2 %v8799_v51  ;;  %v8806_v21 = vld [vmem:[#allocation86_spill] sm:$0xff]  ;;  %v8807_v51 = vld [vmem:[#allocation71_spill] sm:$0xff]  ;;  %v8808_v45 = vld [vmem:[#allocation72_spill] sm:$0xff] }
 0x17d   :  { %1668 = vmatpush.msrb.mxu0 %v8800_v39  ;;  %1692 = vmatpush.msrb.mxu1 %v8801_v29  ;;  %v605_v39 = vadd.f32 %v582_v22, %v4765_v28  ;;  %v8809_v29 = vld [vmem:[#allocation2_spill] sm:$0xff] }
 0x17e   :  { %1709 = vmatpush.msrb.mxu3 %v8802_v34  ;;  %1729 = vmatpush.msrb.mxu2 %v8803_v15  ;;  %v606_v40 = vadd.f32 %v602_v17, %v8809_v29  ;;  %v8810_v34 = vld [vmem:[#allocation88_spill] sm:$0xff]  ;;  %v8811_v15 = vld [vmem:[#allocation90_spill] sm:$0xff] }
 0x17f   :  { %3560 = vmatmul.msk.f32.vlgmr.msrb.gmra.mxu1 %vm1158_vm1, %v5542_v9  ;;  %1669 = vmatpush.msrb.mxu0 %v8804_v11  ;;  %v8813_v11 = vld [vmem:[#allocation76_spill] sm:$0xff]  ;;  %v650_v22 = vadd.f32 %v627_v25, %v605_v39  ;;  %v8822_v39 = vld [vmem:[#allocation89_spill] sm:$0xff] }
 0x180   :  { %1742 = vmatpush.msra.mxu1 %v8805_v46  ;;  %1710 = vmatpush.msrb.mxu3 %v8806_v21  ;;  %v8814_v46 = vld [vmem:[#allocation92_spill] sm:$0xff]  ;;  %v8815_v21 = vld [vmem:[#allocation79_spill] sm:$0xff]  ;;  %v651_v17 = vadd.f32 %v647_v35, %v606_v40  ;;  %v692_v28 = vpop.f32.mrf.mxu3 }
 0x181   :  { %1730 = vmatpush.msrb.mxu2 %v8807_v51  ;;  %1670 = vmatpush.msrb.mxu0 %v8808_v45  ;;  %v8816_v45 = vld [vmem:[#allocation80_spill] sm:$0xff]  ;;  %v8823_v40 = vld [vmem:[#allocation91_spill] sm:$0xff] }
 0x182   :  { %1743 = vmatpush.msra.mxu1 %v8810_v34  ;;  %1711 = vmatpush.msrb.mxu3 %v8811_v15  ;;  %v672_v15 = vpop.f32.mrf.mxu2  ;;  %v8817_v34 = vld [vmem:[#allocation83_spill] sm:$0xff]  ;;  %v696_v35 = vadd.f32 %v692_v28, %v651_v17  ;;  %v8826_v28 = vld [vmem:[#allocation106_spill] sm:$0xff] }
 0x183   :  { %1731 = vmatpush.msrb.mxu2 %v8812_v12  ;;  %1671 = vmatpush.msrb.mxu0 %v8813_v11  ;;  %v8818_v11 = vld [vmem:[#allocation99_spill] sm:$0xff]  ;;  %v695_v25 = vadd.f32 %v672_v15, %v650_v22  ;;  %v8827_v22 = vld [vmem:[#allocation96_spill] sm:$0xff]  ;;  %v8828_v17 = vld [vmem:[#allocation98_spill] sm:$0xff] }
 0x184   :  { %1744 = vmatpush.msra.mxu1 %v8814_v46  ;;  %1712 = vmatpush.msrb.mxu3 %v5503_v41  ;;  %v8819_v46 = vld [vmem:[#allocation85_spill] sm:$0xff]  ;;  %v5859_v15 = vmax.f32 %v696_v35, 0.0  ;;  %v5879_v35 = vld [vmem:[%s8614_s3 + $0x1b0] sm:$0xff] }
 0x185   :  { %1732 = vmatpush.msrb.mxu2 %v8815_v21  ;;  %1672 = vmatpush.msrb.mxu0 %v8816_v45  ;;  %v8820_v41 = vld [vmem:[#allocation101_spill] sm:$0xff]  ;;  %v8821_v21 = vld [vmem:[#allocation87_spill] sm:$0xff]  ;;  %8830 = vst [vmem:[#allocation4_spill] sm:$0xff] %v5879_v35 }
 0x186   :  { %1745 = vmatpush.msra.mxu1 %v5516_v19  ;;  %1713 = vmatpush.msrb.mxu3 %v5528_v42  ;;  %v8824_v42 = vld [vmem:[#allocation93_spill] sm:$0xff] }
 0x187   :  { %1733 = vmatpush.msrb.mxu2 %v8817_v34  ;;  %1673 = vmatmul.f32.vlgmr.msrb.gmra.mxu0 %v5628_v1 }
 0x188   :  { %1746 = vmatpush.msra.mxu1 %v8818_v11  ;;  %1766 = vmatpush.msra.mxu0 %v8819_v46  ;;  %v8825_v11 = vld [vmem:[#allocation95_spill] sm:$0xff] }
 0x189   :  { %1714 = vmatpush.msrb.mxu3 %v8820_v41  ;;  %1734 = vmatpush.msrb.mxu2 %v8821_v21  ;;  %v5857_v41 = vmax.f32 %v695_v25, 0.0  ;;  %v5873_v25 = vld [vmem:[%s8614_s3 + $0xf0] sm:$0xff] }
 0x18a   :  { %1747 = vmatpush.msra.mxu1 %v5561_v13  ;;  %1767 = vmatpush.msra.mxu0 %v8822_v39 }
 0x18b   :  { %1715 = vmatpush.msrb.mxu3 %v5576_v57  ;;  %1735 = vmatpush.msrb.mxu2 %v8823_v40 }
 0x18c   :  { %1748 = vmatpush.msra.mxu1 %v5581_v16  ;;  %1768 = vmatpush.msra.mxu0 %v8824_v42  ;;  %v5907_v16 = vld [vmem:[%s8614_s3 + $0x190] sm:$0xff] }
 0x18d   :  { %1716 = vmatpush.msrb.mxu3 %v5595_v55  ;;  %1736 = vmatpush.msrb.mxu2 %v8825_v11  ;;  %v8829_v55 = vld [vmem:[#allocation100_spill] sm:$0xff]  ;;  %8834 = vst [vmem:[#allocation14_spill] sm:$0xff] %v5907_v16 }
 0x18e   :  { %1749 = vmatpush.msra.mxu1 %v8826_v28  ;;  %1769 = vmatpush.msra.mxu0 %v8827_v22  ;;  %v5893_v28 = vld [vmem:[%s8614_s3 + $0x1a0] sm:$0xff] }
 0x18f   :  { %1717 = vmatpush.msrb.mxu3 %v5614_v63  ;;  %1737 = vmatpush.msrb.mxu2 %v8828_v17  ;;  %v8831_v63 = vld [vmem:[#allocation102_spill] sm:$0xff]  ;;  %8832 = vst [vmem:[#allocation13_spill] sm:$0xff] %v5893_v28 }
 0x190   :  { %1718 = vmatmul.f32.vlgmr.msrb.gmra.mxu3 %v5857_v41  ;;  %3561 = vmatmul.msk.f32.vlgmr.msrb.gmra.mxu2 %vm1158_vm1, %v5859_v15 }
 0x191   :  { %1750 = vmatpush.msra.mxu1 %v5619_v52  ;;  %1770 = vmatpush.msra.mxu0 %v8829_v55  ;;  %v5887_v52 = vld [vmem:[%s8614_s3 + $0xe0] sm:$0xff] }
 0x192   :  { %1786 = vmatpush.msra.mxu2 %v5873_v25  ;;  %1810 = vmatpush.msra.mxu3 %v5879_v35  ;;  %v8833_v35 = vld [vmem:[#allocation104_spill] sm:$0xff] }
 0x193   :  { %1751 = vmatpush.msra.mxu1 %v5637_v48  ;;  %1771 = vmatpush.msra.mxu0 %v8831_v63  ;;  %v5901_v48 = vld [vmem:[%s8614_s3 + $0xd0] sm:$0xff] }
 0x194   :  { %1787 = vmatpush.msra.mxu2 %v5887_v52  ;;  %1811 = vmatpush.msra.mxu3 %v5893_v28  ;;  %v5921_v28 = vld [vmem:[%s8614_s3 + $0x180] sm:$0xff] }
 0x195   :  { %1752 = vmatpush.msra.mxu1 %v5651_v3  ;;  %1772 = vmatpush.msra.mxu0 %v8833_v35  ;;  %v5915_v3 = vld [vmem:[%s8614_s3 + $0xc0] sm:$0xff]  ;;  %8835 = vst [vmem:[#allocation5_spill] sm:$0xff] %v5921_v28 }
 0x196   :  { %1788 = vmatpush.msra.mxu2 %v5901_v48  ;;  %1812 = vmatpush.msra.mxu3 %v5907_v16  ;;  %v5935_v16 = vld [vmem:[%s8614_s3 + $0x170] sm:$0xff] }
 0x197   :  { %1753 = vmatpush.msra.mxu1 %v5665_v62  ;;  %1773 = vmatpush.msra.mxu0 %v5607_v32  ;;  %v5929_v62 = vld [vmem:[%s8614_s3 + $0xb0] sm:$0xff]  ;;  %8836 = vst [vmem:[#allocation6_spill] sm:$0xff] %v5935_v16 }
 0x198   :  { %1789 = vmatpush.msra.mxu2 %v5915_v3  ;;  %1813 = vmatpush.msra.mxu3 %v5921_v28  ;;  %v5949_v28 = vld [vmem:[%s8614_s3 + $0x160] sm:$0xff] }
 0x199   :  { %1754 = vmatpush.msra.mxu1 %v5679_v0  ;;  %1774 = vmatpush.msra.mxu0 %v5626_v31  ;;  %v5943_v0 = vld [vmem:[%s8614_s3 + $0xa0] sm:$0xff]  ;;  %8837 = vst [vmem:[#allocation17_spill] sm:$0xff] %v5949_v28 }
 0x19a   :  { %1790 = vmatpush.msra.mxu2 %v5929_v62  ;;  %1814 = vmatpush.msra.mxu3 %v5935_v16  ;;  %v5963_v16 = vld [vmem:[%s8614_s3 + $0x150] sm:$0xff] }
 0x19b   :  { %1755 = vmatpush.msra.mxu1 %v5688_v10  ;;  %1775 = vmatpush.msra.mxu0 %v5642_v60  ;;  %v5957_v10 = vld [vmem:[%s8614_s3 + $0x90] sm:$0xff]  ;;  %8838 = vst [vmem:[#allocation18_spill] sm:$0xff] %v5963_v16 }
 0x19c   :  { %1791 = vmatpush.msra.mxu2 %v5943_v0  ;;  %1815 = vmatpush.msra.mxu3 %v5949_v28  ;;  %v5977_v28 = vld [vmem:[%s8614_s3 + $0x140] sm:$0xff] }
 0x19d   :  { %1756 = vmatpush.msra.mxu1 %v5698_v2  ;;  %1776 = vmatpush.msra.mxu0 %v5656_v61  ;;  %v5971_v2 = vld [vmem:[%s8614_s3 + $0x80] sm:$0xff]  ;;  %8840 = vst [vmem:[#allocation8_spill] sm:$0xff] %v5977_v28 }
 0x19e   :  { %1792 = vmatpush.msra.mxu2 %v5957_v10  ;;  %1816 = vmatpush.msra.mxu3 %v5963_v16  ;;  %8839 = vst [vmem:[#allocation7_spill] sm:$0xff] %v5971_v2  ;;  %v5992_v16 = vld [vmem:[%s8614_s3 + $0x1b8] sm:$0xff] }
 0x19f   :  { %1757 = vmatpush.msra.mxu1 %v5707_v4  ;;  %1777 = vmatpush.msra.mxu0 %v5670_v6  ;;  %v5986_v4 = vld [vmem:[%s8614_s3 + $0xf8] sm:$0xff]  ;;  %8842 = vst [vmem:[#allocation22_spill] sm:$0xff] %v5992_v16 }
 0x1a0   :  { %1793 = vmatpush.msra.mxu2 %v5971_v2  ;;  %1817 = vmatpush.msra.mxu3 %v5977_v28  ;;  %8841 = vst [vmem:[#allocation21_spill] sm:$0xff] %v5986_v4  ;;  %v5998_v28 = vld [vmem:[%s8614_s3 + $0x70] sm:$0xff] }
 0x1a1   :  { %1758 = vmatmul.f32.vlgmr.msra.gmra.mxu1 %v5857_v41  ;;  %3562 = vmatmul.msk.f32.vlgmr.msra.gmra.mxu0 %vm1158_vm1, %v5859_v15  ;;  %8843 = vst [vmem:[#allocation9_spill] sm:$0xff] %v5998_v28  ;;  %v6004_v2 = vld [vmem:[%s8614_s3 + $0x130] sm:$0xff] }
 0x1a2   :  { %1826 = vmatpush.msrb.mxu0 %v5986_v4  ;;  %1850 = vmatpush.msrb.mxu1 %v5992_v16  ;;  %8844 = vst [vmem:[#allocation10_spill] sm:$0xff] %v6004_v2  ;;  %v6010_v4 = vld [vmem:[%s8614_s3 + $0xe8] sm:$0xff] }
 0x1a3   :  { %1794 = vmatpush.msra.mxu2 %v5998_v28  ;;  %1818 = vmatpush.msra.mxu3 %v6004_v2  ;;  %8845 = vst [vmem:[#allocation25_spill] sm:$0xff] %v6010_v4  ;;  %v6016_v16 = vld [vmem:[%s8614_s3 + $0x1a8] sm:$0xff]  ;;  %v6022_v28 = vld [vmem:[%s8614_s3 + $0x60] sm:$0xff] }
 0x1a4   :  { %1827 = vmatpush.msrb.mxu0 %v6010_v4  ;;  %8846 = vst [vmem:[#allocation26_spill] sm:$0xff] %v6016_v16  ;;  %1851 = vmatpush.msrb.mxu1 %v6016_v16  ;;  %v6028_v2 = vld [vmem:[%s8614_s3 + $0x120] sm:$0xff]  ;;  %v6034_v4 = vld [vmem:[%s8614_s3 + $0xd8] sm:$0xff] }
 0x1a5   :  { %8847 = vst [vmem:[#allocation11_spill] sm:$0xff] %v6022_v28  ;;  %1795 = vmatpush.msra.mxu2 %v6022_v28  ;;  %1819 = vmatpush.msra.mxu3 %v6028_v2  ;;  %v6040_v16 = vld [vmem:[%s8614_s3 + $0x198] sm:$0xff]  ;;  %v6046_v28 = vld [vmem:[%s8614_s3 + $0x50] sm:$0xff] }
 0x1a6   :  { %8848 = vst [vmem:[#allocation12_spill] sm:$0xff] %v6028_v2  ;;  %1828 = vmatpush.msrb.mxu0 %v6034_v4  ;;  %1852 = vmatpush.msrb.mxu1 %v6040_v16  ;;  %v6052_v2 = vld [vmem:[%s8614_s3 + $0x110] sm:$0xff] }
 0x1a7   :  { %8849 = vst [vmem:[#allocation29_spill] sm:$0xff] %v6034_v4  ;;  %1796 = vmatpush.msra.mxu2 %v6046_v28  ;;  %1820 = vmatpush.msra.mxu3 %v6052_v2  ;;  %v6058_v4 = vld [vmem:[%s8614_s3 + $0xc8] sm:$0xff] }
 0x1a8   :  { %8850 = vst [vmem:[#allocation30_spill] sm:$0xff] %v6040_v16  ;;  %1829 = vmatpush.msrb.mxu0 %v6058_v4  ;;  %v6064_v16 = vld [vmem:[%s8614_s3 + $0x188] sm:$0xff] }
 0x1a9   :  { %8851 = vst [vmem:[#allocation15_spill] sm:$0xff] %v6046_v28  ;;  %1853 = vmatpush.msrb.mxu1 %v6064_v16  ;;  %v6070_v28 = vld [vmem:[%s8614_s3 + $0x40] sm:$0xff] }
 0x1aa   :  { %8852 = vst [vmem:[#allocation16_spill] sm:$0xff] %v6052_v2  ;;  %1797 = vmatpush.msra.mxu2 %v6070_v28  ;;  %v6076_v2 = vld [vmem:[%s8614_s3 + $0x100] sm:$0xff] }
 0x1ab   :  { %8853 = vst [vmem:[#allocation33_spill] sm:$0xff] %v6058_v4  ;;  %1821 = vmatpush.msra.mxu3 %v6076_v2  ;;  %v6102_v4 = vld [vmem:[%s8614_s3 + $0x30] sm:$0xff] }
 0x1ac   :  { %8854 = vst [vmem:[#allocation34_spill] sm:$0xff] %v6064_v16  ;;  %3563 = vmatmul.msk.f32.vlgmr.msra.gmra.mxu3 %vm1158_vm1, %v5542_v9  ;;  %v6084_v16 = vld [vmem:[%s8614_s3 + $0xb8] sm:$0xff]  ;;  %1798 = vmatpush.msra.mxu2 %v6102_v4 }
 0x1ad   :  { %8855 = vst [vmem:[#allocation19_spill] sm:$0xff] %v6070_v28  ;;  %1830 = vmatpush.msrb.mxu0 %v6084_v16  ;;  %v6090_v28 = vld [vmem:[%s8614_s3 + $0x178] sm:$0xff] }
 0x1ae   :  { %8856 = vst [vmem:[#allocation20_spill] sm:$0xff] %v6076_v2  ;;  %1854 = vmatpush.msrb.mxu1 %v6090_v28  ;;  %v6096_v2 = vld [vmem:[%s8614_s3 + $0x2b0] sm:$0xff] }
 0x1af   :  { %8857 = vst [vmem:[#allocation23_spill] sm:$0xff] %v6084_v16  ;;  %1868 = vmatpush.msrb.mxu3 %v6096_v2  ;;  %v6108_v16 = vld [vmem:[%s8614_s3 + $0xa8] sm:$0xff] }
 0x1b0   :  { %8858 = vst [vmem:[#allocation24_spill] sm:$0xff] %v6090_v28  ;;  %1831 = vmatpush.msrb.mxu0 %v6108_v16  ;;  %v6114_v28 = vld [vmem:[%s8614_s3 + $0x168] sm:$0xff] }
 0x1b1   :  { %8859 = vst [vmem:[#allocation39_spill] sm:$0xff] %v6096_v2  ;;  %1855 = vmatpush.msrb.mxu1 %v6114_v28  ;;  %v6120_v2 = vld [vmem:[%s8614_s3 + $0x2a0] sm:$0xff] }
 0x1b2   :  { %8860 = vst [vmem:[#allocation27_spill] sm:$0xff] %v6102_v4  ;;  %1869 = vmatpush.msrb.mxu3 %v6120_v2  ;;  %v6126_v4 = vld [vmem:[%s8614_s3 + $0x20] sm:$0xff] }
 0x1b3   :  { %8861 = vst [vmem:[#allocation41_spill] sm:$0xff] %v6108_v16  ;;  %1799 = vmatpush.msra.mxu2 %v6126_v4  ;;  %v6132_v16 = vld [vmem:[%s8614_s3 + $0x98] sm:$0xff] }
 0x1b4   :  { %8862 = vst [vmem:[#allocation28_spill] sm:$0xff] %v6114_v28  ;;  %1832 = vmatpush.msrb.mxu0 %v6132_v16  ;;  %v6138_v28 = vld [vmem:[%s8614_s3 + $0x158] sm:$0xff] }
 0x1b5   :  { %8863 = vst [vmem:[#allocation43_spill] sm:$0xff] %v6120_v2  ;;  %1856 = vmatpush.msrb.mxu1 %v6138_v28  ;;  %v6144_v2 = vld [vmem:[%s8614_s3 + $0x290] sm:$0xff] }
 0x1b6   :  { %8864 = vst [vmem:[#allocation31_spill] sm:$0xff] %v6126_v4  ;;  %1870 = vmatpush.msrb.mxu3 %v6144_v2  ;;  %v6150_v4 = vld [vmem:[%s8614_s3 + $0x10] sm:$0xff] }
 0x1b7   :  { %8865 = vst [vmem:[#allocation32_spill] sm:$0xff] %v6132_v16  ;;  %1800 = vmatpush.msra.mxu2 %v6150_v4  ;;  %v6156_v16 = vld [vmem:[%s8614_s3 + $0x88] sm:$0xff] }
 0x1b8   :  { %8866 = vst [vmem:[#allocation35_spill] sm:$0xff] %v6138_v28  ;;  %1833 = vmatpush.msrb.mxu0 %v6156_v16  ;;  %v6162_v28 = vld [vmem:[%s8614_s3 + $0x148] sm:$0xff] }
 0x1b9   :  { %8867 = vst [vmem:[#allocation36_spill] sm:$0xff] %v6144_v2  ;;  %1857 = vmatpush.msrb.mxu1 %v6162_v28  ;;  %v6168_v2 = vld [vmem:[%s8614_s3 + $0x280] sm:$0xff] }
 0x1ba   :  { %8868 = vst [vmem:[#allocation37_spill] sm:$0xff] %v6150_v4  ;;  %1871 = vmatpush.msrb.mxu3 %v6168_v2  ;;  %v6174_v4 = vld [vmem:[%s8614_s3] sm:$0xff] }
 0x1bb   :  { %8869 = vst [vmem:[#allocation38_spill] sm:$0xff] %v6156_v16  ;;  %1801 = vmatpush.msra.mxu2 %v6174_v4  ;;  %v6180_v16 = vld [vmem:[%s8614_s3 + $0x78] sm:$0xff] }
 0x1bc   :  { %8870 = vst [vmem:[#allocation40_spill] sm:$0xff] %v6162_v28  ;;  %1834 = vmatpush.msrb.mxu0 %v6180_v16  ;;  %1802 = vmatmul.f32.vlgmr.msra.gmra.mxu2 %v5628_v1  ;;  %v6193_v28 = vld [vmem:[%s8614_s3 + $0x270] sm:$0xff] }
 0x1bd   :  { %8871 = vst [vmem:[#allocation42_spill] sm:$0xff] %v6168_v2  ;;  %v6187_v2 = vld [vmem:[%s8614_s3 + $0x138] sm:$0xff]  ;;  %1872 = vmatpush.msrb.mxu3 %v6193_v28 }
 0x1be   :  { %8872 = vst [vmem:[#allocation44_spill] sm:$0xff] %v6174_v4  ;;  %1858 = vmatpush.msrb.mxu1 %v6187_v2  ;;  %v6205_v4 = vld [vmem:[%s8614_s3 + $0x68] sm:$0xff] }
 0x1bf   :  { %8873 = vst [vmem:[#allocation71_spill] sm:$0xff] %v6180_v16  ;;  %v6199_v16 = vld [vmem:[%s8614_s3 + $0x370] sm:$0xff]  ;;  %1835 = vmatpush.msrb.mxu0 %v6205_v4 }
 0x1c0   :  { %8874 = vst [vmem:[#allocation75_spill] sm:$0xff] %v6187_v2  ;;  %1892 = vmatpush.msrb.mxu2 %v6199_v16  ;;  %v6211_v2 = vld [vmem:[%s8614_s3 + $0x128] sm:$0xff] }
 0x1c1   :  { %8875 = vst [vmem:[#allocation80_spill] sm:$0xff] %v6193_v28  ;;  %1859 = vmatpush.msrb.mxu1 %v6211_v2  ;;  %v6217_v28 = vld [vmem:[%s8614_s3 + $0x260] sm:$0xff] }
 0x1c2   :  { %8876 = vst [vmem:[#allocation83_spill] sm:$0xff] %v6199_v16  ;;  %1873 = vmatpush.msrb.mxu3 %v6217_v28  ;;  %v6223_v16 = vld [vmem:[%s8614_s3 + $0x360] sm:$0xff] }
 0x1c3   :  { %8877 = vst [vmem:[#allocation85_spill] sm:$0xff] %v6205_v4  ;;  %1893 = vmatpush.msrb.mxu2 %v6223_v16  ;;  %v6229_v4 = vld [vmem:[%s8614_s3 + $0x58] sm:$0xff] }
 0x1c4   :  { %8878 = vst [vmem:[#allocation87_spill] sm:$0xff] %v6211_v2  ;;  %1836 = vmatpush.msrb.mxu0 %v6229_v4  ;;  %v6235_v2 = vld [vmem:[%s8614_s3 + $0x118] sm:$0xff] }
 0x1c5   :  { %8879 = vst [vmem:[#allocation89_spill] sm:$0xff] %v6217_v28  ;;  %1860 = vmatpush.msrb.mxu1 %v6235_v2  ;;  %v6241_v28 = vld [vmem:[%s8614_s3 + $0x250] sm:$0xff] }
 0x1c6   :  { %8880 = vst [vmem:[#allocation91_spill] sm:$0xff] %v6223_v16  ;;  %1874 = vmatpush.msrb.mxu3 %v6241_v28  ;;  %v6247_v16 = vld [vmem:[%s8614_s3 + $0x350] sm:$0xff] }
 0x1c7   :  { %8881 = vst [vmem:[#allocation93_spill] sm:$0xff] %v6229_v4  ;;  %1894 = vmatpush.msrb.mxu2 %v6247_v16  ;;  %v6253_v4 = vld [vmem:[%s8614_s3 + $0x48] sm:$0xff] }
 0x1c8   :  { %8882 = vst [vmem:[#allocation95_spill] sm:$0xff] %v6235_v2  ;;  %1837 = vmatpush.msrb.mxu0 %v6253_v4  ;;  %v6259_v2 = vld [vmem:[%s8614_s3 + $0x108] sm:$0xff] }
 0x1c9   :  { %8883 = vst [vmem:[#allocation96_spill] sm:$0xff] %v6241_v28  ;;  %1861 = vmatpush.msrb.mxu1 %v6259_v2  ;;  %v6265_v28 = vld [vmem:[%s8614_s3 + $0x240] sm:$0xff] }
 0x1ca   :  { %8884 = vst [vmem:[#allocation98_spill] sm:$0xff] %v6247_v16  ;;  %1875 = vmatpush.msrb.mxu3 %v6265_v28  ;;  %v6271_v16 = vld [vmem:[%s8614_s3 + $0x340] sm:$0xff]  ;;  %3564 = vmatmul.msk.f32.vlgmr.msrb.gmra.mxu1 %vm1158_vm1, %v5542_v9  ;;  %v8889_v9 = vld [vmem:[#allocation45_spill] sm:$0xff] }
 0x1cb   :  { %8885 = vst [vmem:[#allocation100_spill] sm:$0xff] %v6253_v4  ;;  %1895 = vmatpush.msrb.mxu2 %v6271_v16  ;;  %1838 = vmatpush.msrb.mxu0 %v8742_v26  ;;  %v8893_v26 = vld [vmem:[#allocation49_spill] sm:$0xff] }
 0x1cc   :  { %8886 = vst [vmem:[#allocation102_spill] sm:$0xff] %v6259_v2  ;;  %1908 = vmatpush.msra.mxu1 %v8757_v47  ;;  %1876 = vmatpush.msrb.mxu3 %v8758_v49  ;;  %v8900_v47 = vld [vmem:[#allocation56_spill] sm:$0xff]  ;;  %v8901_v49 = vld [vmem:[#allocation57_spill] sm:$0xff] }
 0x1cd   :  { %8887 = vst [vmem:[#allocation104_spill] sm:$0xff] %v6265_v28  ;;  %1896 = vmatpush.msrb.mxu2 %v8745_v30  ;;  %1839 = vmatpush.msrb.mxu0 %v8746_v33  ;;  %v8894_v30 = vld [vmem:[#allocation50_spill] sm:$0xff]  ;;  %v8895_v33 = vld [vmem:[#allocation51_spill] sm:$0xff] }
 0x1ce   :  { %8888 = vst [vmem:[#allocation116_spill] sm:$0xff] %v6271_v16  ;;  %1909 = vmatpush.msra.mxu1 %v8760_v53  ;;  %1877 = vmatpush.msrb.mxu3 %v8762_v58  ;;  %v8903_v53 = vld [vmem:[#allocation59_spill] sm:$0xff]  ;;  %v8905_v58 = vld [vmem:[#allocation61_spill] sm:$0xff] }
 0x1cf   :  { %1897 = vmatpush.msrb.mxu2 %v8749_v36  ;;  %1840 = vmatpush.msrb.mxu0 %v8750_v37  ;;  %v8896_v36 = vld [vmem:[#allocation52_spill] sm:$0xff]  ;;  %v8897_v37 = vld [vmem:[#allocation53_spill] sm:$0xff] }
 0x1d0   :  { %1910 = vmatpush.msra.mxu1 %v8764_v8  ;;  %1878 = vmatpush.msrb.mxu3 %v8766_v24  ;;  %v8907_v8 = vld [vmem:[#allocation63_spill] sm:$0xff]  ;;  %v736_v24 = vpop.f32.mrf.mxu1 }
 0x1d1   :  { %1898 = vmatpush.msrb.mxu2 %v8753_v43  ;;  %1841 = vmatpush.msrb.mxu0 %v8754_v44  ;;  %v8898_v43 = vld [vmem:[#allocation54_spill] sm:$0xff]  ;;  %v8899_v44 = vld [vmem:[#allocation55_spill] sm:$0xff] }
 0x1d2   :  { %1911 = vmatpush.msra.mxu1 %v8768_v5  ;;  %1879 = vmatpush.msrb.mxu3 %v8770_v7  ;;  %v8908_v5 = vld [vmem:[#allocation64_spill] sm:$0xff]  ;;  %v8909_v7 = vld [vmem:[#allocation65_spill] sm:$0xff] }
 0x1d3   :  { %1899 = vmatpush.msrb.mxu2 %v5136_v38  ;;  %1842 = vmatmul.f32.vlgmr.msrb.gmra.mxu0 %v5628_v1  ;;  %v8890_v38 = vld [vmem:[#allocation46_spill] sm:$0xff]  ;;  %v8891_v1 = vld [vmem:[#allocation47_spill] sm:$0xff] }
 0x1d4   :  { %1912 = vmatpush.msra.mxu1 %v8772_v14  ;;  %1932 = vmatpush.msra.mxu0 %v5148_v56  ;;  %v8892_v56 = vld [vmem:[#allocation48_spill] sm:$0xff]  ;;  %v8910_v14 = vld [vmem:[#allocation66_spill] sm:$0xff] }
 0x1d5   :  { %1880 = vmatpush.msrb.mxu3 %v8775_v18  ;;  %1900 = vmatpush.msrb.mxu2 %v8759_v50  ;;  %v8902_v50 = vld [vmem:[#allocation58_spill] sm:$0xff]  ;;  %v8911_v18 = vld [vmem:[#allocation67_spill] sm:$0xff] }
 0x1d6   :  { %1913 = vmatpush.msra.mxu1 %v8776_v20  ;;  %1933 = vmatpush.msra.mxu0 %v8761_v54  ;;  %v8904_v54 = vld [vmem:[#allocation60_spill] sm:$0xff] }
 0x1d7   :  { %1881 = vmatpush.msrb.mxu3 %v8779_v23  ;;  %1901 = vmatpush.msrb.mxu2 %v8763_v59  ;;  %v8906_v59 = vld [vmem:[#allocation62_spill] sm:$0xff]  ;;  %v8912_v20 = vld [vmem:[#allocation68_spill] sm:$0xff]  ;;  %v8913_v23 = vld [vmem:[#allocation69_spill] sm:$0xff] }
 0x1d8   :  { %1914 = vmatpush.msra.mxu1 %v8780_v27  ;;  %1934 = vmatpush.msra.mxu0 %v8889_v9  ;;  %v8914_v27 = vld [vmem:[#allocation70_spill] sm:$0xff]  ;;  %v8915_v9 = vld [vmem:[#allocation72_spill] sm:$0xff] }
 0x1d9   :  { %1882 = vmatpush.msrb.mxu3 %v8890_v38  ;;  %1902 = vmatpush.msrb.mxu2 %v8891_v1  ;;  %v8916_v38 = vld [vmem:[#allocation73_spill] sm:$0xff]  ;;  %v740_v1 = vadd.f32 %v736_v24, %v8809_v29 }
 0x1da   :  { %1915 = vmatpush.msra.mxu1 %v8892_v56  ;;  %1935 = vmatpush.msra.mxu0 %v8893_v26  ;;  %v8917_v56 = vld [vmem:[#allocation74_spill] sm:$0xff]  ;;  %v781_v26 = vpop.f32.mrf.mxu3  ;;  %v8931_v24 = vld [vmem:[#allocation97_spill] sm:$0xff] }
 0x1db   :  { %1883 = vmatpush.msrb.mxu3 %v8894_v30  ;;  %1903 = vmatpush.msrb.mxu2 %v8895_v33  ;;  %v8918_v30 = vld [vmem:[#allocation76_spill] sm:$0xff]  ;;  %v8919_v33 = vld [vmem:[#allocation77_spill] sm:$0xff] }
 0x1dc   :  { %1884 = vmatmul.f32.vlgmr.msrb.gmra.mxu3 %v5857_v41  ;;  %3565 = vmatmul.msk.f32.vlgmr.msrb.gmra.mxu2 %vm1158_vm1, %v5859_v15 }
 0x1dd   :  { %1916 = vmatpush.msra.mxu1 %v8896_v36  ;;  %1936 = vmatpush.msra.mxu0 %v8897_v37  ;;  %v8920_v36 = vld [vmem:[#allocation78_spill] sm:$0xff]  ;;  %v8921_v37 = vld [vmem:[#allocation79_spill] sm:$0xff] }
 0x1de   :  { %1953 = vmatpush.msra.mxu2 %v8898_v43  ;;  %1977 = vmatpush.msra.mxu3 %v8899_v44  ;;  %v716_v43 = vpop.f32.mrf.mxu0  ;;  %v785_v44 = vadd.f32 %v781_v26, %v740_v1  ;;  %v8954_v1 = vld [vmem:[#allocation17_spill] sm:$0xff] }
 0x1df   :  { %1917 = vmatpush.msra.mxu1 %v8900_v47  ;;  %1937 = vmatpush.msra.mxu0 %v8901_v49  ;;  %v8923_v47 = vld [vmem:[#allocation82_spill] sm:$0xff]  ;;  %v8924_v49 = vld [vmem:[#allocation84_spill] sm:$0xff]  ;;  %v8956_v26 = vld [vmem:[#allocation29_spill] sm:$0xff] }
 0x1e0   :  { %1954 = vmatpush.msra.mxu2 %v8902_v50  ;;  %1978 = vmatpush.msra.mxu3 %v8903_v53  ;;  %v8925_v50 = vld [vmem:[#allocation86_spill] sm:$0xff]  ;;  %v8926_v53 = vld [vmem:[#allocation88_spill] sm:$0xff] }
 0x1e1   :  { %1918 = vmatpush.msra.mxu1 %v8904_v54  ;;  %1938 = vmatpush.msra.mxu0 %v8905_v58  ;;  %v8928_v58 = vld [vmem:[#allocation90_spill] sm:$0xff] }
 0x1e2   :  { %1955 = vmatpush.msra.mxu2 %v8906_v59  ;;  %1979 = vmatpush.msra.mxu3 %v8907_v8  ;;  %v761_v59 = vpop.f32.mrf.mxu2  ;;  %v8929_v8 = vld [vmem:[#allocation92_spill] sm:$0xff] }
 0x1e3   :  { %1919 = vmatpush.msra.mxu1 %v8908_v5  ;;  %1939 = vmatpush.msra.mxu0 %v8909_v7  ;;  %v8942_v7 = vld [vmem:[#allocation110_spill] sm:$0xff] }
 0x1e4   :  { %1956 = vmatpush.msra.mxu2 %v8910_v14  ;;  %1980 = vmatpush.msra.mxu3 %v8911_v18  ;;  %v8943_v14 = vld [vmem:[#allocation14_spill] sm:$0xff]  ;;  %v8945_v18 = vld [vmem:[#allocation7_spill] sm:$0xff] }
 0x1e5   :  { %1920 = vmatpush.msra.mxu1 %v8912_v20  ;;  %1940 = vmatpush.msra.mxu0 %v8913_v23  ;;  %v8946_v20 = vld [vmem:[#allocation5_spill] sm:$0xff] }
 0x1e6   :  { %1957 = vmatpush.msra.mxu2 %v8914_v27  ;;  %1981 = vmatpush.msra.mxu3 %v8807_v51  ;;  %v8922_v51 = vld [vmem:[#allocation81_spill] sm:$0xff]  ;;  %v8950_v27 = vld [vmem:[#allocation6_spill] sm:$0xff] }
 0x1e7   :  { %1921 = vmatpush.msra.mxu1 %v8915_v9  ;;  %1941 = vmatpush.msra.mxu0 %v8916_v38  ;;  %v8948_v23 = vld [vmem:[#allocation21_spill] sm:$0xff] }
 0x1e8   :  { %1958 = vmatpush.msra.mxu2 %v8917_v56  ;;  %1982 = vmatpush.msra.mxu3 %v8812_v12  ;;  %v826_v12 = vpop.f32.mrf.mxu1  ;;  %v8951_v9 = vld [vmem:[#allocation113_spill] sm:$0xff]  ;;  %v8955_v56 = vld [vmem:[#allocation114_spill] sm:$0xff] }
 0x1e9   :  { %1922 = vmatpush.msra.mxu1 %v8918_v30  ;;  %1942 = vmatpush.msra.mxu0 %v8919_v33  ;;  %v8952_v38 = vld [vmem:[#allocation25_spill] sm:$0xff]  ;;  %v8957_v30 = vld [vmem:[#allocation15_spill] sm:$0xff]  ;;  %v8958_v33 = vld [vmem:[#allocation18_spill] sm:$0xff] }
 0x1ea   :  { %1959 = vmatpush.msra.mxu2 %v8920_v36  ;;  %1983 = vmatpush.msra.mxu3 %v8921_v37  ;;  %v8959_v36 = vld [vmem:[#allocation115_spill] sm:$0xff]  ;;  %v8960_v37 = vld [vmem:[#allocation33_spill] sm:$0xff] }
 0x1eb   :  { %1923 = vmatpush.msra.mxu1 %v8816_v45  ;;  %1943 = vmatpush.msra.mxu0 %v8922_v51  ;;  %v830_v45 = vadd.f32 %v826_v12, %v785_v44  ;;  %v8961_v51 = vld [vmem:[#allocation19_spill] sm:$0xff] }
 0x1ec   :  { %1960 = vmatpush.msra.mxu2 %v8923_v47  ;;  %1984 = vmatpush.msra.mxu3 %v8817_v34  ;;  %v8927_v34 = vld [vmem:[#allocation3_spill] sm:$0xff]  ;;  %v8964_v47 = vld [vmem:[#allocation22_spill] sm:$0xff] }
 0x1ed   :  { %1924 = vmatmul.f32.vlgmr.msra.gmra.mxu1 %v5857_v41  ;;  %3566 = vmatmul.msk.f32.vlgmr.msra.gmra.mxu0 %vm1158_vm1, %v5859_v15  ;;  %v739_v54 = vadd.f32 %v716_v43, %v8927_v34  ;;  %v8962_v43 = vld [vmem:[#allocation8_spill] sm:$0xff]  ;;  %v8963_v44 = vld [vmem:[#allocation23_spill] sm:$0xff] }
 0x1ee   :  { %1993 = vmatpush.msrb.mxu0 %v8924_v49  ;;  %2017 = vmatpush.msrb.mxu1 %v8819_v46  ;;  %v8930_v46 = vld [vmem:[#allocation94_spill] sm:$0xff]  ;;  %v8965_v12 = vld [vmem:[#allocation27_spill] sm:$0xff] }
 0x1ef   :  { %1961 = vmatpush.msra.mxu2 %v8925_v50  ;;  %1985 = vmatpush.msra.mxu3 %v8821_v21  ;;  %v6361_v21 = vmax.f32 %v830_v45, 0.0  ;;  %v8966_v49 = vld [vmem:[#allocation10_spill] sm:$0xff]  ;;  %v8967_v50 = vld [vmem:[#allocation41_spill] sm:$0xff] }
 0x1f0   :  { %1994 = vmatpush.msrb.mxu0 %v8926_v53  ;;  %2018 = vmatpush.msrb.mxu1 %v8822_v39  ;;  %v784_v39 = vadd.f32 %v761_v59, %v739_v54  ;;  %v8968_v45 = vld [vmem:[#allocation26_spill] sm:$0xff]  ;;  %v8969_v53 = vld [vmem:[#allocation31_spill] sm:$0xff]  ;;  %v8970_v54 = vld [vmem:[#allocation12_spill] sm:$0xff] }
 0x1f1   :  { %1962 = vmatpush.msra.mxu2 %v8928_v58  ;;  %1986 = vmatpush.msra.mxu3 %v8823_v40  ;;  %v806_v40 = vpop.f32.mrf.mxu0  ;;  %v8971_v58 = vld [vmem:[#allocation32_spill] sm:$0xff]  ;;  %v8972_v59 = vld [vmem:[#allocation30_spill] sm:$0xff] }
 0x1f2   :  { %1995 = vmatpush.msrb.mxu0 %v8929_v8  ;;  %2019 = vmatpush.msrb.mxu1 %v8824_v42  ;;  %v8932_v42 = vld [vmem:[#allocation99_spill] sm:$0xff]  ;;  %v8973_v8 = vld [vmem:[#allocation37_spill] sm:$0xff] }
 0x1f3   :  { %1963 = vmatpush.msra.mxu2 %v8930_v46  ;;  %1987 = vmatpush.msra.mxu3 %v8825_v11  ;;  %v8933_v11 = vld [vmem:[#allocation101_spill] sm:$0xff]  ;;  %v8974_v46 = vld [vmem:[#allocation16_spill] sm:$0xff] }
 0x1f4   :  { %1996 = vmatpush.msrb.mxu0 %v5516_v19  ;;  %2020 = vmatpush.msrb.mxu1 %v8827_v22  ;;  %v829_v19 = vadd.f32 %v806_v40, %v784_v39  ;;  %v8934_v22 = vld [vmem:[#allocation103_spill] sm:$0xff]  ;;  %v8975_v39 = vld [vmem:[#allocation38_spill] sm:$0xff]  ;;  %v8977_v40 = vld [vmem:[#allocation44_spill] sm:$0xff] }
 0x1f5   :  { %1964 = vmatpush.msra.mxu2 %v8931_v24  ;;  %1988 = vmatpush.msra.mxu3 %v8828_v17  ;;  %v8936_v17 = vld [vmem:[#allocation106_spill] sm:$0xff] }
 0x1f6   :  { %3567 = vmatmul.msk.f32.vlgmr.msra.gmra.mxu3 %vm1158_vm1, %v6361_v21  ;;  %1997 = vmatpush.msrb.mxu0 %v8932_v42  ;;  %v6382_v5 = vmax.f32 %v829_v19, 0.0  ;;  %v8976_v24 = vld [vmem:[#allocation34_spill] sm:$0xff]  ;;  %v8978_v42 = vld [vmem:[#allocation20_spill] sm:$0xff] }
 0x1f7   :  { %2021 = vmatpush.msrb.mxu1 %v8829_v55  ;;  %2037 = vmatpush.msrb.mxu3 %v5873_v25  ;;  %v8935_v55 = vld [vmem:[#allocation105_spill] sm:$0xff]  ;;  %v8980_v19 = vld [vmem:[#allocation24_spill] sm:$0xff] }
 0x1f8   :  { %1965 = vmatpush.msra.mxu2 %v8933_v11  ;;  %1998 = vmatpush.msrb.mxu0 %v5561_v13  ;;  %v8937_v13 = vld [vmem:[#allocation107_spill] sm:$0xff] }
 0x1f9   :  { %2022 = vmatpush.msrb.mxu1 %v8831_v63  ;;  %2038 = vmatpush.msrb.mxu3 %v5887_v52  ;;  %v8938_v63 = vld [vmem:[#allocation108_spill] sm:$0xff]  ;;  %v8979_v11 = vld [vmem:[#allocation71_spill] sm:$0xff] }
 0x1fa   :  { %1966 = vmatpush.msra.mxu2 %v5576_v57  ;;  %1999 = vmatpush.msrb.mxu0 %v8934_v22  ;;  %v8939_v57 = vld [vmem:[#allocation4_spill] sm:$0xff]  ;;  %v8981_v22 = vld [vmem:[#allocation39_spill] sm:$0xff] }
 0x1fb   :  { %2023 = vmatpush.msrb.mxu1 %v8833_v35  ;;  %2039 = vmatpush.msrb.mxu3 %v5901_v48  ;;  %v8940_v35 = vld [vmem:[#allocation109_spill] sm:$0xff] }
 0x1fc   :  { %1967 = vmatpush.msra.mxu2 %v8935_v55  ;;  %2000 = vmatpush.msrb.mxu0 %v8936_v17  ;;  %v8982_v55 = vld [vmem:[#allocation83_spill] sm:$0xff]  ;;  %v8983_v17 = vld [vmem:[#allocation85_spill] sm:$0xff] }
 0x1fd   :  { %2024 = vmatpush.msrb.mxu1 %v5607_v32  ;;  %2040 = vmatpush.msrb.mxu3 %v5915_v3  ;;  %v8941_v32 = vld [vmem:[#allocation13_spill] sm:$0xff] }
 0x1fe   :  { %1968 = vmatpush.msra.mxu2 %v8937_v13  ;;  %2001 = vmatpush.msrb.mxu0 %v8938_v63  ;;  %v8984_v13 = vld [vmem:[#allocation28_spill] sm:$0xff]  ;;  %v8985_v63 = vld [vmem:[#allocation43_spill] sm:$0xff] }
 0x1ff   :  { %1969 = vmatmul.f32.vlgmr.msra.gmra.mxu2 %v6382_v5  ;;  %2025 = vmatpush.msrb.mxu1 %v5626_v31  ;;  %v8944_v31 = vld [vmem:[#allocation111_spill] sm:$0xff] }
 0x200   :  { %2041 = vmatpush.msrb.mxu3 %v5929_v62  ;;  %2061 = vmatpush.msrb.mxu2 %v8939_v57 }
 0x201   :  { %2002 = vmatpush.msrb.mxu0 %v8940_v35  ;;  %2026 = vmatpush.msrb.mxu1 %v5642_v60  ;;  %v8947_v60 = vld [vmem:[#allocation112_spill] sm:$0xff]  ;;  %v8986_v35 = vld [vmem:[#allocation91_spill] sm:$0xff] }
 0x202   :  { %2042 = vmatpush.msrb.mxu3 %v5943_v0  ;;  %2062 = vmatpush.msrb.mxu2 %v8941_v32 }
 0x203   :  { %2003 = vmatpush.msrb.mxu0 %v8942_v7  ;;  %2027 = vmatpush.msrb.mxu1 %v5656_v61  ;;  %v8949_v61 = vld [vmem:[#allocation9_spill] sm:$0xff] }
 0x204   :  { %2043 = vmatpush.msrb.mxu3 %v5957_v10  ;;  %2063 = vmatpush.msrb.mxu2 %v8943_v14  ;;  %v8987_v7 = vld [vmem:[#allocation93_spill] sm:$0xff] }
 0x205   :  { %2004 = vmatpush.msrb.mxu0 %v8944_v31  ;;  %2028 = vmatpush.msrb.mxu1 %v5670_v6  ;;  %v8953_v6 = vld [vmem:[#allocation11_spill] sm:$0xff] }
 0x206   :  { %2044 = vmatpush.msrb.mxu3 %v8945_v18  ;;  %2064 = vmatpush.msrb.mxu2 %v8946_v20  ;;  %v8988_v31 = vld [vmem:[#allocation35_spill] sm:$0xff] }
 0x207   :  { %3568 = vmatmul.msk.f32.vlgmr.msrb.gmra.mxu1 %vm1158_vm1, %v6361_v21  ;;  %2005 = vmatpush.msrb.mxu0 %v8947_v60  ;;  %v8989_v60 = vld [vmem:[#allocation36_spill] sm:$0xff] }
 0x208   :  { %2077 = vmatpush.msra.mxu1 %v8948_v23  ;;  %2045 = vmatpush.msrb.mxu3 %v8949_v61 }
 0x209   :  { %2065 = vmatpush.msrb.mxu2 %v8950_v27  ;;  %2006 = vmatpush.msrb.mxu0 %v8951_v9  ;;  %v8990_v9 = vld [vmem:[#allocation98_spill] sm:$0xff] }
 0x20a   :  { %2078 = vmatpush.msra.mxu1 %v8952_v38  ;;  %2046 = vmatpush.msrb.mxu3 %v8953_v6 }
 0x20b   :  { %2066 = vmatpush.msrb.mxu2 %v8954_v1  ;;  %2007 = vmatpush.msrb.mxu0 %v8955_v56  ;;  %v8991_v56 = vld [vmem:[#allocation40_spill] sm:$0xff] }
 0x20c   :  { %2079 = vmatpush.msra.mxu1 %v8956_v26  ;;  %2047 = vmatpush.msrb.mxu3 %v8957_v30 }
 0x20d   :  { %2067 = vmatpush.msrb.mxu2 %v8958_v33  ;;  %2008 = vmatpush.msrb.mxu0 %v8959_v36  ;;  %v8992_v36 = vld [vmem:[#allocation42_spill] sm:$0xff] }
 0x20e   :  { %2080 = vmatpush.msra.mxu1 %v8960_v37  ;;  %2048 = vmatpush.msrb.mxu3 %v8961_v51 }
 0x20f   :  { %2068 = vmatpush.msrb.mxu2 %v8962_v43  ;;  %2009 = vmatmul.f32.vlgmr.msrb.gmra.mxu0 %v6382_v5 }
 0x210   :  { %2081 = vmatpush.msra.mxu1 %v8963_v44  ;;  %2101 = vmatpush.msra.mxu0 %v8964_v47 }
 0x211   :  { %2049 = vmatpush.msrb.mxu3 %v8965_v12  ;;  %2069 = vmatpush.msrb.mxu2 %v8966_v49 }
 0x212   :  { %2082 = vmatpush.msra.mxu1 %v8967_v50  ;;  %2102 = vmatpush.msra.mxu0 %v8968_v45 }
 0x213   :  { %2050 = vmatpush.msrb.mxu3 %v8969_v53  ;;  %2070 = vmatpush.msrb.mxu2 %v8970_v54 }
 0x214   :  { %2083 = vmatpush.msra.mxu1 %v8971_v58  ;;  %2103 = vmatpush.msra.mxu0 %v8972_v59 }
 0x215   :  { %2051 = vmatpush.msrb.mxu3 %v8973_v8  ;;  %2071 = vmatpush.msrb.mxu2 %v8974_v46 }
 0x216   :  { %2084 = vmatpush.msra.mxu1 %v8975_v39  ;;  %2104 = vmatpush.msra.mxu0 %v8976_v24 }
 0x217   :  { %2052 = vmatpush.msrb.mxu3 %v8977_v40  ;;  %2072 = vmatpush.msrb.mxu2 %v8978_v42 }
 0x218   :  { %2053 = vmatmul.f32.vlgmr.msrb.gmra.mxu3 %v5857_v41  ;;  %3569 = vmatmul.msk.f32.vlgmr.msrb.gmra.mxu2 %vm1158_vm1, %v5859_v15 }
 0x219   :  { %2085 = vmatpush.msra.mxu1 %v8979_v11  ;;  %2105 = vmatpush.msra.mxu0 %v8980_v19 }
 0x21a   :  { %2119 = vmatpush.msra.mxu2 %v8981_v22  ;;  %2143 = vmatpush.msra.mxu3 %v8982_v55  ;;  %v6483_v55 = vld [vmem:[%s8614_s3 + $0x320] sm:$0xff] }
 0x21b   :  { %2086 = vmatpush.msra.mxu1 %v8983_v17  ;;  %2106 = vmatpush.msra.mxu0 %v8984_v13  ;;  %v8995_v17 = vld [vmem:[#allocation80_spill] sm:$0xff]  ;;  %9000 = vst [vmem:[#allocation48_spill] sm:$0xff] %v6483_v55 }
 0x21c   :  { %2120 = vmatpush.msra.mxu2 %v8985_v63  ;;  %2144 = vmatpush.msra.mxu3 %v8986_v35  ;;  %v6461_v35 = vld [vmem:[%s8614_s3 + $0x38] sm:$0xff] }
 0x21d   :  { %2087 = vmatpush.msra.mxu1 %v8987_v7  ;;  %2107 = vmatpush.msra.mxu0 %v8988_v31  ;;  %8993 = vst [vmem:[#allocation45_spill] sm:$0xff] %v6461_v35  ;;  %v8994_v7 = vld [vmem:[#allocation75_spill] sm:$0xff] }
 0x21e   :  { %2121 = vmatpush.msra.mxu2 %v8989_v60  ;;  %2145 = vmatpush.msra.mxu3 %v8990_v9  ;;  %v8998_v9 = vld [vmem:[#allocation87_spill] sm:$0xff] }
 0x21f   :  { %2088 = vmatpush.msra.mxu1 %v6253_v4  ;;  %2108 = vmatpush.msra.mxu0 %v8991_v56  ;;  %v6469_v4 = vld [vmem:[%s8614_s3 + $0x330] sm:$0xff] }
 0x220   :  { %2122 = vmatpush.msra.mxu2 %v8992_v36  ;;  %2146 = vmatpush.msra.mxu3 %v6271_v16  ;;  %8996 = vst [vmem:[#allocation46_spill] sm:$0xff] %v6469_v4  ;;  %v6475_v16 = vld [vmem:[%s8614_s3 + $0x28] sm:$0xff] }
 0x221   :  { %2089 = vmatpush.msra.mxu1 %v6461_v35  ;;  %2109 = vmatpush.msra.mxu0 %v8994_v7  ;;  %8997 = vst [vmem:[#allocation47_spill] sm:$0xff] %v6475_v16  ;;  %v8999_v35 = vld [vmem:[#allocation89_spill] sm:$0xff] }
 0x222   :  { %2123 = vmatpush.msra.mxu2 %v8995_v17  ;;  %2147 = vmatpush.msra.mxu3 %v6469_v4  ;;  %v6489_v4 = vld [vmem:[%s8614_s3 + $0x18] sm:$0xff]  ;;  %v9002_v17 = vld [vmem:[#allocation95_spill] sm:$0xff] }
 0x223   :  { %2090 = vmatpush.msra.mxu1 %v6475_v16  ;;  %2110 = vmatpush.msra.mxu0 %v8998_v9  ;;  %9001 = vst [vmem:[#allocation49_spill] sm:$0xff] %v6489_v4  ;;  %v9003_v16 = vld [vmem:[#allocation96_spill] sm:$0xff] }
 0x224   :  { %2124 = vmatpush.msra.mxu2 %v8999_v35  ;;  %2148 = vmatpush.msra.mxu3 %v6483_v55  ;;  %v6497_v35 = vld [vmem:[%s8614_s3 + $0x310] sm:$0xff]  ;;  %v6503_v55 = vld [vmem:[%s8614_s3 + $0x8] sm:$0xff] }
 0x225   :  { %2091 = vmatpush.msra.mxu1 %v6489_v4  ;;  %2111 = vmatpush.msra.mxu0 %v9002_v17  ;;  %9004 = vst [vmem:[#allocation50_spill] sm:$0xff] %v6497_v35  ;;  %v6511_v4 = vld [vmem:[%s8614_s3 + $0x300] sm:$0xff] }
 0x226   :  { %2125 = vmatpush.msra.mxu2 %v9003_v16  ;;  %2149 = vmatpush.msra.mxu3 %v6497_v35  ;;  %9005 = vst [vmem:[#allocation51_spill] sm:$0xff] %v6503_v55  ;;  %v6526_v35 = vld [vmem:[%s8614_s3 + $0x378] sm:$0xff]  ;;  %v895_v16 = vpop.f32.mrf.mxu0 }
 0x227   :  { %2092 = vmatpush.msra.mxu1 %v6503_v55  ;;  %2112 = vmatpush.msra.mxu0 %v6259_v2  ;;  %9006 = vst [vmem:[#allocation52_spill] sm:$0xff] %v6511_v4  ;;  %v6520_v55 = vld [vmem:[%s8614_s3 + $0x2b8] sm:$0xff] }
 0x228   :  { %2126 = vmatpush.msra.mxu2 %v6265_v28  ;;  %2150 = vmatpush.msra.mxu3 %v6511_v4  ;;  %9007 = vst [vmem:[#allocation53_spill] sm:$0xff] %v6520_v55  ;;  %v6544_v4 = vld [vmem:[%s8614_s3 + $0x2a8] sm:$0xff]  ;;  %v6805_v28 = vld [vmem:[%s8614_s3 + $0x500] sm:$0xff] }
 0x229   :  { %2093 = vmatmul.f32.vlgmr.msra.gmra.mxu1 %v5857_v41  ;;  %3570 = vmatmul.msk.f32.vlgmr.msra.gmra.mxu0 %vm1158_vm1, %v5859_v15  ;;  %9008 = vst [vmem:[#allocation54_spill] sm:$0xff] %v6526_v35  ;;  %v6532_v41 = vld [vmem:[%s8614_s3 + $0x230] sm:$0xff] }
 0x22a   :  { %2159 = vmatpush.msrb.mxu0 %v6520_v55  ;;  %2183 = vmatpush.msrb.mxu1 %v6526_v35  ;;  %9009 = vst [vmem:[#allocation55_spill] sm:$0xff] %v6532_v41  ;;  %v6538_v15 = vld [vmem:[%s8614_s3 + $0x2f0] sm:$0xff]  ;;  %v6550_v35 = vld [vmem:[%s8614_s3 + $0x368] sm:$0xff]  ;;  %v870_v55 = vpop.f32.mrf.mxu3 }
 0x22b   :  { %2127 = vmatpush.msra.mxu2 %v6532_v41  ;;  %9010 = vst [vmem:[#allocation56_spill] sm:$0xff] %v6538_v15  ;;  %2151 = vmatpush.msra.mxu3 %v6538_v15  ;;  %v6556_v41 = vld [vmem:[%s8614_s3 + $0x220] sm:$0xff]  ;;  %v874_v2 = vadd.f32 %v870_v55, %v8809_v29  ;;  %v6863_v55 = vld [vmem:[%s8614_s3 + $0x1d8] sm:$0xff] }
 0x22c   :  { %9011 = vst [vmem:[#allocation57_spill] sm:$0xff] %v6544_v4  ;;  %2160 = vmatpush.msrb.mxu0 %v6544_v4  ;;  %2184 = vmatpush.msrb.mxu1 %v6550_v35  ;;  %v6562_v15 = vld [vmem:[%s8614_s3 + $0x2e0] sm:$0xff]  ;;  %v6568_v4 = vld [vmem:[%s8614_s3 + $0x298] sm:$0xff] }
 0x22d   :  { %9012 = vst [vmem:[#allocation58_spill] sm:$0xff] %v6550_v35  ;;  %2128 = vmatpush.msra.mxu2 %v6556_v41  ;;  %2152 = vmatpush.msra.mxu3 %v6562_v15  ;;  %v6574_v35 = vld [vmem:[%s8614_s3 + $0x358] sm:$0xff] }
 0x22e   :  { %9013 = vst [vmem:[#allocation59_spill] sm:$0xff] %v6556_v41  ;;  %2161 = vmatpush.msrb.mxu0 %v6568_v4  ;;  %2185 = vmatpush.msrb.mxu1 %v6574_v35  ;;  %v6580_v41 = vld [vmem:[%s8614_s3 + $0x210] sm:$0xff] }
 0x22f   :  { %9014 = vst [vmem:[#allocation60_spill] sm:$0xff] %v6562_v15  ;;  %2129 = vmatpush.msra.mxu2 %v6580_v41  ;;  %v6586_v15 = vld [vmem:[%s8614_s3 + $0x2d0] sm:$0xff] }
 0x230   :  { %9015 = vst [vmem:[#allocation61_spill] sm:$0xff] %v6568_v4  ;;  %2153 = vmatpush.msra.mxu3 %v6586_v15  ;;  %v6592_v4 = vld [vmem:[%s8614_s3 + $0x288] sm:$0xff] }
 0x231   :  { %9016 = vst [vmem:[#allocation62_spill] sm:$0xff] %v6574_v35  ;;  %2162 = vmatpush.msrb.mxu0 %v6592_v4  ;;  %v6598_v35 = vld [vmem:[%s8614_s3 + $0x348] sm:$0xff] }
 0x232   :  { %9017 = vst [vmem:[#allocation63_spill] sm:$0xff] %v6580_v41  ;;  %2186 = vmatpush.msrb.mxu1 %v6598_v35  ;;  %v6604_v41 = vld [vmem:[%s8614_s3 + $0x200] sm:$0xff]  ;;  %v960_v17 = vpop.f32.mrf.mxu3 }
 0x233   :  { %9018 = vst [vmem:[#allocation64_spill] sm:$0xff] %v6586_v15  ;;  %2130 = vmatpush.msra.mxu2 %v6604_v41  ;;  %v6610_v15 = vld [vmem:[%s8614_s3 + $0x2c0] sm:$0xff] }
 0x234   :  { %9019 = vst [vmem:[#allocation65_spill] sm:$0xff] %v6592_v4  ;;  %2154 = vmatpush.msra.mxu3 %v6610_v15  ;;  %v6636_v4 = vld [vmem:[%s8614_s3 + $0x1f0] sm:$0xff] }
 0x235   :  { %9020 = vst [vmem:[#allocation66_spill] sm:$0xff] %v6598_v35  ;;  %3571 = vmatmul.msk.f32.vlgmr.msra.gmra.mxu3 %vm1158_vm1, %v6361_v21  ;;  %v6618_v35 = vld [vmem:[%s8614_s3 + $0x278] sm:$0xff]  ;;  %2131 = vmatpush.msra.mxu2 %v6636_v4 }
 0x236   :  { %9021 = vst [vmem:[#allocation67_spill] sm:$0xff] %v6604_v41  ;;  %2163 = vmatpush.msrb.mxu0 %v6618_v35  ;;  %v6624_v41 = vld [vmem:[%s8614_s3 + $0x338] sm:$0xff] }
 0x237   :  { %9022 = vst [vmem:[#allocation68_spill] sm:$0xff] %v6610_v15  ;;  %2187 = vmatpush.msrb.mxu1 %v6624_v41  ;;  %v6630_v15 = vld [vmem:[%s8614_s3 + $0x470] sm:$0xff] }
 0x238   :  { %9023 = vst [vmem:[#allocation69_spill] sm:$0xff] %v6618_v35  ;;  %2204 = vmatpush.msrb.mxu3 %v6630_v15  ;;  %v6642_v35 = vld [vmem:[%s8614_s3 + $0x268] sm:$0xff] }
 0x239   :  { %9024 = vst [vmem:[#allocation70_spill] sm:$0xff] %v6624_v41  ;;  %2164 = vmatpush.msrb.mxu0 %v6642_v35  ;;  %v6648_v41 = vld [vmem:[%s8614_s3 + $0x328] sm:$0xff] }
 0x23a   :  { %9025 = vst [vmem:[#allocation72_spill] sm:$0xff] %v6630_v15  ;;  %2188 = vmatpush.msrb.mxu1 %v6648_v41  ;;  %v6654_v15 = vld [vmem:[%s8614_s3 + $0x460] sm:$0xff] }
 0x23b   :  { %9026 = vst [vmem:[#allocation73_spill] sm:$0xff] %v6636_v4  ;;  %2205 = vmatpush.msrb.mxu3 %v6654_v15  ;;  %v6660_v4 = vld [vmem:[%s8614_s3 + $0x1e0] sm:$0xff] }
 0x23c   :  { %9027 = vst [vmem:[#allocation74_spill] sm:$0xff] %v6642_v35  ;;  %2132 = vmatpush.msra.mxu2 %v6660_v4  ;;  %v6666_v35 = vld [vmem:[%s8614_s3 + $0x258] sm:$0xff] }
 0x23d   :  { %9028 = vst [vmem:[#allocation76_spill] sm:$0xff] %v6648_v41  ;;  %2165 = vmatpush.msrb.mxu0 %v6666_v35  ;;  %v6672_v41 = vld [vmem:[%s8614_s3 + $0x318] sm:$0xff] }
 0x23e   :  { %9029 = vst [vmem:[#allocation77_spill] sm:$0xff] %v6654_v15  ;;  %2189 = vmatpush.msrb.mxu1 %v6672_v41  ;;  %v6678_v15 = vld [vmem:[%s8614_s3 + $0x450] sm:$0xff] }
 0x23f   :  { %9030 = vst [vmem:[#allocation78_spill] sm:$0xff] %v6660_v4  ;;  %2206 = vmatpush.msrb.mxu3 %v6678_v15  ;;  %v6684_v4 = vld [vmem:[%s8614_s3 + $0x1d0] sm:$0xff] }
 0x240   :  { %9031 = vst [vmem:[#allocation79_spill] sm:$0xff] %v6666_v35  ;;  %2133 = vmatpush.msra.mxu2 %v6684_v4  ;;  %v6690_v35 = vld [vmem:[%s8614_s3 + $0x248] sm:$0xff] }
 0x241   :  { %9032 = vst [vmem:[#allocation81_spill] sm:$0xff] %v6672_v41  ;;  %2166 = vmatpush.msrb.mxu0 %v6690_v35  ;;  %v6696_v41 = vld [vmem:[%s8614_s3 + $0x308] sm:$0xff] }
 0x242   :  { %9033 = vst [vmem:[#allocation82_spill] sm:$0xff] %v6678_v15  ;;  %2190 = vmatpush.msrb.mxu1 %v6696_v41  ;;  %v6702_v15 = vld [vmem:[%s8614_s3 + $0x440] sm:$0xff] }
 0x243   :  { %9034 = vst [vmem:[#allocation84_spill] sm:$0xff] %v6684_v4  ;;  %2207 = vmatpush.msrb.mxu3 %v6702_v15  ;;  %v6708_v4 = vld [vmem:[%s8614_s3 + $0x1c0] sm:$0xff] }
 0x244   :  { %9035 = vst [vmem:[#allocation86_spill] sm:$0xff] %v6690_v35  ;;  %2134 = vmatpush.msra.mxu2 %v6708_v4  ;;  %v6714_v35 = vld [vmem:[%s8614_s3 + $0x238] sm:$0xff] }
 0x245   :  { %9036 = vst [vmem:[#allocation88_spill] sm:$0xff] %v6696_v41  ;;  %2167 = vmatpush.msrb.mxu0 %v6714_v35  ;;  %2135 = vmatmul.f32.vlgmr.msra.gmra.mxu2 %v6382_v5  ;;  %v6727_v41 = vld [vmem:[%s8614_s3 + $0x430] sm:$0xff] }
 0x246   :  { %9037 = vst [vmem:[#allocation90_spill] sm:$0xff] %v6702_v15  ;;  %v6721_v15 = vld [vmem:[%s8614_s3 + $0x2f8] sm:$0xff]  ;;  %2208 = vmatpush.msrb.mxu3 %v6727_v41 }
 0x247   :  { %9038 = vst [vmem:[#allocation92_spill] sm:$0xff] %v6708_v4  ;;  %2191 = vmatpush.msrb.mxu1 %v6721_v15  ;;  %v6739_v4 = vld [vmem:[%s8614_s3 + $0x228] sm:$0xff] }
 0x248   :  { %9039 = vst [vmem:[#allocation94_spill] sm:$0xff] %v6714_v35  ;;  %v6733_v35 = vld [vmem:[%s8614_s3 + $0x530] sm:$0xff]  ;;  %2168 = vmatpush.msrb.mxu0 %v6739_v4 }
 0x249   :  { %9040 = vst [vmem:[#allocation97_spill] sm:$0xff] %v6721_v15  ;;  %2228 = vmatpush.msrb.mxu2 %v6733_v35  ;;  %v6745_v15 = vld [vmem:[%s8614_s3 + $0x2e8] sm:$0xff] }
 0x24a   :  { %9041 = vst [vmem:[#allocation99_spill] sm:$0xff] %v6727_v41  ;;  %2192 = vmatpush.msrb.mxu1 %v6745_v15  ;;  %v6751_v41 = vld [vmem:[%s8614_s3 + $0x420] sm:$0xff] }
 0x24b   :  { %9042 = vst [vmem:[#allocation101_spill] sm:$0xff] %v6733_v35  ;;  %2209 = vmatpush.msrb.mxu3 %v6751_v41  ;;  %v6757_v35 = vld [vmem:[%s8614_s3 + $0x520] sm:$0xff] }
 0x24c   :  { %9043 = vst [vmem:[#allocation103_spill] sm:$0xff] %v6739_v4  ;;  %2229 = vmatpush.msrb.mxu2 %v6757_v35  ;;  %v6763_v4 = vld [vmem:[%s8614_s3 + $0x218] sm:$0xff] }
 0x24d   :  { %9044 = vst [vmem:[#allocation105_spill] sm:$0xff] %v6745_v15  ;;  %2169 = vmatpush.msrb.mxu0 %v6763_v4  ;;  %v6769_v15 = vld [vmem:[%s8614_s3 + $0x2d8] sm:$0xff] }
 0x24e   :  { %9045 = vst [vmem:[#allocation106_spill] sm:$0xff] %v6751_v41  ;;  %2193 = vmatpush.msrb.mxu1 %v6769_v15  ;;  %v6775_v41 = vld [vmem:[%s8614_s3 + $0x410] sm:$0xff] }
 0x24f   :  { %9046 = vst [vmem:[#allocation107_spill] sm:$0xff] %v6757_v35  ;;  %2210 = vmatpush.msrb.mxu3 %v6775_v41  ;;  %v6781_v35 = vld [vmem:[%s8614_s3 + $0x510] sm:$0xff] }
 0x250   :  { %9047 = vst [vmem:[#allocation108_spill] sm:$0xff] %v6763_v4  ;;  %2230 = vmatpush.msrb.mxu2 %v6781_v35  ;;  %v850_v4 = vpop.f32.mrf.mxu2 }
 0x251   :  { %9048 = vst [vmem:[#allocation4_spill] sm:$0xff] %v6769_v15  ;;  %v6787_v15 = vld [vmem:[%s8614_s3 + $0x208] sm:$0xff] }
 0x252   :  { %9049 = vst [vmem:[#allocation109_spill] sm:$0xff] %v6775_v41  ;;  %2170 = vmatpush.msrb.mxu0 %v6787_v15  ;;  %v6793_v41 = vld [vmem:[%s8614_s3 + $0x2c8] sm:$0xff]  ;;  %2231 = vmatpush.msrb.mxu2 %v6805_v28 }
 0x253   :  { %9050 = vst [vmem:[#allocation13_spill] sm:$0xff] %v6781_v35  ;;  %2194 = vmatpush.msrb.mxu1 %v6793_v41  ;;  %v6799_v35 = vld [vmem:[%s8614_s3 + $0x400] sm:$0xff] }
 0x254   :  { %9051 = vst [vmem:[#allocation110_spill] sm:$0xff] %v6787_v15  ;;  %2211 = vmatpush.msrb.mxu3 %v6799_v35  ;;  %3572 = vmatmul.msk.f32.vlgmr.msrb.gmra.mxu1 %vm1158_vm1, %v6361_v21  ;;  %v6831_v15 = vld [vmem:[%s8614_s3 + $0x4f0] sm:$0xff] }
 0x255   :  { %9052 = vst [vmem:[#allocation14_spill] sm:$0xff] %v6793_v41  ;;  %v6813_v41 = vld [vmem:[%s8614_s3 + $0x1f8] sm:$0xff]  ;;  %2232 = vmatpush.msrb.mxu2 %v6831_v15 }
 0x256   :  { %9053 = vst [vmem:[#allocation111_spill] sm:$0xff] %v6799_v35  ;;  %2171 = vmatpush.msrb.mxu0 %v6813_v41  ;;  %v6819_v35 = vld [vmem:[%s8614_s3 + $0x478] sm:$0xff] }
 0x257   :  { %9054 = vst [vmem:[#allocation7_spill] sm:$0xff] %v6805_v28  ;;  %2244 = vmatpush.msra.mxu1 %v6819_v35  ;;  %v6825_v28 = vld [vmem:[%s8614_s3 + $0x3f0] sm:$0xff] }
 0x258   :  { %9055 = vst [vmem:[#allocation5_spill] sm:$0xff] %v6813_v41  ;;  %2212 = vmatpush.msrb.mxu3 %v6825_v28  ;;  %v6837_v41 = vld [vmem:[%s8614_s3 + $0x1e8] sm:$0xff]  ;;  %v940_v29 = vpop.f32.mrf.mxu2 }
 0x259   :  { %9056 = vst [vmem:[#allocation112_spill] sm:$0xff] %v6819_v35  ;;  %2172 = vmatpush.msrb.mxu0 %v6837_v41  ;;  %v873_v35 = vadd.f32 %v850_v4, %v8927_v34  ;;  %v6857_v4 = vld [vmem:[%s8614_s3 + $0x4e0] sm:$0xff]  ;;  %v6875_v34 = vld [vmem:[%s8614_s3 + $0x3d0] sm:$0xff] }
 0x25a   :  { %9057 = vst [vmem:[#allocation21_spill] sm:$0xff] %v6825_v28  ;;  %v6845_v28 = vld [vmem:[%s8614_s3 + $0x468] sm:$0xff]  ;;  %2233 = vmatpush.msrb.mxu2 %v6857_v4 }
 0x25b   :  { %9058 = vst [vmem:[#allocation9_spill] sm:$0xff] %v6831_v15  ;;  %2245 = vmatpush.msra.mxu1 %v6845_v28  ;;  %v6851_v15 = vld [vmem:[%s8614_s3 + $0x3e0] sm:$0xff]  ;;  %2173 = vmatpush.msrb.mxu0 %v6863_v55 }
 0x25c   :  { %9059 = vst [vmem:[#allocation6_spill] sm:$0xff] %v6837_v41  ;;  %2213 = vmatpush.msrb.mxu3 %v6851_v15  ;;  %v915_v41 = vpop.f32.mrf.mxu1 }
 0x25d   :  { %9060 = vst [vmem:[#allocation113_spill] sm:$0xff] %v6845_v28  ;;  %v6881_v28 = vld [vmem:[%s8614_s3 + $0x4d0] sm:$0xff] }
 0x25e   :  { %9061 = vst [vmem:[#allocation25_spill] sm:$0xff] %v6851_v15  ;;  %v6869_v15 = vld [vmem:[%s8614_s3 + $0x458] sm:$0xff]  ;;  %2214 = vmatpush.msrb.mxu3 %v6875_v34  ;;  %2234 = vmatpush.msrb.mxu2 %v6881_v28 }
 0x25f   :  { %9062 = vst [vmem:[#allocation11_spill] sm:$0xff] %v6857_v4  ;;  %2246 = vmatpush.msra.mxu1 %v6869_v15  ;;  %v919_v4 = vadd.f32 %v915_v41, %v874_v2  ;;  %v6912_v2 = vld [vmem:[%s8614_s3 + $0x438] sm:$0xff]  ;;  %v6924_v41 = vld [vmem:[%s8614_s3 + $0x3b0] sm:$0xff] }
 0x260   :  { %9063 = vst [vmem:[#allocation17_spill] sm:$0xff] %v6863_v55  ;;  %v6887_v55 = vld [vmem:[%s8614_s3 + $0x1c8] sm:$0xff] }
 0x261   :  { %9064 = vst [vmem:[#allocation114_spill] sm:$0xff] %v6869_v15  ;;  %2174 = vmatpush.msrb.mxu0 %v6887_v55  ;;  %v918_v15 = vadd.f32 %v895_v16, %v873_v35  ;;  %v6905_v16 = vld [vmem:[%s8614_s3 + $0x4c0] sm:$0xff]  ;;  %v6918_v35 = vld [vmem:[%s8614_s3 + $0x538] sm:$0xff] }
 0x262   :  { %9065 = vst [vmem:[#allocation29_spill] sm:$0xff] %v6875_v34  ;;  %v6893_v34 = vld [vmem:[%s8614_s3 + $0x448] sm:$0xff]  ;;  %2235 = vmatpush.msrb.mxu2 %v6905_v16  ;;  %2175 = vmatmul.f32.vlgmr.msrb.gmra.mxu0 %v6382_v5 }
 0x263   :  { %9066 = vst [vmem:[#allocation15_spill] sm:$0xff] %v6881_v28  ;;  %2247 = vmatpush.msra.mxu1 %v6893_v34  ;;  %v6899_v28 = vld [vmem:[%s8614_s3 + $0x3c0] sm:$0xff]  ;;  %2268 = vmatpush.msra.mxu0 %v6918_v35 }
 0x264   :  { %9067 = vst [vmem:[#allocation18_spill] sm:$0xff] %v6893_v34  ;;  %2215 = vmatpush.msrb.mxu3 %v6899_v28  ;;  %v964_v34 = vadd.f32 %v960_v17, %v919_v4  ;;  %v6960_v17 = vld [vmem:[%s8614_s3 + $0x418] sm:$0xff]  ;;  %v6972_v4 = vld [vmem:[%s8614_s3 + $0x390] sm:$0xff] }
 0x265   :  { %9068 = vst [vmem:[#allocation115_spill] sm:$0xff] %v6899_v28  ;;  %2248 = vmatpush.msra.mxu1 %v6912_v2  ;;  %v6930_v28 = vld [vmem:[%s8614_s3 + $0x4b0] sm:$0xff] }
 0x266   :  { %9069 = vst [vmem:[#allocation33_spill] sm:$0xff] %v6912_v2  ;;  %2216 = vmatpush.msrb.mxu3 %v6924_v41  ;;  %2236 = vmatpush.msrb.mxu2 %v6930_v28  ;;  %v963_v2 = vadd.f32 %v940_v29, %v918_v15  ;;  %v6954_v29 = vld [vmem:[%s8614_s3 + $0x4a0] sm:$0xff]  ;;  %v6966_v15 = vld [vmem:[%s8614_s3 + $0x518] sm:$0xff] }
 0x267   :  { %9070 = vst [vmem:[#allocation19_spill] sm:$0xff] %v6918_v35  ;;  %v6936_v35 = vld [vmem:[%s8614_s3 + $0x428] sm:$0xff] }
 0x268   :  { %9071 = vst [vmem:[#allocation8_spill] sm:$0xff] %v6924_v41  ;;  %2249 = vmatpush.msra.mxu1 %v6936_v35  ;;  %v6942_v41 = vld [vmem:[%s8614_s3 + $0x528] sm:$0xff]  ;;  %2237 = vmatpush.msrb.mxu2 %v6954_v29 }
 0x269   :  { %9072 = vst [vmem:[#allocation23_spill] sm:$0xff] %v6930_v28  ;;  %2269 = vmatpush.msra.mxu0 %v6942_v41  ;;  %v6948_v28 = vld [vmem:[%s8614_s3 + $0x3a0] sm:$0xff] }
 0x26a   :  { %9073 = vst [vmem:[#allocation22_spill] sm:$0xff] %v6936_v35  ;;  %2217 = vmatpush.msrb.mxu3 %v6948_v28  ;;  %2250 = vmatpush.msra.mxu1 %v6960_v17  ;;  %v6983_v35 = vmax.f32 %v964_v34, 0.0  ;;  %v7006_v34 = vld [vmem:[%s8614_s3 + $0x480] sm:$0xff] }
 0x26b   :  { %9074 = vst [vmem:[#allocation27_spill] sm:$0xff] %v6948_v28  ;;  %2270 = vmatpush.msra.mxu0 %v6966_v15  ;;  %v6978_v28 = vld [vmem:[%s8614_s3 + $0x490] sm:$0xff] }
 0x26c   :  { %9075 = vst [vmem:[#allocation10_spill] sm:$0xff] %v6960_v17  ;;  %2218 = vmatpush.msrb.mxu3 %v6972_v4  ;;  %2238 = vmatpush.msrb.mxu2 %v6978_v28  ;;  %v6981_v17 = vmax.f32 %v963_v2, 0.0  ;;  %v7000_v2 = vld [vmem:[%s8614_s3 + $0x380] sm:$0xff] }
 0x26d   :  { %9076 = vst [vmem:[#allocation41_spill] sm:$0xff] %v6966_v15  ;;  %v6988_v15 = vld [vmem:[%s8614_s3 + $0x408] sm:$0xff] }
 0x26e   :  { %9077 = vst [vmem:[#allocation26_spill] sm:$0xff] %v6972_v4  ;;  %2251 = vmatpush.msra.mxu1 %v6988_v15  ;;  %v6994_v4 = vld [vmem:[%s8614_s3 + $0x508] sm:$0xff]  ;;  %2219 = vmatpush.msrb.mxu3 %v7000_v2 }
 0x26f   :  { %9078 = vst [vmem:[#allocation31_spill] sm:$0xff] %v6988_v15  ;;  %2271 = vmatpush.msra.mxu0 %v6994_v4  ;;  %2239 = vmatpush.msrb.mxu2 %v7006_v34  ;;  %v7015_v15 = vld [vmem:[%s8614_s3 + $0x3f8] sm:$0xff] }
 0x270   :  { %9079 = vst [vmem:[#allocation12_spill] sm:$0xff] %v7000_v2  ;;  %2220 = vmatmul.f32.vlgmr.msrb.gmra.mxu3 %v6981_v17  ;;  %3573 = vmatmul.msk.f32.vlgmr.msrb.gmra.mxu2 %vm1158_vm1, %v6983_v35  ;;  %v7021_v2 = vld [vmem:[%s8614_s3 + $0x4f8] sm:$0xff] }
 0x271   :  { %9080 = vst [vmem:[#allocation32_spill] sm:$0xff] %v7006_v34  ;;  %2252 = vmatpush.msra.mxu1 %v7015_v15  ;;  %2272 = vmatpush.msra.mxu0 %v7021_v2  ;;  %v7029_v34 = vld [vmem:[%s8614_s3 + $0x3e8] sm:$0xff] }
 0x272   :  { %9081 = vst [vmem:[#allocation30_spill] sm:$0xff] %v7015_v15  ;;  %2288 = vmatpush.msra.mxu2 %v5873_v25  ;;  %2312 = vmatpush.msra.mxu3 %v8939_v57  ;;  %v7035_v15 = vld [vmem:[%s8614_s3 + $0x4e8] sm:$0xff]  ;;  %v7043_v25 = vld [vmem:[%s8614_s3 + $0x3d8] sm:$0xff] }
 0x273   :  { %2253 = vmatpush.msra.mxu1 %v7029_v34  ;;  %2273 = vmatpush.msra.mxu0 %v7035_v15  ;;  %v7049_v57 = vld [vmem:[%s8614_s3 + $0x4d8] sm:$0xff] }
 0x274   :  { %2289 = vmatpush.msra.mxu2 %v5887_v52  ;;  %2313 = vmatpush.msra.mxu3 %v8941_v32  ;;  %v7057_v52 = vld [vmem:[%s8614_s3 + $0x3c8] sm:$0xff] }
 0x275   :  { %2254 = vmatpush.msra.mxu1 %v7043_v25  ;;  %2274 = vmatpush.msra.mxu0 %v7049_v57  ;;  %v7063_v32 = vld [vmem:[%s8614_s3 + $0x4c8] sm:$0xff] }
 0x276   :  { %2290 = vmatpush.msra.mxu2 %v5901_v48  ;;  %2314 = vmatpush.msra.mxu3 %v8943_v14  ;;  %v7071_v48 = vld [vmem:[%s8614_s3 + $0x3b8] sm:$0xff] }
 0x277   :  { %2255 = vmatpush.msra.mxu1 %v7057_v52  ;;  %2275 = vmatpush.msra.mxu0 %v7063_v32  ;;  %v7077_v14 = vld [vmem:[%s8614_s3 + $0x4b8] sm:$0xff] }
 0x278   :  { %2291 = vmatpush.msra.mxu2 %v5915_v3  ;;  %2315 = vmatpush.msra.mxu3 %v8946_v20  ;;  %v7085_v3 = vld [vmem:[%s8614_s3 + $0x3a8] sm:$0xff] }
 0x279   :  { %2256 = vmatpush.msra.mxu1 %v7071_v48  ;;  %2276 = vmatpush.msra.mxu0 %v7077_v14  ;;  %v7091_v20 = vld [vmem:[%s8614_s3 + $0x4a8] sm:$0xff] }
 0x27a   :  { %2292 = vmatpush.msra.mxu2 %v5929_v62  ;;  %2316 = vmatpush.msra.mxu3 %v8950_v27  ;;  %v7099_v62 = vld [vmem:[%s8614_s3 + $0x398] sm:$0xff] }
 0x27b   :  { %2257 = vmatpush.msra.mxu1 %v7085_v3  ;;  %2277 = vmatpush.msra.mxu0 %v7091_v20  ;;  %v7105_v27 = vld [vmem:[%s8614_s3 + $0x498] sm:$0xff] }
 0x27c   :  { %2293 = vmatpush.msra.mxu2 %v5943_v0  ;;  %2317 = vmatpush.msra.mxu3 %v8954_v1  ;;  %v7113_v0 = vld [vmem:[%s8614_s3 + $0x388] sm:$0xff] }
 0x27d   :  { %2258 = vmatpush.msra.mxu1 %v7099_v62  ;;  %2278 = vmatpush.msra.mxu0 %v7105_v27  ;;  %v7119_v1 = vld [vmem:[%s8614_s3 + $0x488] sm:$0xff] }
 0x27e   :  { %2294 = vmatpush.msra.mxu2 %v5957_v10  ;;  %2318 = vmatpush.msra.mxu3 %v8958_v33  ;;  %v7150_v10 = vpop.f32.mrf.mxu0  ;;  %v9087_v33 = vld [vmem:[#allocation93_spill] sm:$0xff] }
 0x27f   :  { %2259 = vmatpush.msra.mxu1 %v7113_v0  ;;  %2279 = vmatpush.msra.mxu0 %v7119_v1 }
 0x280   :  { %2295 = vmatpush.msra.mxu2 %v8945_v18  ;;  %2319 = vmatpush.msra.mxu3 %v8962_v43  ;;  %v7156_v18 = vpop.f32.mrf.mxu1  ;;  %v9090_v43 = vld [vmem:[#allocation98_spill] sm:$0xff] }
 0x281   :  { %2260 = vmatmul.f32.vlgmr.msra.gmra.mxu1 %v6981_v17  ;;  %3574 = vmatmul.msk.f32.vlgmr.msra.gmra.mxu0 %vm1158_vm1, %v6983_v35 }
 0x282   :  { %2328 = vmatpush.msrb.mxu0 %v8948_v23  ;;  %2352 = vmatpush.msrb.mxu1 %v8964_v47  ;;  %v9082_v23 = vld [vmem:[#allocation80_spill] sm:$0xff] }
 0x283   :  { %2296 = vmatpush.msra.mxu2 %v8949_v61  ;;  %2320 = vmatpush.msra.mxu3 %v8966_v49  ;;  %v9083_v61 = vld [vmem:[#allocation83_spill] sm:$0xff]  ;;  %v9091_v47 = vld [vmem:[#allocation100_spill] sm:$0xff] }
 0x284   :  { %2329 = vmatpush.msrb.mxu0 %v8952_v38  ;;  %2353 = vmatpush.msrb.mxu1 %v8968_v45  ;;  %v9084_v38 = vld [vmem:[#allocation85_spill] sm:$0xff]  ;;  %v9093_v49 = vld [vmem:[#allocation104_spill] sm:$0xff] }
 0x285   :  { %2297 = vmatpush.msra.mxu2 %v8953_v6  ;;  %2321 = vmatpush.msra.mxu3 %v8970_v54  ;;  %v9085_v6 = vld [vmem:[#allocation89_spill] sm:$0xff]  ;;  %v9097_v54 = vld [vmem:[#allocation55_spill] sm:$0xff] }
 0x286   :  { %2330 = vmatpush.msrb.mxu0 %v8956_v26  ;;  %2354 = vmatpush.msrb.mxu1 %v8972_v59  ;;  %v9086_v26 = vld [vmem:[#allocation91_spill] sm:$0xff]  ;;  %v9095_v45 = vld [vmem:[#allocation45_spill] sm:$0xff] }
 0x287   :  { %2298 = vmatpush.msra.mxu2 %v8957_v30  ;;  %2322 = vmatpush.msra.mxu3 %v8974_v46  ;;  %v7174_v30 = vpop.f32.mrf.mxu0  ;;  %v9099_v59 = vld [vmem:[#allocation47_spill] sm:$0xff] }
 0x288   :  { %2331 = vmatpush.msrb.mxu0 %v8960_v37  ;;  %2355 = vmatpush.msrb.mxu1 %v8976_v24  ;;  %v9088_v37 = vld [vmem:[#allocation95_spill] sm:$0xff]  ;;  %v9102_v24 = vld [vmem:[#allocation48_spill] sm:$0xff] }
 0x289   :  { %2299 = vmatpush.msra.mxu2 %v8961_v51  ;;  %2323 = vmatpush.msra.mxu3 %v8978_v42  ;;  %v9089_v51 = vld [vmem:[#allocation96_spill] sm:$0xff]  ;;  %v9101_v46 = vld [vmem:[#allocation59_spill] sm:$0xff] }
 0x28a   :  { %3575 = vmatmul.msk.f32.vlgmr.msra.gmra.mxu3 %vm1158_vm1, %v6361_v21  ;;  %2332 = vmatpush.msrb.mxu0 %v8963_v44  ;;  %v7180_v44 = vpop.f32.mrf.mxu1  ;;  %v9105_v42 = vld [vmem:[#allocation63_spill] sm:$0xff] }
 0x28b   :  { %2356 = vmatpush.msrb.mxu1 %v8980_v19  ;;  %2370 = vmatpush.msrb.mxu3 %v8981_v22  ;;  %v9106_v19 = vld [vmem:[#allocation50_spill] sm:$0xff]  ;;  %v9107_v22 = vld [vmem:[#allocation51_spill] sm:$0xff] }
 0x28c   :  { %2300 = vmatpush.msra.mxu2 %v8965_v12  ;;  %2333 = vmatpush.msrb.mxu0 %v8967_v50  ;;  %v9092_v12 = vld [vmem:[#allocation102_spill] sm:$0xff]  ;;  %v9094_v50 = vld [vmem:[#allocation116_spill] sm:$0xff] }
 0x28d   :  { %2357 = vmatpush.msrb.mxu1 %v8984_v13  ;;  %2371 = vmatpush.msrb.mxu3 %v8985_v63  ;;  %v9108_v13 = vld [vmem:[#allocation65_spill] sm:$0xff]  ;;  %v9109_v63 = vld [vmem:[#allocation67_spill] sm:$0xff] }
 0x28e   :  { %2301 = vmatpush.msra.mxu2 %v8969_v53  ;;  %2334 = vmatpush.msrb.mxu0 %v8971_v58  ;;  %v9096_v53 = vld [vmem:[#allocation53_spill] sm:$0xff]  ;;  %v9098_v58 = vld [vmem:[#allocation46_spill] sm:$0xff] }
 0x28f   :  { %2358 = vmatpush.msrb.mxu1 %v8988_v31  ;;  %2372 = vmatpush.msrb.mxu3 %v8989_v60  ;;  %v9111_v31 = vld [vmem:[#allocation69_spill] sm:$0xff]  ;;  %v9112_v60 = vld [vmem:[#allocation54_spill] sm:$0xff] }
 0x290   :  { %2302 = vmatpush.msra.mxu2 %v8973_v8  ;;  %2335 = vmatpush.msrb.mxu0 %v8975_v39  ;;  %v9100_v8 = vld [vmem:[#allocation57_spill] sm:$0xff]  ;;  %v7195_v39 = vpop.f32.mrf.mxu0 }
 0x291   :  { %2359 = vmatpush.msrb.mxu1 %v8991_v56  ;;  %2373 = vmatpush.msrb.mxu3 %v8992_v36  ;;  %v9114_v56 = vld [vmem:[#allocation56_spill] sm:$0xff]  ;;  %v9115_v36 = vld [vmem:[#allocation74_spill] sm:$0xff] }
 0x292   :  { %2303 = vmatpush.msra.mxu2 %v8977_v40  ;;  %2336 = vmatpush.msrb.mxu0 %v8979_v11  ;;  %v9103_v40 = vld [vmem:[#allocation49_spill] sm:$0xff]  ;;  %v7201_v11 = vpop.f32.mrf.mxu1 }
 0x293   :  { %2304 = vmatmul.f32.vlgmr.msra.gmra.mxu2 %v6382_v5  ;;  %2360 = vmatpush.msrb.mxu1 %v8994_v7  ;;  %v9110_v7 = vld [vmem:[#allocation52_spill] sm:$0xff] }
 0x294   :  { %2374 = vmatpush.msrb.mxu3 %v9082_v23  ;;  %2394 = vmatpush.msrb.mxu2 %v9083_v61  ;;  %v9116_v23 = vld [vmem:[#allocation58_spill] sm:$0xff] }
 0x295   :  { %2337 = vmatpush.msrb.mxu0 %v9084_v38  ;;  %2361 = vmatpush.msrb.mxu1 %v8998_v9  ;;  %v9113_v9 = vld [vmem:[#allocation73_spill] sm:$0xff]  ;;  %v9117_v38 = vld [vmem:[#allocation78_spill] sm:$0xff] }
 0x296   :  { %2375 = vmatpush.msrb.mxu3 %v9085_v6  ;;  %2395 = vmatpush.msrb.mxu2 %v9086_v26  ;;  %v9118_v6 = vld [vmem:[#allocation60_spill] sm:$0xff]  ;;  %v9119_v26 = vld [vmem:[#allocation79_spill] sm:$0xff] }
 0x297   :  { %2338 = vmatpush.msrb.mxu0 %v9087_v33  ;;  %2362 = vmatpush.msrb.mxu1 %v9088_v37  ;;  %v9121_v37 = vld [vmem:[#allocation84_spill] sm:$0xff] }
 0x298   :  { %2376 = vmatpush.msrb.mxu3 %v9089_v51  ;;  %2396 = vmatpush.msrb.mxu2 %v9090_v43  ;;  %v7215_v61 = vpop.f32.mrf.mxu0  ;;  %v9122_v51 = vld [vmem:[#allocation64_spill] sm:$0xff]  ;;  %v9123_v43 = vld [vmem:[#allocation86_spill] sm:$0xff] }
 0x299   :  { %2339 = vmatpush.msrb.mxu0 %v9091_v47  ;;  %2363 = vmatpush.msrb.mxu1 %v9092_v12  ;;  %v9124_v47 = vld [vmem:[#allocation66_spill] sm:$0xff]  ;;  %v9125_v12 = vld [vmem:[#allocation92_spill] sm:$0xff] }
 0x29a   :  { %2377 = vmatpush.msrb.mxu3 %v9093_v49  ;;  %2397 = vmatpush.msrb.mxu2 %v9094_v50  ;;  %v7221_v33 = vpop.f32.mrf.mxu1  ;;  %v9126_v49 = vld [vmem:[#allocation68_spill] sm:$0xff]  ;;  %v9127_v50 = vld [vmem:[#allocation94_spill] sm:$0xff] }
 0x29b   :  { %3576 = vmatmul.msk.f32.vlgmr.msrb.gmra.mxu1 %vm1158_vm1, %v6361_v21  ;;  %2340 = vmatpush.msrb.mxu0 %v9095_v45  ;;  %v9104_v21 = vld [vmem:[#allocation61_spill] sm:$0xff]  ;;  %v9128_v45 = vld [vmem:[#allocation70_spill] sm:$0xff] }
 0x29c   :  { %2410 = vmatpush.msra.mxu1 %v9096_v53  ;;  %2378 = vmatpush.msrb.mxu3 %v9097_v54  ;;  %v7234_v53 = vpop.f32.mrf.mxu2  ;;  %v9129_v54 = vld [vmem:[#allocation72_spill] sm:$0xff] }
 0x29d   :  { %2398 = vmatpush.msrb.mxu2 %v9098_v58  ;;  %2341 = vmatpush.msrb.mxu0 %v9099_v59  ;;  %v9130_v58 = vld [vmem:[#allocation101_spill] sm:$0xff]  ;;  %v1049_v59 = vpop.f32.mrf.mxu3 }
 0x29e   :  { %2411 = vmatpush.msra.mxu1 %v9100_v8  ;;  %2379 = vmatpush.msrb.mxu3 %v9101_v46  ;;  %v9131_v46 = vld [vmem:[#allocation103_spill] sm:$0xff] }
 0x29f   :  { %2399 = vmatpush.msrb.mxu2 %v9102_v24  ;;  %2342 = vmatpush.msrb.mxu0 %v9103_v40  ;;  %v9132_v24 = vld [vmem:[#allocation76_spill] sm:$0xff]  ;;  %v9133_v40 = vld [vmem:[#allocation77_spill] sm:$0xff] }
 0x2a0   :  { %2412 = vmatpush.msra.mxu1 %v9104_v21  ;;  %2380 = vmatpush.msrb.mxu3 %v9105_v42  ;;  %v7238_v8 = vpop.f32.mrf.mxu0  ;;  %v9134_v21 = vld [vmem:[#allocation107_spill] sm:$0xff] }
 0x2a1   :  { %2400 = vmatpush.msrb.mxu2 %v9106_v19  ;;  %2343 = vmatpush.msrb.mxu0 %v9107_v22  ;;  %v9135_v19 = vld [vmem:[#allocation108_spill] sm:$0xff]  ;;  %v9136_v22 = vld [vmem:[#allocation81_spill] sm:$0xff] }
 0x2a2   :  { %2413 = vmatpush.msra.mxu1 %v9108_v13  ;;  %2381 = vmatpush.msrb.mxu3 %v9109_v63  ;;  %v7244_v42 = vpop.f32.mrf.mxu1  ;;  %v9137_v13 = vld [vmem:[#allocation82_spill] sm:$0xff]  ;;  %v9138_v63 = vld [vmem:[#allocation13_spill] sm:$0xff] }
 0x2a3   :  { %2401 = vmatpush.msrb.mxu2 %v9110_v7  ;;  %2344 = vmatmul.f32.vlgmr.msrb.gmra.mxu0 %v6382_v5  ;;  %v9120_v5 = vld [vmem:[#allocation62_spill] sm:$0xff] }
 0x2a4   :  { %2414 = vmatpush.msra.mxu1 %v9111_v31  ;;  %2434 = vmatpush.msra.mxu0 %v9112_v60  ;;  %v9139_v7 = vld [vmem:[#allocation110_spill] sm:$0xff]  ;;  %v9140_v31 = vld [vmem:[#allocation88_spill] sm:$0xff] }
 0x2a5   :  { %2382 = vmatpush.msrb.mxu3 %v9113_v9  ;;  %2402 = vmatpush.msrb.mxu2 %v9114_v56  ;;  %v9141_v60 = vld [vmem:[#allocation90_spill] sm:$0xff]  ;;  %v9142_v9 = vld [vmem:[#allocation7_spill] sm:$0xff]  ;;  %v9143_v56 = vld [vmem:[#allocation5_spill] sm:$0xff] }
 0x2a6   :  { %2415 = vmatpush.msra.mxu1 %v9115_v36  ;;  %2435 = vmatpush.msra.mxu0 %v9116_v23  ;;  %v9144_v36 = vld [vmem:[#allocation97_spill] sm:$0xff]  ;;  %v9145_v23 = vld [vmem:[#allocation99_spill] sm:$0xff] }
 0x2a7   :  { %2383 = vmatpush.msrb.mxu3 %v9117_v38  ;;  %2403 = vmatpush.msrb.mxu2 %v9118_v6  ;;  %v9146_v38 = vld [vmem:[#allocation9_spill] sm:$0xff]  ;;  %v7258_v6 = vpop.f32.mrf.mxu2 }
 0x2a8   :  { %2416 = vmatpush.msra.mxu1 %v9119_v26  ;;  %2436 = vmatpush.msra.mxu0 %v9120_v5  ;;  %v7260_v26 = vpop.f32.mrf.mxu0  ;;  %v9147_v5 = vld [vmem:[#allocation6_spill] sm:$0xff] }
 0x2a9   :  { %2384 = vmatpush.msrb.mxu3 %v9121_v37  ;;  %2404 = vmatpush.msrb.mxu2 %v9122_v51  ;;  %v9148_v37 = vld [vmem:[#allocation105_spill] sm:$0xff]  ;;  %v9149_v51 = vld [vmem:[#allocation2_spill] sm:$0xff] }
 0x2aa   :  { %2417 = vmatpush.msra.mxu1 %v9123_v43  ;;  %2437 = vmatpush.msra.mxu0 %v9124_v47  ;;  %v1008_v43 = vadd.f32 %v7156_v18, %v9149_v51  ;;  %v9150_v47 = vld [vmem:[#allocation106_spill] sm:$0xff] }
 0x2ab   :  { %2385 = vmatpush.msrb.mxu3 %v9125_v12  ;;  %2405 = vmatpush.msrb.mxu2 %v9126_v49  ;;  %v9151_v12 = vld [vmem:[#allocation11_spill] sm:$0xff]  ;;  %v7268_v49 = vpop.f32.mrf.mxu3  ;;  %v9174_v51 = vld [vmem:[#allocation22_spill] sm:$0xff] }
 0x2ac   :  { %2386 = vmatmul.f32.vlgmr.msrb.gmra.mxu3 %v6981_v17  ;;  %3577 = vmatmul.msk.f32.vlgmr.msrb.gmra.mxu2 %vm1158_vm1, %v6983_v35  ;;  %v1053_v18 = vadd.f32 %v1049_v59, %v1008_v43  ;;  %v9161_v59 = vld [vmem:[#allocation23_spill] sm:$0xff] }
 0x2ad   :  { %2418 = vmatpush.msra.mxu1 %v9127_v50  ;;  %2438 = vmatpush.msra.mxu0 %v9128_v45  ;;  %v7270_v50 = vpop.f32.mrf.mxu1  ;;  %v9152_v45 = vld [vmem:[#allocation17_spill] sm:$0xff]  ;;  %v7339_v43 = vld [vmem:[%s9169_s9 + $0x68] sm:$0xff] }
 0x2ae   :  { %2455 = vmatpush.msra.mxu2 %v9129_v54  ;;  %2479 = vmatpush.msra.mxu3 %v9130_v58  ;;  %v9153_v54 = vld [vmem:[#allocation4_spill] sm:$0xff]  ;;  %v9154_v58 = vld [vmem:[#allocation109_spill] sm:$0xff] }
 0x2af   :  { %2419 = vmatpush.msra.mxu1 %v9131_v46  ;;  %2439 = vmatpush.msra.mxu0 %v9132_v24  ;;  %v9155_v46 = vld [vmem:[#allocation15_spill] sm:$0xff]  ;;  %v9156_v24 = vld [vmem:[#allocation14_spill] sm:$0xff] }
 0x2b0   :  { %2456 = vmatpush.msra.mxu2 %v9133_v40  ;;  %2480 = vmatpush.msra.mxu3 %v9134_v21  ;;  %v9157_v40 = vld [vmem:[#allocation111_spill] sm:$0xff]  ;;  %v9158_v21 = vld [vmem:[#allocation112_spill] sm:$0xff] }
 0x2b1   :  { %2420 = vmatpush.msra.mxu1 %v9135_v19  ;;  %2440 = vmatpush.msra.mxu0 %v9136_v22  ;;  %v9159_v19 = vld [vmem:[#allocation19_spill] sm:$0xff]  ;;  %v7285_v22 = vpop.f32.mrf.mxu2 }
 0x2b2   :  { %2457 = vmatpush.msra.mxu2 %v9137_v13  ;;  %2481 = vmatpush.msra.mxu3 %v9138_v63  ;;  %v7287_v13 = vpop.f32.mrf.mxu0  ;;  %v7292_v63 = vadd.f32 %v7180_v44, %v1053_v18  ;;  %v9167_v44 = vld [vmem:[#allocation29_spill] sm:$0xff]  ;;  %v9179_v18 = vld [vmem:[#allocation31_spill] sm:$0xff] }
 0x2b3   :  { %2421 = vmatpush.msra.mxu1 %v9139_v7  ;;  %2441 = vmatpush.msra.mxu0 %v9140_v31  ;;  %v7298_v7 = vpop.f32.mrf.mxu3 }
 0x2b4   :  { %2458 = vmatpush.msra.mxu2 %v9141_v60  ;;  %2482 = vmatpush.msra.mxu3 %v9142_v9  ;;  %v9164_v60 = vld [vmem:[#allocation25_spill] sm:$0xff]  ;;  %v9165_v9 = vld [vmem:[#allocation114_spill] sm:$0xff] }
 0x2b5   :  { %2422 = vmatpush.msra.mxu1 %v9143_v56  ;;  %2442 = vmatpush.msra.mxu0 %v9144_v36  ;;  %v7300_v31 = vpop.f32.mrf.mxu1  ;;  %v9166_v56 = vld [vmem:[#allocation41_spill] sm:$0xff]  ;;  %v9168_v36 = vld [vmem:[#allocation18_spill] sm:$0xff] }
 0x2b6   :  { %2459 = vmatpush.msra.mxu2 %v9145_v23  ;;  %2483 = vmatpush.msra.mxu3 %v9146_v38  ;;  %v9170_v23 = vld [vmem:[#allocation115_spill] sm:$0xff]  ;;  %v9171_v38 = vld [vmem:[#allocation32_spill] sm:$0xff] }
 0x2b7   :  { %2423 = vmatpush.msra.mxu1 %v9147_v5  ;;  %2443 = vmatpush.msra.mxu0 %v9148_v37 }
 0x2b8   :  { %2460 = vmatpush.msra.mxu2 %v9150_v47  ;;  %2484 = vmatpush.msra.mxu3 %v9151_v12 }
 0x2b9   :  { %2424 = vmatpush.msra.mxu1 %v9152_v45  ;;  %2444 = vmatpush.msra.mxu0 %v9153_v54  ;;  %v7328_v5 = vpop.f32.mrf.mxu2  ;;  %v9176_v54 = vld [vmem:[#allocation27_spill] sm:$0xff] }
 0x2ba   :  { %2461 = vmatpush.msra.mxu2 %v9154_v58  ;;  %2485 = vmatpush.msra.mxu3 %v9155_v46  ;;  %v7330_v37 = vpop.f32.mrf.mxu0  ;;  %v9177_v58 = vld [vmem:[#allocation10_spill] sm:$0xff]  ;;  %v1240_v46 = vadd.f32 %v7201_v11, %v7195_v39  ;;  %v7379_v39 = vld [vmem:[%s9169_s9 + $0x58] sm:$0xff]  ;;  %v9180_v11 = vld [vmem:[#allocation12_spill] sm:$0xff] }
 0x2bb   :  { %2425 = vmatpush.msra.mxu1 %v6887_v55  ;;  %2445 = vmatpush.msra.mxu0 %v9156_v24  ;;  %v9160_v55 = vld [vmem:[#allocation21_spill] sm:$0xff]  ;;  %v7344_v12 = vpop.f32.mrf.mxu3  ;;  %v9178_v24 = vld [vmem:[#allocation26_spill] sm:$0xff] }
 0x2bc   :  { %2462 = vmatpush.msra.mxu2 %v9157_v40  ;;  %2486 = vmatpush.msra.mxu3 %v6905_v16  ;;  %v9162_v16 = vld [vmem:[#allocation113_spill] sm:$0xff] }
 0x2bd   :  { %2426 = vmatmul.f32.vlgmr.msra.gmra.mxu1 %v6981_v17  ;;  %3578 = vmatmul.msk.f32.vlgmr.msra.gmra.mxu0 %vm1158_vm1, %v6983_v35  ;;  %v9163_v35 = vld [vmem:[#allocation3_spill] sm:$0xff]  ;;  %v7346_v45 = vpop.f32.mrf.mxu1 }
 0x2be   :  { %2495 = vmatpush.msrb.mxu0 %v9158_v21  ;;  %2519 = vmatpush.msrb.mxu1 %v9159_v19  ;;  %v1007_v17 = vadd.f32 %v7150_v10, %v9163_v35  ;;  %v7314_v10 = vld [vmem:[%s9169_s9 + $0x78] sm:$0xff]  ;;  %v1387_v21 = vadd.f32 %v7215_v61, %v7221_v33  ;;  %v9181_v19 = vld [vmem:[#allocation30_spill] sm:$0xff] }
 0x2bf   :  { %2463 = vmatpush.msra.mxu2 %v9160_v55  ;;  %2487 = vmatpush.msra.mxu3 %v9161_v59  ;;  %v7401_v59 = vld [vmem:[%s9169_s9 + $0x50] sm:$0xff] }
 0x2c0   :  { %2496 = vmatpush.msrb.mxu0 %v9162_v16  ;;  %2520 = vmatpush.msrb.mxu1 %v6942_v41  ;;  %v1100_v41 = vmax.f32 %v7292_v63, 0.0  ;;  %v7406_v16 = vld [vmem:[%s9169_s9 + $0x90] sm:$0xff] }
 0x2c1   :  { %2464 = vmatpush.msra.mxu2 %v9164_v60  ;;  %2488 = vmatpush.msra.mxu3 %v6954_v29  ;;  %v1052_v29 = vadd.f32 %v7234_v53, %v1007_v17  ;;  %v9173_v53 = vld [vmem:[#allocation8_spill] sm:$0xff]  ;;  %v7391_v33 = vpop.f32.mrf.mxu2  ;;  %v7422_v17 = vld [vmem:[%s9169_s9 + $0x88] sm:$0xff] }
 0x2c2   :  { %2497 = vmatpush.msrb.mxu0 %v9165_v9  ;;  %2521 = vmatpush.msrb.mxu1 %v9166_v56  ;;  %v7393_v55 = vpop.f32.mrf.mxu0  ;;  %v1613_v9 = vadd.f32 %v7260_v26, %v7270_v50  ;;  %v1695_v26 = vadd.f32 %v7300_v31, %v7287_v13  ;;  %v7461_v50 = vld [vmem:[%s9169_s9 + $0x38] sm:$0xff]  ;;  %v7472_v13 = vld [vmem:[%s9169_s9 + $0x110] sm:$0xff] }
 0x2c3   :  { %2465 = vmatpush.msra.mxu2 %v9167_v44  ;;  %2489 = vmatpush.msra.mxu3 %v6978_v28  ;;  %v9172_v28 = vld [vmem:[#allocation33_spill] sm:$0xff]  ;;  %v7342_v47 = vadd.f32 %v7174_v30, %v1052_v29  ;;  %v7360_v30 = vld [vmem:[%s9169_s9 + $0x60] sm:$0xff]  ;;  %v7477_v31 = vld [vmem:[%s9169_s9 + $0x130] sm:$0xff] }
 0x2c4   :  { %2498 = vmatpush.msrb.mxu0 %v9168_v36  ;;  %2522 = vmatpush.msrb.mxu1 %v6994_v4  ;;  %v7326_v4 = vld [vmem:[%s9169_s9 + $0x70] sm:$0xff]  ;;  %9182 = vst [vmem:[#allocation37_spill] sm:$0xff] %v7477_v31  ;;  %v1780_v36 = vadd.f32 %v7330_v37, %v7346_v45  ;;  %v7515_v37 = vld [vmem:[%s9169_s9 + $0x100] sm:$0xff] }
 0x2c5   :  { %2466 = vmatpush.msra.mxu2 %v9170_v23  ;;  %2490 = vmatpush.msra.mxu3 %v9171_v38  ;;  %v1099_v40 = vmax.f32 %v7342_v47, 0.0  ;;  %v1863_v35 = vpop.f32.mrf.mxu1  ;;  %v7487_v63 = vld [vmem:[%s9169_s9 + $0x30] sm:$0xff]  ;;  %v7496_v23 = vld [vmem:[%s9169_s9 + $0x108] sm:$0xff] }
 0x2c6   :  { %3579 = vmatmul.msk.f32.vlgmr.msra.gmra.mxu3 %vm1158_vm1, %v1100_v41  ;;  %2499 = vmatpush.msrb.mxu0 %v9172_v28  ;;  %9183 = vst [vmem:[#allocation16_spill] sm:$0xff] %v7496_v23  ;;  %v7508_v28 = vld [vmem:[%s9169_s9 + $0x28] sm:$0xff]  ;;  %v7591_v47 = vld [vmem:[%s9169_s9 + $0x1b0] sm:$0xff] }
 0x2c7   :  { %2523 = vmatpush.msrb.mxu1 %v7021_v2  ;;  %2564 = vmatpush.msrb.mxu3 %v7314_v10  ;;  %v7353_v2 = vld [vmem:[%s9175_s24] sm:$0x3] }
 0x2c8   :  { %2467 = vmatpush.msra.mxu2 %v9173_v53  ;;  %2500 = vmatpush.msrb.mxu0 %v9174_v51  ;;  %v7520_v53 = vld [vmem:[%s9169_s9 + $0x120] sm:$0xff]  ;;  %v1200_v51 = vadd.f32 %v7268_v49, %v7258_v6  ;;  %v7525_v45 = vperm.slane %v7353_v2, 0  ;;  %v7541_v6 = vld [vmem:[%s9169_s9 + $0x1d8] sm:$0xff]  ;;  %v1347_v49 = vadd.f32 %v7285_v22, %v7298_v7 }
 0x2c9   :  { %2524 = vmatpush.msrb.mxu1 %v7035_v15  ;;  %2565 = vmatpush.msrb.mxu3 %v7326_v4  ;;  %v7365_v15 = vperm.slane %v7353_v2, 1  ;;  %9185 = vst [vmem:[#allocation34_spill] sm:$0xff] %v7520_v53  ;;  %v1864_v2 = vadd.f32 %v1863_v35, %v7393_v55  ;;  %v7565_v22 = vld [vmem:[%s9169_s9 + $0x18] sm:$0xff]  ;;  %v7611_v35 = vld [vmem:[%s9169_s9 + $0xe8] sm:$0xff] }
 0x2ca   :  { %2468 = vmatpush.msra.mxu2 %v9176_v54  ;;  %2501 = vmatpush.msrb.mxu0 %v9177_v58  ;;  %v1945_v56 = vpop.f32.mrf.mxu0  ;;  %v7556_v58 = vld [vmem:[%s9169_s9 + $0x1b8] sm:$0xff]  ;;  %v1247_v7 = vadd.f32 %v7525_v45, %v1200_v51 }
 0x2cb   :  { %2525 = vmatpush.msrb.mxu1 %v7049_v57  ;;  %2566 = vmatpush.msrb.mxu3 %v7339_v43  ;;  %v7384_v57 = vld [vmem:[%s9169_s9 + $0x98] sm:$0xff]  ;;  %v1248_v61 = vadd.f32 %v7365_v15, %v1240_v46  ;;  %v1616_v44 = vadd.f32 %v1613_v9, %v7365_v15  ;;  %v7623_v9 = vld [vmem:[%s9169_s9 + $0x8] sm:$0xff] }
 0x2cc   :  { %2469 = vmatpush.msra.mxu2 %v9178_v24  ;;  %2502 = vmatpush.msrb.mxu0 %v9179_v18  ;;  %v1489_v18 = vadd.f32 %v7344_v12, %v7328_v5  ;;  %v7596_v12 = vld [vmem:[%s9169_s9 + $0x10] sm:$0xff]  ;;  %v7654_v51 = vld [vmem:[%s9169_s9 + $0xd8] sm:$0xff] }
 0x2cd   :  { %2526 = vmatpush.msrb.mxu1 %v7063_v32  ;;  %2567 = vmatpush.msrb.mxu3 %v7360_v30  ;;  %v1529_v32 = vadd.f32 %v7244_v42, %v7238_v8  ;;  %v1390_v8 = vadd.f32 %v1387_v21, %v1248_v61  ;;  %v7410_v42 = vpop.f32.mrf.mxu3  ;;  %v1925_v29 = vpop.f32.mrf.mxu1  ;;  %v1698_v38 = vadd.f32 %v1695_v26, %v1616_v44  ;;  %v7635_v44 = vld [vmem:[%s9169_s9 + $0xe0] sm:$0xff] }
 0x2ce   :  { %2470 = vmatpush.msra.mxu2 %v9180_v11  ;;  %2503 = vmatpush.msrb.mxu0 %v9181_v19  ;;  %v1946_v11 = vadd.f32 %v1945_v56, %v1925_v29  ;;  %v7582_v19 = vld [vmem:[%s9169_s9 + $0xf0] sm:$0xff]  ;;  %v7630_v56 = vld [vmem:[%s9169_s9 + $0x1c0] sm:$0xff] }
 0x2cf   :  { %2471 = vmatmul.f32.vlgmr.msra.gmra.mxu2 %v1099_v40  ;;  %2527 = vmatpush.msrb.mxu1 %v7077_v14  ;;  %v7417_v14 = vld [vmem:[%s9169_s9 + $0x48] sm:$0xff]  ;;  %v1532_v60 = vadd.f32 %v1529_v32, %v1390_v8  ;;  %v7527_v54 = vadd.f32 %v1780_v36, %v1698_v38  ;;  %v1867_v32 = vadd.f32 %v1864_v2, %v7365_v15  ;;  %v7642_v36 = vld [vmem:[%s9169_s9 + $0x1a0] sm:$0xff]  ;;  %v7661_v2 = vld [vmem:[%s9169_s9 + $0x198] sm:$0xff] }
 0x2d0   :  { %2568 = vmatpush.msrb.mxu3 %v7379_v39  ;;  %2596 = vmatpush.msrb.mxu2 %v7384_v57  ;;  %v7606_v8 = vld [vmem:[%s9169_s9 + $0x1c8] sm:$0xff]  ;;  %9187 = vst [vmem:[#allocation20_spill] sm:$0xff] %v7630_v56  ;;  %v7649_v38 = vld [vmem:[%s9169_s9] sm:$0xff] }
 0x2d1   :  { %2504 = vmatpush.msrb.mxu0 %v7029_v34  ;;  %2528 = vmatpush.msrb.mxu1 %v7091_v20  ;;  %v7431_v34 = vld [vmem:[%s9169_s9 + $0x40] sm:$0xff]  ;;  %v8588_v21 = vmax.f32 %v7527_v54, 0.0  ;;  %9186 = vst [vmem:[#allocation44_spill] sm:$0xff] %v7606_v8 }
 0x2d2   :  { %2569 = vmatpush.msrb.mxu3 %v7401_v59  ;;  %2597 = vmatpush.msrb.mxu2 %v7406_v16  ;;  %v7436_v20 = vld [vmem:[%s9169_s9 + $0x80] sm:$0xff]  ;;  %v2010_v24 = vpop.f32.mrf.mxu0 }
 0x2d3   :  { %2505 = vmatpush.msrb.mxu0 %v7043_v25  ;;  %2529 = vmatpush.msrb.mxu1 %v7105_v27  ;;  %v7445_v25 = vld [vmem:[%s9169_s9 + $0x138] sm:$0xff] }
 0x2d4   :  { %2570 = vmatpush.msrb.mxu3 %v7417_v14  ;;  %2598 = vmatpush.msrb.mxu2 %v7422_v17  ;;  %v7452_v27 = vld [vmem:[%s9169_s9 + $0x118] sm:$0xff] }
 0x2d5   :  { %2506 = vmatpush.msrb.mxu0 %v7057_v52  ;;  %2530 = vmatpush.msrb.mxu1 %v7119_v1  ;;  %v1534_v52 = vmax.f32 %v1532_v60, 0.0  ;;  %v7463_v1 = vpop.f32.mrf.mxu2  ;;  %v2030_v5 = vpop.f32.mrf.mxu1  ;;  %v7618_v60 = vld [vmem:[%s9169_s9 + $0x1a8] sm:$0xff] }
 0x2d6   :  { %2571 = vmatpush.msrb.mxu3 %v7431_v34  ;;  %2599 = vmatpush.msrb.mxu2 %v7436_v20  ;;  %v2031_v55 = vadd.f32 %v2030_v5, %v2010_v24  ;;  %v7678_v5 = vld [vmem:[%s9169_s9 + $0x190] sm:$0xff] }
 0x2d7   :  { %3580 = vmatmul.msk.f32.vlgmr.msrb.gmra.mxu1 %vm1158_vm1, %v1100_v41  ;;  %2507 = vmatpush.msrb.mxu0 %v7071_v48  ;;  %v7489_v41 = vpop.f32.mrf.mxu3  ;;  %v7501_v48 = vld [vmem:[%s9169_s9 + $0x128] sm:$0xff] }
 0x2d8   :  { %2664 = vmatpush.msra.mxu2 %v7445_v25  ;;  %2632 = vmatpush.msra.mxu1 %v7452_v27  ;;  %9184 = vst [vmem:[#allocation38_spill] sm:$0xff] %v7501_v48 }
 0x2d9   :  { %2572 = vmatpush.msrb.mxu3 %v7461_v50  ;;  %3581 = vmatmul.msk.f32.vlgmr.msrb.gmra.mxu2 %vm2560_vm2, %v1534_v52  ;;  %v1949_v52 = vadd.f32 %v1946_v11, %v1867_v32  ;;  %v7693_v32 = vld [vmem:[%s9169_s9 + $0x188] sm:$0xff] }
 0x2da   :  { %2633 = vmatpush.msra.mxu1 %v7472_v13  ;;  %2665 = vmatpush.msra.mxu2 %v7477_v31 }
 0x2db   :  { %2508 = vmatpush.msrb.mxu0 %v7085_v3  ;;  %2573 = vmatpush.msrb.mxu3 %v7487_v63  ;;  %v7534_v3 = vld [vmem:[%s9169_s9 + $0x20] sm:$0xff]  ;;  %v2034_v29 = vadd.f32 %v2031_v55, %v1949_v52  ;;  %v1573_v55 = vadd.f32 %v7391_v33, %v7410_v42  ;;  %v1655_v33 = vadd.f32 %v7489_v41, %v7463_v1 }
 0x2dc   :  { %2634 = vmatpush.msra.mxu1 %v7496_v23  ;;  %2666 = vmatpush.msra.mxu2 %v7501_v48  ;;  %v7709_v52 = vld [vmem:[%s9169_s9 + $0x180] sm:$0xff] }
 0x2dd   :  { %2509 = vmatpush.msrb.mxu0 %v7099_v62  ;;  %2574 = vmatpush.msrb.mxu3 %v7508_v28  ;;  %v7551_v62 = vld [vmem:[%s9169_s9 + $0xf8] sm:$0xff]  ;;  %v7558_v46 = vpop.f32.mrf.mxu2  ;;  %v7672_v11 = vmax.f32 %v2034_v29, 0.0  ;;  %v1615_v1 = vadd.f32 %v1573_v55, %v7525_v45  ;;  %v7753_v55 = vld [vmem:[%s9169_s9 + $0xa8] sm:$0xff] }
 0x2de   :  { %2635 = vmatpush.msra.mxu1 %v7515_v37  ;;  %2667 = vmatpush.msra.mxu2 %v7520_v53  ;;  %v7718_v29 = vld [vmem:[%s9169_s9 + $0xb8] sm:$0xff]  ;;  %v7737_v53 = vld [vmem:[%s9169_s9 + $0xb0] sm:$0xff] }
 0x2df   :  { %2510 = vmatpush.msrb.mxu0 %v7113_v0  ;;  %2575 = vmatpush.msrb.mxu3 %v7534_v3  ;;  %v7577_v0 = vld [vmem:[%s9169_s9 + $0x1d0] sm:$0xff]  ;;  %v7584_v61 = vpop.f32.mrf.mxu3  ;;  %v1697_v48 = vadd.f32 %v1655_v33, %v1615_v1  ;;  %v7762_v1 = vld [vmem:[%s9169_s9 + $0x168] sm:$0xff] }
 0x2e0   :  { %2729 = vmatpush.msrb.mxu2 %v7541_v6  ;;  %2511 = vmatmul.f32.vlgmr.msrb.gmra.mxu0 %v1099_v40  ;;  %v1389_v40 = vadd.f32 %v1347_v49, %v1247_v7  ;;  %v1740_v41 = vadd.f32 %v7558_v46, %v7584_v61  ;;  %v7744_v46 = vld [vmem:[%s9169_s9 + $0x170] sm:$0xff]  ;;  %v9190_v61 = vmax.f32 %v7527_v54, 0.0  ;;  %9191 = vst [vmem:[#allocation39_spill] sm:$0xff] %v7762_v1  ;;  %v7769_v54 = vld [vmem:[%s9169_s9 + $0xa0] sm:$0xff] }
 0x2e1   :  { %2636 = vmatpush.msra.mxu1 %v7551_v62  ;;  %2697 = vmatpush.msra.mxu0 %v7556_v58  ;;  %9189 = vst [vmem:[#allocation24_spill] sm:$0xff] %v7744_v46 }
 0x2e2   :  { %2576 = vmatpush.msrb.mxu3 %v7565_v22  ;;  %3602 = vmatmul.msk.f32.vlgmr.msra.gmra.mxu2 %vm2560_vm2, %v8588_v21  ;;  %v1531_v26 = vadd.f32 %v1489_v18, %v1389_v40  ;;  %v7670_v18 = vld [vmem:[%s9169_s9 + $0xd0] sm:$0xff]  ;;  %v7685_v40 = vld [vmem:[%s9169_s9 + $0xc8] sm:$0xff]  ;;  %v7755_v33 = vadd.f32 %v1740_v41, %v1697_v48  ;;  %v7776_v41 = vld [vmem:[%s9169_s9 + $0x160] sm:$0xff] }
 0x2e3   :  { %2730 = vmatpush.msrb.mxu2 %v7577_v0  ;;  %2637 = vmatpush.msra.mxu1 %v7582_v19 }
 0x2e4   :  { %2698 = vmatpush.msra.mxu0 %v7591_v47  ;;  %2577 = vmatpush.msrb.mxu3 %v7596_v12  ;;  %v1533_v24 = vmax.f32 %v1531_v26, 0.0  ;;  %v7702_v26 = vld [vmem:[%s9169_s9 + $0xc0] sm:$0xff] }
 0x2e5   :  { %2731 = vmatpush.msrb.mxu2 %v7606_v8  ;;  %2638 = vmatpush.msra.mxu1 %v7611_v35  ;;  %v1803_v49 = vpop.f32.mrf.mxu2 }
 0x2e6   :  { %2699 = vmatpush.msra.mxu0 %v7618_v60  ;;  %2578 = vmatpush.msrb.mxu3 %v7623_v9 }
 0x2e7   :  { %2732 = vmatpush.msrb.mxu2 %v7630_v56  ;;  %2639 = vmatpush.msra.mxu1 %v7635_v44  ;;  %v1823_v7 = vpop.f32.mrf.mxu3 }
 0x2e8   :  { %2700 = vmatpush.msra.mxu0 %v7642_v36  ;;  %2579 = vmatpush.msrb.mxu3 %v7649_v38  ;;  %v1824_v31 = vadd.f32 %v1823_v7, %v1803_v49  ;;  %v2094_v7 = vpop.f32.mrf.mxu1 }
 0x2e9   :  { %2739 = vmatpush.msra.mxu2 %v7314_v10  ;;  %2640 = vmatpush.msra.mxu1 %v7654_v51 }
 0x2ea   :  { %2580 = vmatmul.f32.vlgmr.msrb.gmra.mxu3 %v1533_v24  ;;  %2701 = vmatpush.msra.mxu0 %v7661_v2  ;;  %v7725_v24 = vld [vmem:[%s9169_s9 + $0x178] sm:$0xff] }
 0x2eb   :  { %2740 = vmatpush.msra.mxu2 %v7326_v4  ;;  %2771 = vmatpush.msra.mxu3 %v7384_v57  ;;  %9188 = vst [vmem:[#allocation71_spill] sm:$0xff] %v7725_v24 }
 0x2ec   :  { %3623 = vmatmul.msk.f32.vlgmr.msrb.gmra.mxu2 %vm2560_vm2, %v7672_v11  ;;  %2641 = vmatpush.msra.mxu1 %v7670_v18 }
 0x2ed   :  { %2702 = vmatpush.msra.mxu0 %v7678_v5  ;;  %2741 = vmatpush.msra.mxu2 %v7339_v43  ;;  %v1905_v42 = vpop.f32.mrf.mxu2 }
 0x2ee   :  { %2772 = vmatpush.msra.mxu3 %v7406_v16  ;;  %2642 = vmatpush.msra.mxu1 %v7685_v40 }
 0x2ef   :  { %2703 = vmatpush.msra.mxu0 %v7693_v32  ;;  %2742 = vmatpush.msra.mxu2 %v7360_v30  ;;  %v1885_v21 = vpop.f32.mrf.mxu3 }
 0x2f0   :  { %2773 = vmatpush.msra.mxu3 %v7422_v17  ;;  %2643 = vmatpush.msra.mxu1 %v7702_v26  ;;  %v1906_v49 = vadd.f32 %v1905_v42, %v1885_v21  ;;  %v1866_v21 = vadd.f32 %v1824_v31, %v7525_v45  ;;  %v7804_v31 = vld [vmem:[%s9169_s9 + $0x148] sm:$0xff] }
 0x2f1   :  { %2704 = vmatpush.msra.mxu0 %v7709_v52  ;;  %2743 = vmatpush.msra.mxu2 %v7379_v39 }
 0x2f2   :  { %2774 = vmatpush.msra.mxu3 %v7436_v20  ;;  %2644 = vmatpush.msra.mxu1 %v7718_v29 }
 0x2f3   :  { %2705 = vmatpush.msra.mxu0 %v7725_v24  ;;  %2744 = vmatpush.msra.mxu2 %v7401_v59 }
 0x2f4   :  { %2780 = vmatpush.msrb.mxu3 %v7452_v27  ;;  %2645 = vmatpush.msra.mxu1 %v7737_v53 }
 0x2f5   :  { %3624 = vmatmul.msk.f32.vlgmr.msra.gmra.mxu3 %vm2560_vm2, %v9190_v61  ;;  %2706 = vmatpush.msra.mxu0 %v7744_v46  ;;  %v1970_v48 = vpop.f32.mrf.mxu2  ;;  %v2114_v61 = vpop.f32.mrf.mxu0  ;;  %v1784_v46 = vmax.f32 %v7755_v33, 0.0  ;;  %v7795_v33 = vld [vmem:[%s9169_s9 + $0x150] sm:$0xff] }
 0x2f6   :  { %2781 = vmatpush.msrb.mxu3 %v7472_v13  ;;  %2745 = vmatpush.msra.mxu2 %v7417_v14 }
 0x2f7   :  { %2646 = vmatpush.msra.mxu1 %v7753_v55  ;;  %2707 = vmatpush.msra.mxu0 %v7762_v1  ;;  %v1990_v24 = vpop.f32.mrf.mxu3  ;;  %v1948_v1 = vadd.f32 %v1906_v49, %v1866_v21  ;;  %v2196_v49 = vpop.f32.mrf.mxu1 }
 0x2f8   :  { %2782 = vmatpush.msrb.mxu3 %v7496_v23  ;;  %2746 = vmatpush.msra.mxu2 %v7431_v34  ;;  %v7786_v23 = vld [vmem:[%s9169_s9 + $0x158] sm:$0xff]  ;;  %v1991_v42 = vadd.f32 %v1990_v24, %v1970_v48  ;;  %v7813_v48 = vld [vmem:[%s9169_s9 + $0x140] sm:$0xff] }
 0x2f9   :  { %2647 = vmatpush.msra.mxu1 %v7769_v54  ;;  %2708 = vmatpush.msra.mxu0 %v7776_v41 }
 0x2fa   :  { %2783 = vmatpush.msrb.mxu3 %v7515_v37  ;;  %2747 = vmatpush.msra.mxu2 %v7461_v50  ;;  %v2033_v24 = vadd.f32 %v1991_v42, %v1948_v1  ;;  %v2115_v42 = vadd.f32 %v2114_v61, %v2094_v7 }
 0x2fb   :  { %2648 = vmatmul.f32.vlgmr.msra.gmra.mxu1 %v1784_v46  ;;  %2709 = vmatpush.msra.mxu0 %v7786_v23 }
 0x2fc   :  { %2784 = vmatpush.msrb.mxu3 %v7551_v62  ;;  %2856 = vmatpush.msrb.mxu1 %v7541_v6  ;;  %v7819_v1 = vmax.f32 %v2033_v24, 0.0  ;;  %v2118_v7 = vadd.f32 %v2115_v42, %v7365_v15  ;;  %v2996_v42 = vld [vmem:[%s9201_s5 + $0x10] sm:$0xff] }
 0x2fd   :  { %2748 = vmatpush.msra.mxu2 %v7487_v63  ;;  %2710 = vmatpush.msra.mxu0 %v7795_v33  ;;  %v2176_v21 = vpop.f32.mrf.mxu0 }
 0x2fe   :  { %2785 = vmatpush.msrb.mxu3 %v7582_v19  ;;  %2857 = vmatpush.msrb.mxu1 %v7577_v0 }
 0x2ff   :  { %2749 = vmatpush.msra.mxu2 %v7508_v28  ;;  %2711 = vmatpush.msra.mxu0 %v7804_v31 }
 0x300   :  { %2786 = vmatpush.msrb.mxu3 %v7611_v35  ;;  %2858 = vmatpush.msrb.mxu1 %v7606_v8  ;;  %v2054_v8 = vpop.f32.mrf.mxu3 }
 0x301   :  { %2750 = vmatpush.msra.mxu2 %v7534_v3  ;;  %2712 = vmatpush.msra.mxu0 %v7813_v48 }
 0x302   :  { %2787 = vmatpush.msrb.mxu3 %v7635_v44  ;;  %2859 = vmatpush.msrb.mxu1 %v7630_v56  ;;  %v2197_v56 = vadd.f32 %v2196_v49, %v2176_v21  ;;  %v9198_v49 = vld [vmem:[#allocation34_spill] sm:$0xff] }
 0x303   :  { %2751 = vmatpush.msra.mxu2 %v7565_v22  ;;  %2713 = vmatmul.f32.vlgmr.msra.gmra.mxu0 %v7819_v1 }
 0x304   :  { %2866 = vmatpush.msra.mxu1 %v7314_v10  ;;  %2788 = vmatpush.msrb.mxu3 %v7654_v51  ;;  %v2261_v10 = vpop.f32.mrf.mxu1  ;;  %v2200_v61 = vadd.f32 %v2197_v56, %v2118_v7  ;;  %v3642_v7 = vld [vmem:[%s9201_s5 + $0xb8] sm:$0xff] }
 0x305   :  { %2824 = vmatpush.msrb.mxu0 %v7556_v58  ;;  %2752 = vmatpush.msra.mxu2 %v7596_v12  ;;  %v2281_v24 = vpop.f32.mrf.mxu0 }
 0x306   :  { %2867 = vmatpush.msra.mxu1 %v7326_v4  ;;  %2789 = vmatpush.msrb.mxu3 %v7670_v18  ;;  %v2074_v4 = vpop.f32.mrf.mxu2 }
 0x307   :  { %2825 = vmatpush.msrb.mxu0 %v7591_v47  ;;  %2753 = vmatpush.msra.mxu2 %v7623_v9 }
 0x308   :  { %2868 = vmatpush.msra.mxu1 %v7339_v43  ;;  %2790 = vmatpush.msrb.mxu3 %v7685_v40  ;;  %v2282_v43 = vadd.f32 %v2281_v24, %v2261_v10  ;;  %v2995_v10 = vld [vmem:[%s9201_s5 + $0x8] sm:$0xff]  ;;  %v2994_v24 = vld [vmem:[%s9201_s5] sm:$0xff] }
 0x309   :  { %2826 = vmatpush.msrb.mxu0 %v7618_v60  ;;  %2754 = vmatpush.msra.mxu2 %v7649_v38 }
 0x30a   :  { %2869 = vmatpush.msra.mxu1 %v7360_v30  ;;  %2755 = vmatmul.f32.vlgmr.msra.gmra.mxu2 %v1784_v46  ;;  %v7847_v30 = vadd.f32 %v2282_v43, %v2200_v61  ;;  %v9197_v46 = vld [vmem:[#allocation39_spill] sm:$0xff]  ;;  %v3641_v43 = vld [vmem:[%s9201_s5 + $0xb0] sm:$0xff] }
 0x30b   :  { %2791 = vmatpush.msrb.mxu3 %v7702_v26  ;;  %2827 = vmatpush.msrb.mxu0 %v7642_v36  ;;  %v3640_v61 = vld [vmem:[%s9201_s5 + $0xa8] sm:$0xff] }
 0x30c   :  { %2898 = vmatpush.msrb.mxu2 %v7384_v57  ;;  %2870 = vmatpush.msra.mxu1 %v7379_v39  ;;  %v2156_v39 = vpop.f32.mrf.mxu3 }
 0x30d   :  { %2792 = vmatpush.msrb.mxu3 %v7718_v29  ;;  %2828 = vmatpush.msrb.mxu0 %v7661_v2 }
 0x30e   :  { %2899 = vmatpush.msrb.mxu2 %v7406_v16  ;;  %2871 = vmatpush.msra.mxu1 %v7401_v59  ;;  %v2136_v57 = vpop.f32.mrf.mxu2  ;;  %v2287_v59 = vmax.f32 %v7847_v30, 0.0  ;;  %v9192_v16 = vld [vmem:[#allocation71_spill] sm:$0xff] }
 0x30f   :  { %2793 = vmatpush.msrb.mxu3 %v7737_v53  ;;  %2829 = vmatpush.msrb.mxu0 %v7678_v5 }
 0x310   :  { %2900 = vmatpush.msrb.mxu2 %v7422_v17  ;;  %2872 = vmatpush.msra.mxu1 %v7417_v14  ;;  %v9193_v14 = vld [vmem:[#allocation16_spill] sm:$0xff]  ;;  %v2075_v17 = vadd.f32 %v2074_v4, %v2054_v8 }
 0x311   :  { %2794 = vmatpush.msrb.mxu3 %v7753_v55  ;;  %2830 = vmatpush.msrb.mxu0 %v7693_v32 }
 0x312   :  { %2901 = vmatpush.msrb.mxu2 %v7436_v20  ;;  %2873 = vmatpush.msra.mxu1 %v7431_v34  ;;  %v9194_v34 = vld [vmem:[#allocation37_spill] sm:$0xff]  ;;  %v9195_v20 = vld [vmem:[#allocation24_spill] sm:$0xff] }
 0x313   :  { %2795 = vmatpush.msrb.mxu3 %v7769_v54  ;;  %2831 = vmatpush.msrb.mxu0 %v7709_v52 }
 0x314   :  { %2907 = vmatpush.msra.mxu2 %v7452_v27  ;;  %2796 = vmatmul.f32.vlgmr.msrb.gmra.mxu3 %v7819_v1  ;;  %v2221_v27 = vpop.f32.mrf.mxu3 }
 0x315   :  { %3627 = vmatmul.msk.f32.vlgmr.msrb.gmra.mxu2 %vm2560_vm2, %v7672_v11  ;;  %2874 = vmatpush.msra.mxu1 %v7461_v50  ;;  %v2157_v50 = vadd.f32 %v2156_v39, %v2136_v57  ;;  %v3639_v39 = vld [vmem:[%s9201_s5 + $0xa0] sm:$0xff]  ;;  %v3638_v57 = vld [vmem:[%s9201_s5 + $0x98] sm:$0xff] }
 0x316   :  { %2908 = vmatpush.msra.mxu2 %v7472_v13  ;;  %2812 = vmatpush.msra.mxu3 %v7445_v25  ;;  %v2241_v56 = vpop.f32.mrf.mxu2  ;;  %v9196_v13 = vld [vmem:[#allocation38_spill] sm:$0xff] }
 0x317   :  { %2832 = vmatpush.msrb.mxu0 %v9192_v16  ;;  %3626 = vmatmul.msk.f32.vlgmr.msrb.gmra.mxu1 %vm2560_vm2, %v2287_v59  ;;  %v2242_v8 = vadd.f32 %v2241_v56, %v2221_v27 }
 0x318   :  { %2875 = vmatpush.msra.mxu1 %v7487_v63  ;;  %2909 = vmatpush.msra.mxu2 %v9193_v14  ;;  %v2117_v63 = vadd.f32 %v2075_v17, %v7525_v45 }
 0x319   :  { %2813 = vmatpush.msra.mxu3 %v9194_v34  ;;  %2833 = vmatpush.msrb.mxu0 %v9195_v20 }
 0x31a   :  { %2876 = vmatpush.msra.mxu1 %v7508_v28  ;;  %2910 = vmatpush.msra.mxu2 %v7515_v37  ;;  %v2199_v28 = vadd.f32 %v2157_v50, %v2117_v63 }
 0x31b   :  { %2814 = vmatpush.msra.mxu3 %v9196_v13  ;;  %2834 = vmatpush.msrb.mxu0 %v9197_v46 }
 0x31c   :  { %2877 = vmatpush.msra.mxu1 %v7534_v3  ;;  %2911 = vmatpush.msra.mxu2 %v7551_v62  ;;  %v2284_v37 = vadd.f32 %v2242_v8, %v2199_v28  ;;  %v9200_v3 = vld [vmem:[#allocation20_spill] sm:$0xff]  ;;  %v2325_v62 = vpop.f32.mrf.mxu3  ;;  %v3635_v8 = vld [vmem:[%s9201_s5 + $0x80] sm:$0xff]  ;;  %v3634_v28 = vld [vmem:[%s9201_s5 + $0x78] sm:$0xff] }
 0x31d   :  { %2815 = vmatpush.msra.mxu3 %v9198_v49  ;;  %2835 = vmatpush.msrb.mxu0 %v7776_v41 }
 0x31e   :  { %3625 = vmatmul.msk.f32.vlgmr.msra.gmra.mxu3 %vm2560_vm2, %v7672_v11  ;;  %2878 = vmatpush.msra.mxu1 %v7565_v22 }
 0x31f   :  { %2912 = vmatpush.msra.mxu2 %v7582_v19  ;;  %2836 = vmatpush.msrb.mxu0 %v7786_v23  ;;  %v2365_v19 = vpop.f32.mrf.mxu1 }
 0x320   :  { %2939 = vmatpush.msrb.mxu3 %v7445_v25  ;;  %2879 = vmatpush.msra.mxu1 %v7596_v12  ;;  %v2286_v25 = vmax.f32 %v2284_v37, 0.0 }
 0x321   :  { %2913 = vmatpush.msra.mxu2 %v7611_v35  ;;  %2837 = vmatpush.msrb.mxu0 %v7795_v33  ;;  %v3005_v35 = vld [vmem:[%s9201_s5 + $0x58] sm:$0xff] }
 0x322   :  { %2940 = vmatpush.msrb.mxu3 %v9194_v34  ;;  %2880 = vmatpush.msra.mxu1 %v7623_v9  ;;  %v7989_v34 = vld [vmem:[%s9202_s25] ss:$0 sm:$0xff] }
 0x323   :  { %2914 = vmatpush.msra.mxu2 %v7635_v44  ;;  %2838 = vmatpush.msrb.mxu0 %v7804_v31 }
 0x324   :  { %2941 = vmatpush.msrb.mxu3 %v9196_v13  ;;  %2881 = vmatpush.msra.mxu1 %v7649_v38 }
 0x325   :  { %2915 = vmatpush.msra.mxu2 %v7654_v51  ;;  %2839 = vmatpush.msrb.mxu0 %v7813_v48 }
 0x326   :  { %2882 = vmatmul.f32.vlgmr.msra.gmra.mxu1 %v7819_v1  ;;  %2942 = vmatpush.msrb.mxu3 %v9198_v49 }
 0x327   :  { %2840 = vmatmul.f32.vlgmr.msrb.gmra.mxu0 %v2286_v25  ;;  %2916 = vmatpush.msra.mxu2 %v7670_v18 }
 0x328   :  { %3628 = vmatmul.msk.f32.vlgmr.msrb.gmra.mxu3 %vm2560_vm2, %v2287_v59  ;;  %3013 = vmatpush.msra.mxu0 %v3005_v35 }
 0x329   :  { %2917 = vmatpush.msra.mxu2 %v7685_v40  ;;  %2951 = vmatpush.msra.mxu3 %v7556_v58 }
 0x32a   :  { %3053 = vmatpush.msrb.mxu1 %v3642_v7  ;;  %v3110_v7 = vld [vmem:[%s8175_s11 + $0x10] sm:$0xff] }
 0x32b   :  { %2918 = vmatpush.msra.mxu2 %v7702_v26  ;;  %2952 = vmatpush.msra.mxu3 %v7591_v47  ;;  %v2345_v47 = vpop.f32.mrf.mxu0  ;;  %v3001_v26 = vld [vmem:[%s9201_s5 + $0x38] sm:$0xff] }
 0x32c   :  { %3054 = vmatpush.msrb.mxu1 %v3641_v43  ;;  %v3109_v43 = vld [vmem:[%s8175_s11 + $0x8] sm:$0xff] }
 0x32d   :  { %2919 = vmatpush.msra.mxu2 %v7718_v29  ;;  %2953 = vmatpush.msra.mxu3 %v7618_v60 }
 0x32e   :  { %3055 = vmatpush.msrb.mxu1 %v3640_v61  ;;  %v3108_v61 = vld [vmem:[%s8175_s11] sm:$0xff] }
 0x32f   :  { %2920 = vmatpush.msra.mxu2 %v7737_v53  ;;  %2954 = vmatpush.msra.mxu3 %v7642_v36  ;;  %v9199_v53 = vld [vmem:[#allocation44_spill] sm:$0xff]  ;;  %v2387_v58 = vpop.f32.mrf.mxu3  ;;  %v3003_v36 = vld [vmem:[%s9201_s5 + $0x48] sm:$0xff] }
 0x330   :  { %3056 = vmatpush.msrb.mxu1 %v3639_v39 }
 0x331   :  { %2921 = vmatpush.msra.mxu2 %v7753_v55  ;;  %2955 = vmatpush.msra.mxu3 %v7661_v2  ;;  %v3002_v2 = vld [vmem:[%s9201_s5 + $0x40] sm:$0xff] }
 0x332   :  { %3057 = vmatpush.msrb.mxu1 %v3638_v57 }
 0x333   :  { %2922 = vmatpush.msra.mxu2 %v7769_v54  ;;  %2956 = vmatpush.msra.mxu3 %v7678_v5 }
 0x334   :  { %2923 = vmatmul.f32.vlgmr.msra.gmra.mxu2 %v2286_v25  ;;  %v3633_v25 = vld [vmem:[%s9201_s5 + $0x70] sm:$0xff] }
 0x335   :  { %2957 = vmatpush.msra.mxu3 %v7693_v32  ;;  %2983 = vmatpush.msrb.mxu2 %v7541_v6  ;;  %v2305_v6 = vpop.f32.mrf.mxu2 }
 0x337   :  { %2958 = vmatpush.msra.mxu3 %v7709_v52  ;;  %2984 = vmatpush.msrb.mxu2 %v7577_v0  ;;  %v2326_v0 = vadd.f32 %v2325_v62, %v2305_v6  ;;  %v3000_v52 = vld [vmem:[%s9201_s5 + $0x30] sm:$0xff] }
 0x339   :  { %2959 = vmatpush.msra.mxu3 %v9192_v16  ;;  %2985 = vmatpush.msrb.mxu2 %v9199_v53  ;;  %v2368_v60 = vadd.f32 %v2326_v0, %v7525_v45  ;;  %v2366_v45 = vadd.f32 %v2365_v19, %v2345_v47  ;;  %v3637_v16 = vld [vmem:[%s9201_s5 + $0x90] sm:$0xff]  ;;  %v3632_v53 = vld [vmem:[%s9201_s5 + $0x68] sm:$0xff] }
 0x33a   :  { %v2427_v18 = vpop.f32.mrf.mxu1  ;;  %v2447_v11 = vpop.f32.mrf.mxu0  ;;  %3058 = vmatpush.msrb.mxu1 %v3637_v16  ;;  %v3653_v19 = vld [vmem:[%s9201_s5 + $0x108] sm:$0xff] }
 0x33b   :  { %2960 = vmatpush.msra.mxu3 %v9195_v20  ;;  %2986 = vmatpush.msrb.mxu2 %v9200_v3  ;;  %v2448_v32 = vadd.f32 %v2447_v11, %v2427_v18  ;;  %v2369_v29 = vadd.f32 %v2366_v45, %v7365_v15  ;;  %v2997_v15 = vld [vmem:[%s9201_s5 + $0x18] sm:$0xff]  ;;  %v3636_v20 = vld [vmem:[%s9201_s5 + $0x88] sm:$0xff]  ;;  %v3631_v3 = vld [vmem:[%s9201_s5 + $0x60] sm:$0xff] }
 0x33c   :  { %3059 = vmatpush.msrb.mxu1 %v3636_v20  ;;  %v3651_v18 = vld [vmem:[%s9201_s5 + $0xf8] sm:$0xff]  ;;  %v3650_v11 = vld [vmem:[%s9201_s5 + $0xf0] sm:$0xff]  ;;  %v3668_v20 = vld [vmem:[%s8174_s12] ss:$0 sm:$0xff] }
 0x33d   :  { %2961 = vmatpush.msra.mxu3 %v9197_v46  ;;  %v2407_v22 = vpop.f32.mrf.mxu2  ;;  %v3647_v45 = vld [vmem:[%s9201_s5 + $0xd8] sm:$0xff] }
 0x33e   :  { %v2408_v12 = vadd.f32 %v2407_v22, %v2387_v58  ;;  %3060 = vmatpush.msrb.mxu1 %v3635_v8  ;;  %v3655_v58 = vld [vmem:[%s9201_s5 + $0x118] sm:$0xff]  ;;  %v3654_v22 = vld [vmem:[%s9201_s5 + $0x110] sm:$0xff] }
 0x33f   :  { %2962 = vmatpush.msra.mxu3 %v7776_v41  ;;  %v2999_v41 = vld [vmem:[%s9201_s5 + $0x28] sm:$0xff]  ;;  %3090 = vmatpush.msra.mxu2 %v3655_v58  ;;  %v3238_v58 = vld [vmem:[%s8178_s17] sm:$0xf] }
 0x340   :  { %v2450_v38 = vadd.f32 %v2408_v12, %v2368_v60  ;;  %3061 = vmatpush.msrb.mxu1 %v3634_v28  ;;  %v3652_v12 = vld [vmem:[%s9201_s5 + $0x100] sm:$0xff] }
 0x341   :  { %2963 = vmatpush.msra.mxu3 %v7786_v23  ;;  %v3004_v23 = vld [vmem:[%s9201_s5 + $0x50] sm:$0xff]  ;;  %3091 = vmatpush.msra.mxu2 %v3654_v22  ;;  %v3186_v22 = vld [vmem:[%s8179_s16] sm:$0x3f] }
 0x342   :  { %3014 = vmatpush.msra.mxu0 %v3004_v23  ;;  %3062 = vmatpush.msrb.mxu1 %v3633_v25 }
 0x343   :  { %2964 = vmatpush.msra.mxu3 %v7795_v33  ;;  %v2451_v33 = vadd.f32 %v2448_v32, %v2369_v29  ;;  %3092 = vmatpush.msra.mxu2 %v3653_v19  ;;  %v3646_v32 = vld [vmem:[%s9201_s5 + $0xd0] sm:$0xff] }
 0x344   :  { %3015 = vmatpush.msra.mxu0 %v3003_v36  ;;  %3063 = vmatpush.msrb.mxu1 %v3632_v53  ;;  %v3184_v19 = vld [vmem:[%s8180_s15 + $0x10] sm:$0xff] }
 0x345   :  { %2965 = vmatpush.msra.mxu3 %v7804_v31  ;;  %3093 = vmatpush.msra.mxu2 %v3652_v12  ;;  %v3180_v12 = vld [vmem:[%s8182_s1] sm:$0x3] }
 0x346   :  { %3016 = vmatpush.msra.mxu0 %v3002_v2  ;;  %3064 = vmatpush.msrb.mxu1 %v3631_v3 }
 0x347   :  { %2966 = vmatpush.msra.mxu3 %v7813_v48  ;;  %v2998_v48 = vld [vmem:[%s9201_s5 + $0x20] sm:$0xff]  ;;  %3094 = vmatpush.msra.mxu2 %v3651_v18 }
 0x348   :  { %3017 = vmatpush.msra.mxu0 %v3001_v26  ;;  %v3645_v26 = vld [vmem:[%s9201_s5 + $0xc8] sm:$0xff] }
 0x349   :  { %v2492_v9 = vpop.f32.mrf.mxu3  ;;  %3095 = vmatpush.msra.mxu2 %v3650_v11 }
 0x34a   :  { %3018 = vmatpush.msra.mxu0 %v3000_v52  ;;  %v3644_v52 = vld [vmem:[%s9201_s5 + $0xc0] sm:$0xff] }
 0x34c   :  { %3019 = vmatpush.msra.mxu0 %v2999_v41 }
 0x34e   :  { %3020 = vmatpush.msra.mxu0 %v2998_v48 }
 0x350   :  { %3021 = vmatpush.msra.mxu0 %v2997_v15 }
 0x352   :  { %v2472_v44 = vpop.f32.mrf.mxu2  ;;  %3022 = vmatpush.msra.mxu0 %v2996_v42 }
 0x353   :  { %v2493_v51 = vadd.f32 %v2492_v9, %v2472_v44 }
 0x354   :  { %v2532_v55 = vpop.f32.mrf.mxu1  ;;  %3023 = vmatpush.msra.mxu0 %v2995_v10 }
 0x355   :  { %v2535_v5 = vadd.f32 %v2493_v51, %v2450_v38 }
 0x356   :  { %3024 = vmatpush.msra.mxu0 %v2994_v24 }
 0x357   :  { %v2537_v40 = vmax.f32 %v2535_v5, 0.0  ;;  %v3649_v5 = vld [vmem:[%s9201_s5 + $0xe8] sm:$0xff] }
 0x358   :  { %3096 = vmatpush.msra.mxu2 %v3649_v5  ;;  %3658 = vmatpush.msk.msrb.mxu0 %vm3191_vm6, %v3186_v22 }
 0x359   :  { %2967 = vmatmul.f32.vlgmr.msra.gmra.mxu3 %v2537_v40  ;;  %v3648_v40 = vld [vmem:[%s9201_s5 + $0xe0] sm:$0xff] }
 0x35a   :  { %3097 = vmatpush.msra.mxu2 %v3648_v40 }
 0x35c   :  { %v2601_v4 = vpop.f32.mrf.mxu2  ;;  %3098 = vmatpush.msra.mxu2 %v3647_v45 }
 0x35d   :  { %v2512_v54 = vpop.f32.mrf.mxu0 }
 0x35e   :  { %v2533_v31 = vadd.f32 %v2532_v55, %v2512_v54  ;;  %3099 = vmatpush.msra.mxu2 %v3646_v32  ;;  %v3669_v32 = vld [vmem:[%s8176_s13] ss:$0 sm:$0xff] }
 0x360   :  { %v2536_v21 = vadd.f32 %v2533_v31, %v2451_v33  ;;  %3100 = vmatpush.msra.mxu2 %v3645_v26 }
 0x362   :  { %v2538_v1 = vmax.f32 %v2536_v21, 0.0  ;;  %3101 = vmatpush.msra.mxu2 %v3644_v52  ;;  %v3670_v52 = vld [vmem:[%s8177_s14] ss:$0 sm:$0xff] }
 0x364   :  { %3629 = vmatmul.msk.f32.vlgmr.msrb.gmra.mxu2 %vm2560_vm2, %v2538_v1 }
 0x365   :  { %v2669_v30 = vpop.f32.mrf.mxu2 }
 0x36d   :  { %v2581_v59 = vpop.f32.mrf.mxu3 }
 0x36e   :  { %v2602_v17 = vadd.f32 %v2601_v4, %v2581_v59  ;;  %v3111_v4 = vld [vmem:[%s8175_s11 + $0x18] sm:$0xff] }
 0x36f   :  { %v2734_v50 = vpop.f32.mrf.mxu2  ;;  %3131 = vmatpush.msrb.mxu3 %v3111_v4  ;;  %v3313_v4 = vld [vmem:[%s8186_s21 + $0x18] sm:$0xff] }
 0x370   :  { %v2607_v56 = vadd.f32 %v7989_v34, %v2602_v17 }
 0x371   :  { %3132 = vmatpush.msrb.mxu3 %v3110_v7 }
 0x373   :  { %3133 = vmatpush.msrb.mxu3 %v3109_v43 }
 0x375   :  { %3134 = vmatpush.msrb.mxu3 %v3108_v61 }
 0x377   :  { %3661 = vmatpush.msk.msra.mxu3 %vm3243_vm5, %v3238_v58 }
 0x378   :  { %v2649_v14 = vpop.f32.mrf.mxu1  ;;  %v2776_v62 = vpop.f32.mrf.mxu3 }
 0x379   :  { %v2670_v27 = vadd.f32 %v2669_v30, %v2649_v14  ;;  %v3667_v30 = vld [vmem:[%s8173_s10] ss:$0 sm:$0xff] }
 0x37b   :  { %v2672_v46 = vadd.f32 %v2670_v27, %v2607_v56 }
 0x380   :  { %v2714_v13 = vpop.f32.mrf.mxu0 }
 0x381   :  { %v2735_v63 = vadd.f32 %v2734_v50, %v2714_v13  ;;  %v3848_v13 = vmov 32.0  }
 0x382   :  { %3674 = vrcp.f32 %v3848_v13  ;;  %v3673_v13 = vld [vmem:[%s8187_s22] ss:$0 sm:$0xff] }
 0x383   :  { %v2737_v49 = vadd.f32 %v2735_v63, %v2672_v46 }
 0x385   :  { %v2738_v37 = vmax.f32 %v2737_v49, 0.0 }
 0x387   :  { %3630 = vmatmul.msk.f32.vlgmr.msra.gmra.mxu0 %vm1158_vm1, %v2738_v37 }
 0x388   :  { %v3675_v46 = vpop.eup %3674 }
 0x389   :  { %v3144_v63 = vmul.f32 32.0, %v3675_v46  ;;  %vm3148_vm4 = vweird.f32 %v3675_v46 }
 0x38b   :  { %v3145_v8 = vsub.f32 1.0, %v3144_v63 }
 0x38d   :  { %v2756_v0 = vpop.f32.mrf.mxu2  ;;  %v3146_v49 = vmul.f32 %v3675_v46, %v3145_v8 }
 0x38e   :  { %v2777_v47 = vadd.f32 %v2776_v62, %v2756_v0  ;;  %v3185_v0 = vld [vmem:[%s8180_s15 + $0x18] sm:$0xff] }
 0x38f   :  { %v3147_v28 = vadd.f32 %v3675_v46, %v3146_v49  ;;  %3230 = vmatpush.msra.mxu1 %v3185_v0  ;;  %3659 = vmatmul.msk.f32.vlgmr.msrb.gmra.mxu0 %vm3187_vm8, %v3180_v12 }
 0x390   :  { %v2779_v23 = vadd.f32 %v7989_v34, %v2777_v47  ;;  %v3181_v47 = vld [vmem:[%s8181_s2] sm:$0x3] }
 0x391   :  { %v3149_v37 = vsel %vm3148_vm4, %v3675_v46, %v3147_v28  ;;  %3231 = vmatpush.msra.mxu1 %v3184_v19 }
 0x394   :  { %v2861_v9 = vpop.f32.mrf.mxu1 }
 0x397   :  { %v2797_v6 = vpop.f32.mrf.mxu3 }
 0x398   :  { %v2903_v29 = vpop.f32.mrf.mxu2 }
 0x3a1   :  { %v2817_v35 = vpop.f32.mrf.mxu3 }
 0x3a2   :  { %v2818_v60 = vadd.f32 %v2817_v35, %v2797_v6 }
 0x3a3   :  { %v2883_v55 = vpop.f32.mrf.mxu1 }
 0x3a4   :  { %v2820_v44 = vadd.f32 %v2818_v60, %v2779_v23  ;;  %v2841_v36 = vpop.f32.mrf.mxu0  ;;  %v2904_v33 = vadd.f32 %v2903_v29, %v2883_v55  ;;  %v3183_v23 = vld [vmem:[%s8180_s15 + $0x8] sm:$0xff] }
 0x3a5   :  { %v2862_v38 = vadd.f32 %v2861_v9, %v2841_v36  ;;  %v3182_v9 = vld [vmem:[%s8180_s15] sm:$0xff]  ;;  %3232 = vmatpush.msra.mxu1 %v3183_v23  ;;  %v3281_v36 = vld [vmem:[%s8183_s19 + $0x38] sm:$0xff] }
 0x3a6   :  { %v2906_v48 = vadd.f32 %v7989_v34, %v2904_v33  ;;  %3297 = vmatpush.msra.mxu0 %v3281_v36  ;;  %v3278_v33 = vld [vmem:[%s8183_s19 + $0x20] sm:$0xff] }
 0x3a7   :  { %v2864_v51 = vadd.f32 %v2862_v38, %v2820_v44  ;;  %v3280_v38 = vld [vmem:[%s8183_s19 + $0x30] sm:$0xff]  ;;  %3233 = vmatpush.msra.mxu1 %v3182_v9 }
 0x3a8   :  { %3298 = vmatpush.msra.mxu0 %v3280_v38 }
 0x3a9   :  { %v2865_v2 = vmax.f32 %v2864_v51, 0.0  ;;  %v3279_v51 = vld [vmem:[%s8183_s19 + $0x28] sm:$0xff] }
 0x3aa   :  { %3299 = vmatpush.msra.mxu0 %v3279_v51 }
 0x3ab   :  { %3643 = vmatmul.msk.f32.vlgmr.msrb.gmra.mxu1 %vm1158_vm1, %v2865_v2  ;;  %v2944_v54 = vpop.f32.mrf.mxu3 }
 0x3ac   :  { %3300 = vmatpush.msra.mxu0 %v3278_v33 }
 0x3b7   :  { %v2924_v41 = vpop.f32.mrf.mxu2 }
 0x3b8   :  { %v2945_v31 = vadd.f32 %v2944_v54, %v2924_v41 }
 0x3ba   :  { %v2947_v15 = vadd.f32 %v2945_v31, %v2906_v48  ;;  %v3277_v31 = vld [vmem:[%s8183_s19 + $0x18] sm:$0xff]  ;;  %v3276_v48 = vld [vmem:[%s8183_s19 + $0x10] sm:$0xff] }
 0x3bb   :  { %3301 = vmatpush.msra.mxu0 %v3277_v31 }
 0x3bd   :  { %3302 = vmatpush.msra.mxu0 %v3276_v48 }
 0x3dc   :  { %v2968_v21 = vpop.f32.mrf.mxu3 }
 0x3e7   :  { %v2988_v1 = vpop.f32.mrf.mxu2 }
 0x3e8   :  { %v2989_v42 = vadd.f32 %v2988_v1, %v2968_v21  ;;  %v3275_v21 = vld [vmem:[%s8183_s19 + $0x8] sm:$0xff]  ;;  %v3317_v1 = vld [vmem:[%s8186_s21 + $0x38] sm:$0xff] }
 0x3e9   :  { %3333 = vmatpush.msrb.mxu1 %v3317_v1  ;;  %3303 = vmatpush.msra.mxu0 %v3275_v21 }
 0x3ea   :  { %v2991_v10 = vadd.f32 %v2989_v42, %v2947_v15  ;;  %v3316_v15 = vld [vmem:[%s8186_s21 + $0x30] sm:$0xff]  ;;  %v3274_v42 = vld [vmem:[%s8183_s19] sm:$0xff] }
 0x3eb   :  { %3334 = vmatpush.msrb.mxu1 %v3316_v15  ;;  %3304 = vmatpush.msra.mxu0 %v3274_v42 }
 0x3ec   :  { %v2992_v24 = vmax.f32 %v2991_v10, 0.0  ;;  %v3315_v10 = vld [vmem:[%s8186_s21 + $0x28] sm:$0xff] }
 0x3ed   :  { %3335 = vmatpush.msrb.mxu1 %v3315_v10 }
 0x3ee   :  { %3656 = vmatmul.msk.f32.vlgmr.msra.gmra.mxu2 %vm1158_vm1, %v2992_v24  ;;  %v3314_v24 = vld [vmem:[%s8186_s21 + $0x20] sm:$0xff] }
 0x3ef   :  { %3336 = vmatpush.msrb.mxu1 %v3314_v24 }
 0x3f1   :  { %3337 = vmatpush.msrb.mxu1 %v3313_v4 }
 0x404   :  { %v3026_v39 = vpop.f32.mrf.mxu0 }
 0x405   :  { %v3032_v59 = vadd.f32 %v3667_v30, %v3026_v39  ;;  %v3671_v39 = vld [vmem:[%s8184_s18] ss:$0 sm:$0xff] }
 0x40c   :  { %v3212_v7 = vpop.f32.mrf.mxu0 }
 0x428   :  { %v3066_v57 = vpop.f32.mrf.mxu1 }
 0x429   :  { %v3069_v16 = vadd.f32 %v3066_v57, %v3032_v59 }
 0x471   :  { %v3103_v14 = vpop.f32.mrf.mxu2 }
 0x472   :  { %v3106_v17 = vadd.f32 %v3103_v14, %v3069_v16  ;;  %v3312_v14 = vld [vmem:[%s8186_s21 + $0x10] sm:$0xff] }
 0x473   :  { %3338 = vmatpush.msrb.mxu1 %v3312_v14 }
 0x474   :  { %v3107_v34 = vmax.f32 %v3106_v17, 0.0  ;;  %v3311_v17 = vld [vmem:[%s8186_s21 + $0x8] sm:$0xff] }
 0x475   :  { %3339 = vmatpush.msrb.mxu1 %v3311_v17 }
 0x476   :  { %3657 = vmatmul.msk.f32.vlgmr.msrb.gmra.mxu3 %vm2560_vm2, %v3107_v34  ;;  %v3310_v34 = vld [vmem:[%s8186_s21] sm:$0xff] }
 0x477   :  { %3340 = vmatpush.msrb.mxu1 %v3310_v34 }
 0x47e   :  { %3662 = vmatmul.msk.f32.vlgmr.msra.gmra.mxu3 %vm3239_vm7, %v3181_v47 }
 0x4f9   :  { %v3136_v27 = vpop.f32.mrf.mxu3 }
 0x4fa   :  { %v3137_v56 = vadd.f32 %v3668_v20, %v3136_v27  ;;  %v3672_v20 = vld [vmem:[%s8185_s20] ss:$0 sm:$0xff] }
 0x4fc   :  { %v3140_v50 = vsel %vm3139_vm3, %v3137_v56, 0.0 }
 0x4fd   :  { %3141 = vadd.xlane.f32.xlu0 %v3140_v50 }
 0x501   :  { %v3264_v61 = vpop.f32.mrf.mxu3 }
 0x570   :  { %v3142_v25 = vpop.xlane.xlu0 %3141 }
 0x571   :  { %v3150_v53 = vmul.f32 %v3149_v37, %v3142_v25 }
 0x573   :  { %v3151_v3 = vsub.f32 %v3137_v56, %v3150_v53 }
 0x575   :  { %v3152_v62 = vmul.f32 %v3151_v3, %v3151_v3 }
 0x577   :  { %v3153_v6 = vsel %vm3139_vm3, %v3152_v62, 0.0 }
 0x578   :  { %3154 = vadd.xlane.f32.xlu0 %v3153_v6 }
 0x5eb   :  { %v3155_v35 = vpop.xlane.xlu0 %3154 }
 0x5ec   :  { %v3156_v60 = vmul.f32 %v3155_v35, %v3149_v37 }
 0x5ee   :  { %v3157_v44 = vadd.f32 1e-05, %v3156_v60 }
 0x5f0   :  { %3676 = vrsqrt.f32 %v3157_v44  ;;  %vm3164_vm10 = vweird.f32 %v3157_v44 }
 0x5f6   :  { %v3677_v2 = vpop.eup %3676 }
 0x5f7   :  { %v3159_v18 = vmul.f32 %v3677_v2, %v3157_v44  ;;  %vm3165_vm9 = vweird.f32 %v3677_v2 }
 0x5f8   :  { %vm3166_vm11 = vmor %vm3164_vm10, %vm3165_vm9 }
 0x5f9   :  { %v3160_v11 = vmul.f32 %v3677_v2, %v3159_v18 }
 0x5fb   :  { %v3161_v5 = vmul.f32 0.5, %v3160_v11 }
 0x5fd   :  { %v3162_v40 = vsub.f32 1.5, %v3161_v5 }
 0x5ff   :  { %v3163_v45 = vmul.f32 %v3677_v2, %v3162_v40 }
 0x601   :  { %v3167_v26 = vsel %vm3166_vm11, %v3677_v2, %v3163_v45 }
 0x602   :  { %v3168_v29 = vmul.f32 %v3167_v26, %v3151_v3 }
 0x604   :  { %v3173_v55 = vmul.f32 %v3669_v32, %v3168_v29 }
 0x606   :  { %v3178_v54 = vadd.f32 %v3670_v52, %v3173_v55 }
 0x608   :  { %3678 = vtanh.f32 %v3178_v54 }
 0x60e   :  { %v3679_v41 = vpop.eup %3678 }
 0x60f   :  { %3660 = vmatmul.msk.f32.vlgmr.msra.gmra.mxu1 %vm2560_vm2, %v3679_v41 }
 0x68c   :  { %v3235_v43 = vpop.f32.mrf.mxu1 }
 0x68d   :  { %v3236_v30 = vadd.f32 %v3235_v43, %v3212_v7 }
 0x68f   :  { %v3267_v57 = vadd.f32 %v3264_v61, %v3236_v30 }
 0x691   :  { %v3272_v59 = vadd.f32 %v3671_v39, %v3267_v57 }
 0x693   :  { %v3273_v16 = vmax.f32 %v3272_v59, 0.0 }
 0x695   :  { %3663 = vmatmul.msk.f32.vlgmr.msra.gmra.mxu0 %vm120_vm0, %v3273_v16 }
 0x712   :  { %v3306_v27 = vpop.f32.mrf.mxu0 }
 0x713   :  { %v3307_v56 = vadd.f32 %v3672_v20, %v3306_v27 }
 0x715   :  { %v3309_v50 = vmax.f32 %v3307_v56, 0.0 }
 0x717   :  { %3664 = vmatmul.msk.f32.vlgmr.msrb.gmra.mxu1 %vm120_vm0, %v3309_v50 }
 0x794   :  { %v3342_v46 = vpop.f32.mrf.mxu1 }
 0x795   :  { %v3343_v63 = vadd.f32 %v3673_v13, %v3342_v46 }
 0x797   :  { %3346 = vst.msk [vmem:[%s8188_s23] sm:$0x3] %vm3345_vm12, %v3343_v63 }

</bundles_post_ra>
